<compile_context>
chip_gen: v5e
topology: v5e:2x2
jax: 0.10.0
libtpu: 0.0.40
codegen_flags: <defaults>
</compile_context>

<pallas_src>
import numpy as np
import jax
import jax.numpy as jnp
from jax.experimental import pallas as pl
from jax.experimental.pallas import tpu as pltpu

# ----------------------------- model config ---------------------------------
BATCH = 4
HIST_LEN = 16
N_CONT = 2                 # number of continuous features
NUM_COEFS = 4              # periodic_activation_num_coefs
SIGMA = 1.0                # periodic_activation_sigma
CONT_EMB_DIM = 8
CAT_VOCAB = 10             # vocab_size (table has vocab_size + 1 rows)
CAT_PAD = 16               # one-hot lane width (>= vocab_size + 1, 8-aligned)
CAT_EMB_DIM = 8
EMB_TOTAL = N_CONT * CONT_EMB_DIM + CAT_EMB_DIM      # 24
OUT_CHANNELS = [32, 32]
KERNEL_SIZES = [3, 3]
POOLING_SIZES = [2, 2]
HEAD_HIDDEN = 32
HEAD_OUT = 4
L_LAST = HIST_LEN // (POOLING_SIZES[0] * POOLING_SIZES[1])   # 4
TWO_PI = 2.0 * np.pi

FUSED_EMB_IN = N_CONT * (2 * NUM_COEFS) + N_CONT             # 18
FUSED_EMB_OUT = N_CONT * CONT_EMB_DIM                        # 16

# ---------------------- packed-weight buffer layout --------------------------
def _pack_layout():
    sizes = [
        ("pa",   N_CONT),                               # periodic coefs * 2*pi
        ("etab", CAT_PAD),                              # categorical emb table (padded)
        ("wemb", FUSED_EMB_IN),                         # fused cont-emb weight
        ("bemb", 1),
        ("wc1",  KERNEL_SIZES[0] * EMB_TOTAL),          # fused conv1 taps
        ("bc1",  1),
        ("wc2",  KERNEL_SIZES[1] * OUT_CHANNELS[0]),    # fused conv2 taps
        ("bc2",  1),
        ("wh1",  L_LAST * OUT_CHANNELS[-1]),            # head layer 1 (L*C, H)
        ("bh1",  1),
        ("wh2",  HEAD_HIDDEN),                          # head layer 2 (H, OUT)
        ("bh2",  1),
    ]
    off, layout = 0, {}
    for name, rows in sizes:
        layout[name] = off
        off = ((off + rows + 7) // 8) * 8               # 8-aligned row slabs
    return layout, off

PACK_OFF, PACK_ROWS = _pack_layout()                    # PACK_ROWS == 416
PACK_W = 32                                             # widest packed weight

SCR_ROWS = BATCH * HIST_LEN                             # 64
SCR_W = OUT_CHANNELS[0]                                 # 32 (== OUT_CHANNELS[1])


# ------------------------------- kernel -------------------------------------
def net_kernel(x_ref, ids_ref, wp_ref, out_ref, scr_ref):
    rows = BATCH * HIST_LEN
    xc = x_ref[...]                                     # (64, N_CONT) continuous
    ids = ids_ref[...]                                  # (64, 1) int32 categorical

    # --- fused continuous embeddings: periodic features + block-diag Linear + ReLU
    pa = wp_ref[PACK_OFF["pa"]:PACK_OFF["pa"] + N_CONT, 0:NUM_COEFS]   # (2,4), pre-scaled 2*pi
    per = jnp.concatenate(
        [xc[:, f:f + 1] * pa[f:f + 1, :] for f in range(N_CONT)], axis=-1)         # (64, 8)
    feat = jnp.concatenate([jnp.sin(per), jnp.cos(per), xc], axis=-1)               # (64, 18)
    w_emb = wp_ref[PACK_OFF["wemb"]:PACK_OFF["wemb"] + FUSED_EMB_IN, 0:FUSED_EMB_OUT]
    b_emb = wp_ref[PACK_OFF["bemb"]:PACK_OFF["bemb"] + 1, 0:FUSED_EMB_OUT]
    emb = jnp.maximum(
        jnp.dot(feat, w_emb, preferred_element_type=jnp.float32) + b_emb, 0.0)      # (64, 16)

    # --- categorical embedding (nn.Embedding) as a one-hot MXU matmul
    etab = wp_ref[PACK_OFF["etab"]:PACK_OFF["etab"] + CAT_PAD, 0:CAT_EMB_DIM]       # (16, 8)
    lane = jax.lax.broadcasted_iota(jnp.int32, (rows, CAT_PAD), 1)
    onehot = (lane == ids).astype(jnp.float32)                                      # (64, 16)
    cat_emb = jnp.dot(onehot, etab, preferred_element_type=jnp.float32)             # (64, 8)

    # channel concat of continuous + categorical embeddings
    x = jnp.concatenate([emb, cat_emb], axis=-1)                                    # (64, 24)

    # --- Conv1d -> MaxPool1d -> ReLU blocks (taps fused, pool via strided reads)
    def conv_pool_relu(x, n_rows, t_len, c_in, c_out, pool, w_off, b_off):
        zero_row = jnp.zeros((1, c_in), dtype=x.dtype)
        x_prev = jnp.concatenate([zero_row, x[:n_rows - 1, :]], axis=0)   # row r -> x[r-1]
        x_next = jnp.concatenate([x[1:, :], zero_row], axis=0)           # row r -> x[r+1]
        # mask halo rows at per-batch boundaries (rows are b*t_len + t)
        tmod = jax.lax.broadcasted_iota(jnp.int32, (n_rows, c_in), 0) % t_len
        x_prev = jnp.where(tmod != 0, x_prev, 0.0)
        x_next = jnp.where(tmod != t_len - 1, x_next, 0.0)
        feat = jnp.concatenate([x_prev, x, x_next], axis=-1)              # (n_rows, 3*c_in)
        w = wp_ref[w_off:w_off + 3 * c_in, 0:c_out]
        y = jnp.dot(feat, w, preferred_element_type=jnp.float32)          # (n_rows, c_out)
        # maxpool over time; t_len % pool == 0 so pairs never span batch boundaries
        scr_ref[0:n_rows, :] = y
        n_out = n_rows // pool
        m = scr_ref[pl.ds(0, n_out, stride=pool), :]
        for p in range(1, pool):
            m = jnp.maximum(m, scr_ref[pl.ds(p, n_out, stride=pool), :])
        b = wp_ref[b_off:b_off + 1, 0:c_out]
        return jnp.maximum(m + b, 0.0)                                    # (n_out, c_out)

    x = conv_pool_relu(x, rows, HIST_LEN, EMB_TOTAL, OUT_CHANNELS[0],
                       POOLING_SIZES[0], PACK_OFF["wc1"], PACK_OFF["bc1"])    # (32, 32)
    rows //= POOLING_SIZES[0]
    t_len = HIST_LEN // POOLING_SIZES[0]
    x = conv_pool_relu(x, rows, t_len, OUT_CHANNELS[0], OUT_CHANNELS[1],
                       POOLING_SIZES[1], PACK_OFF["wc2"], PACK_OFF["bc2"])    # (16, 32)
    rows //= POOLING_SIZES[1]                                                  # 16 = B * L_LAST

    # --- head: PyTorch's C-major flatten folded into the (L*C, H) weight layout.
    # Gather rows (b, l) into a (B, L*C) = (4, 128) tile with stride-L reads.
    scr_ref[0:rows, :] = x
    xh = jnp.concatenate(
        [scr_ref[pl.ds(l, BATCH, stride=L_LAST), :] for l in range(L_LAST)],
        axis=-1)                                                               # (4, 128)
    w1 = wp_ref[PACK_OFF["wh1"]:PACK_OFF["wh1"] + L_LAST * OUT_CHANNELS[-1], 0:HEAD_HIDDEN]
    b1 = wp_ref[PACK_OFF["bh1"]:PACK_OFF["bh1"] + 1, 0:HEAD_HIDDEN]
    h = jnp.maximum(jnp.dot(xh, w1, preferred_element_type=jnp.float32) + b1, 0.0)  # (4, 32)
    w2 = wp_ref[PACK_OFF["wh2"]:PACK_OFF["wh2"] + HEAD_HIDDEN, 0:HEAD_OUT]
    b2 = wp_ref[PACK_OFF["bh2"]:PACK_OFF["bh2"] + 1, 0:HEAD_OUT]
    out_ref[...] = jnp.dot(h, w2, preferred_element_type=jnp.float32) + b2          # (4, 4)


# -------------------------- weight packing (glue) -----------------------------
def build_weight_pack(params):
    wpack = jnp.zeros((PACK_ROWS, PACK_W), jnp.float32)

    def put(buf, off, arr):
        r, c = arr.shape
        return buf.at[off:off + r, 0:c].set(arr.astype(jnp.float32))

    # periodic-activation coefficients, pre-scaled by 2*pi
    wpack = put(wpack, PACK_OFF["pa"], params["pa"] * TWO_PI)

    # categorical embedding table, padded to CAT_PAD rows for the one-hot matmul
    etab = jnp.zeros((CAT_PAD, CAT_EMB_DIM), jnp.float32)
    etab = etab.at[0:CAT_VOCAB + 1, :].set(params["emb_table"].astype(jnp.float32))
    wpack = put(wpack, PACK_OFF["etab"], etab)

    # block-diagonal fused ContinuousEmbedding weight.  Kernel feature lanes are:
    # [sin(f0) sin(f1) cos(f0) cos(f1) x0 x1]; outputs [emb_f0 emb_f1].
    w_emb = jnp.zeros((FUSED_EMB_IN, FUSED_EMB_OUT), jnp.float32)
    for f in range(N_CONT):
        wt = params["cont_w_torch"][f]                      # (E, 2*NC+1): [sin | cos | x]
        c0 = f * CONT_EMB_DIM
        w_emb = w_emb.at[f * NUM_COEFS:(f + 1) * NUM_COEFS,
                         c0:c0 + CONT_EMB_DIM].set(wt[:, 0:NUM_COEFS].T)
        w_emb = w_emb.at[N_CONT * NUM_COEFS + f * NUM_COEFS:
                         N_CONT * NUM_COEFS + (f + 1) * NUM_COEFS,
                         c0:c0 + CONT_EMB_DIM].set(wt[:, NUM_COEFS:2 * NUM_COEFS].T)
        w_emb = w_emb.at[2 * N_CONT * NUM_COEFS + f,
                         c0:c0 + CONT_EMB_DIM].set(wt[:, 2 * NUM_COEFS])
    wpack = put(wpack, PACK_OFF["wemb"], w_emb)
    wpack = put(wpack, PACK_OFF["bemb"], params["cont_b"].reshape(1, -1))

    # conv taps fused: (Cout, Cin, k) -> (k*Cin, Cout), tap j in rows [j*Cin:(j+1)*Cin]
    def fuse_conv(w_torch):
        return jnp.concatenate([w_torch[:, :, j].T for j in range(w_torch.shape[2])], axis=0)

    wpack = put(wpack, PACK_OFF["wc1"], fuse_conv(params["conv1_w_torch"]))
    wpack = put(wpack, PACK_OFF["bc1"], params["conv1_b"].reshape(1, -1))
    wpack = put(wpack, PACK_OFF["wc2"], fuse_conv(params["conv2_w_torch"]))
    wpack = put(wpack, PACK_OFF["bc2"], params["conv2_b"].reshape(1, -1))

    # head layer 1: PyTorch flattens (C, L) C-major; re-lay rows to index l*C + c
    H, C, L = HEAD_HIDDEN, OUT_CHANNELS[-1], L_LAST
    w1 = params["head_w1_torch"].T.reshape(C, L, H).transpose(1, 0, 2).reshape(L * C, H)
    wpack = put(wpack, PACK_OFF["wh1"], w1)
    wpack = put(wpack, PACK_OFF["bh1"], params["head_b1"].reshape(1, -1))
    wpack = put(wpack, PACK_OFF["wh2"], params["head_w2_torch"].T)
    wpack = put(wpack, PACK_OFF["bh2"], params["head_b2"].reshape(1, -1))
    return wpack


# ------------------------------ wrapper --------------------------------------
@jax.jit
def net_forward(x_cont, cat_ids, params):
    B, T, _ = x_cont.shape
    assert B == BATCH and T == HIST_LEN
    assert HIST_LEN % POOLING_SIZES[0] == 0
    assert (HIST_LEN // POOLING_SIZES[0]) % POOLING_SIZES[1] == 0
    assert OUT_CHANNELS[0] == SCR_W and OUT_CHANNELS[1] == SCR_W
    assert CAT_VOCAB + 1 <= CAT_PAD

    x_in = x_cont.reshape(B * T, N_CONT).astype(jnp.float32)        # rows = b*T + t
    ids_in = cat_ids.reshape(B * T, 1).astype(jnp.int32)
    wpack = build_weight_pack(params)

    out = pl.pallas_call(
        net_kernel,
        out_shape=jax.ShapeDtypeStruct((B, HEAD_OUT), jnp.float32),
        grid_spec=pltpu.PrefetchScalarGridSpec(
            num_scalar_prefetch=0,
            grid=(1,),
            in_specs=[
                pl.BlockSpec((B * T, N_CONT), lambda i: (0, 0)),
                pl.BlockSpec((B * T, 1), lambda i: (0, 0)),
                pl.BlockSpec((PACK_ROWS, PACK_W), lambda i: (0, 0)),
            ],
            out_specs=pl.BlockSpec((B, HEAD_OUT), lambda i: (0, 0)),
            scratch_shapes=[pltpu.VMEM((SCR_ROWS, SCR_W), jnp.float32)],
        ),
        compiler_params=pltpu.CompilerParams(dimension_semantics=("arbitrary",)),
    )(x_in, ids_in, wpack)
    return out


# ------------------------- pure-JAX reference --------------------------------
def reference_forward(x_cont, cat_ids, params):
    B, T, _ = x_cont.shape
    with jax.default_matmul_precision("highest"):
        embs = []
        for f in range(N_CONT):
            xf = x_cont[:, :, f:f + 1]
            xper = xf * params["pa"][f] * TWO_PI
            feat = jnp.concatenate([jnp.sin(xper), jnp.cos(xper), xf], axis=-1)
            e = jax.nn.relu(
                jnp.einsum("btk,ek->bte", feat, params["cont_w_torch"][f])
                + params["cont_b"][f])
            embs.append(e)
        embs.append(params["emb_table"][cat_ids])
        x = jnp.concatenate(embs, axis=-1)                  # (B, T, EMB_TOTAL)
        x = jnp.transpose(x, (0, 2, 1))                     # NCL
        convs = [(params["conv1_w_torch"], params["conv1_b"]),
                 (params["conv2_w_torch"], params["conv2_b"])]
        for i, (w, b) in enumerate(convs):
            pad = (KERNEL_SIZES[i] - 1) // 2
            x = jax.lax.conv_general_dilated(
                x, w, window_strides=(1,), padding=[(pad, pad)],
                dimension_numbers=("NCH", "OIH", "NCH"))
            x = x + b[None, :, None]
            pool = POOLING_SIZES[i]
            Bc, C, L = x.shape
            x = x.reshape(Bc, C, L // pool, pool).max(axis=-1)
            x = jax.nn.relu(x)
        x = x.reshape(B, -1)
        h = jax.nn.relu(x @ params["head_w1_torch"].T + params["head_b1"])
        return h @ params["head_w2_torch"].T + params["head_b2"]


# ------------------------------- main -----------------------------------------
def make_params(key):
    ks = jax.random.split(key, 12)
    in_head = L_LAST * OUT_CHANNELS[-1]
    return {
        "pa": jax.random.normal(ks[0], (N_CONT, NUM_COEFS), jnp.float32) * SIGMA,
        "cont_w_torch": jax.random.normal(ks[1], (N_CONT, CONT_EMB_DIM, 2 * NUM_COEFS + 1), jnp.float32) * 0.2,
        "cont_b": jax.random.normal(ks[2], (N_CONT, CONT_EMB_DIM), jnp.float32) * 0.1,
        "emb_table": jax.random.normal(ks[3], (CAT_VOCAB + 1, CAT_EMB_DIM), jnp.float32) * 0.5,
        "conv1_w_torch": jax.random.normal(ks[4], (OUT_CHANNELS[0], EMB_TOTAL, KERNEL_SIZES[0]), jnp.float32) * 0.1,
        "conv1_b": jax.random.normal(ks[5], (OUT_CHANNELS[0],), jnp.float32) * 0.1,
        "conv2_w_torch": jax.random.normal(ks[6], (OUT_CHANNELS[1], OUT_CHANNELS[0], KERNEL_SIZES[1]), jnp.float32) * 0.1,
        "conv2_b": jax.random.normal(ks[7], (OUT_CHANNELS[1],), jnp.float32) * 0.1,
        "head_w1_torch": jax.random.normal(ks[8], (HEAD_HIDDEN, in_head), jnp.float32) * 0.1,
        "head_b1": jax.random.normal(ks[9], (HEAD_HIDDEN,), jnp.float32) * 0.1,
        "head_w2_torch": jax.random.normal(ks[10], (HEAD_OUT, HEAD_HIDDEN), jnp.float32) * 0.1,
        "head_b2": jax.random.normal(ks[11], (HEAD_OUT,), jnp.float32) * 0.1,
    }


if __name__ == "__main__":
    key = jax.random.PRNGKey(0)
    kp, kx, kc = jax.random.split(key, 3)
    params = make_params(kp)

    # continuous features: (B, T, N_CONT); categorical ids: (B, T) in [0, CAT_VOCAB]
    x_cont = jax.random.normal(kx, (BATCH, HIST_LEN, N_CONT), jnp.float32)
    cat_ids = jax.random.randint(kc, (BATCH, HIST_LEN), 0, CAT_VOCAB + 1, dtype=jnp.int32)

    out = jax.block_until_ready(net_forward(x_cont, cat_ids, params))
    ref = jax.block_until_ready(reference_forward(x_cont, cat_ids, params))

    assert out.shape == (BATCH, HEAD_OUT)
    np.testing.assert_allclose(np.asarray(out), np.asarray(ref), rtol=1e-3, atol=1e-3)

    # TODO(synk): BatchNorm1d / LayerNorm / Dropout branches are disabled in this
    # config (batchnorm=False, layernorm=False, dropout=0.0), matching eval-mode
    # semantics of the reference module for these hyperparameters.
    print("KERNEL_OK")
</pallas_src>

<mosaic_0001>
module attributes {stable_mosaic.version = 11 : i64} {
  func.func @net_kernel(%arg0: i32, %arg1: memref<64x2xf32, #tpu.memory_space<vmem>>, %arg2: memref<64x1xi32, #tpu.memory_space<vmem>>, %arg3: memref<416x32xf32, #tpu.memory_space<vmem>>, %arg4: memref<4x4xf32, #tpu.memory_space<vmem>>, %arg5: memref<64x32xf32, #tpu.memory_space<vmem>>) attributes {dimension_semantics = [#tpu.dimension_semantics<arbitrary>], iteration_bounds = array<i64: 1>, scalar_prefetch = 0 : i64, scratch_operands = 1 : i64, tpu.core_type = #tpu.core_type<tc>, window_params = [{pipeline_mode = #tpu.pipeline_mode<synchronous>, transform_indices = @transform_0, window_bounds = array<i64: 64, 2>}, {pipeline_mode = #tpu.pipeline_mode<synchronous>, transform_indices = @transform_1, window_bounds = array<i64: 64, 1>}, {pipeline_mode = #tpu.pipeline_mode<synchronous>, transform_indices = @transform_2, window_bounds = array<i64: 416, 32>}, {pipeline_mode = #tpu.pipeline_mode<synchronous>, transform_indices = @transform_3, window_bounds = array<i64: 4, 4>}]} {
    %c0 = arith.constant 0 : index
    %c0_0 = arith.constant 0 : index
    %0 = vector.load %arg1[%c0, %c0_0] : memref<64x2xf32, #tpu.memory_space<vmem>>, vector<64x2xf32>
    %c0_1 = arith.constant 0 : index
    %c0_2 = arith.constant 0 : index
    %1 = vector.load %arg2[%c0_1, %c0_2] : memref<64x1xi32, #tpu.memory_space<vmem>>, vector<64x1xi32>
    %c0_3 = arith.constant 0 : index
    %c0_4 = arith.constant 0 : index
    %2 = vector.load %arg3[%c0_3, %c0_4] : memref<416x32xf32, #tpu.memory_space<vmem>>, vector<2x4xf32>
    %3 = vector.extract_strided_slice %0 {offsets = [0, 0], sizes = [64, 1], strides = [1, 1]} : vector<64x2xf32> to vector<64x1xf32>
    %4 = vector.extract_strided_slice %2 {offsets = [0, 0], sizes = [1, 4], strides = [1, 1]} : vector<2x4xf32> to vector<1x4xf32>
    %5 = vector.broadcast %3 : vector<64x1xf32> to vector<64x4xf32>
    %6 = vector.broadcast %4 : vector<1x4xf32> to vector<64x4xf32>
    %7 = arith.mulf %5, %6 : vector<64x4xf32>
    %8 = vector.extract_strided_slice %0 {offsets = [0, 1], sizes = [64, 1], strides = [1, 1]} : vector<64x2xf32> to vector<64x1xf32>
    %9 = vector.extract_strided_slice %2 {offsets = [1, 0], sizes = [1, 4], strides = [1, 1]} : vector<2x4xf32> to vector<1x4xf32>
    %10 = vector.broadcast %8 : vector<64x1xf32> to vector<64x4xf32>
    %11 = vector.broadcast %9 : vector<1x4xf32> to vector<64x4xf32>
    %12 = arith.mulf %10, %11 : vector<64x4xf32>
    %13 = tpu.concatenate %7, %12 in 1 : vector<64x4xf32>, vector<64x4xf32> -> vector<64x8xf32>
    %14 = math.sin %13 : vector<64x8xf32>
    %15 = math.cos %13 : vector<64x8xf32>
    %16 = tpu.concatenate %14, %15, %0 in 1 : vector<64x8xf32>, vector<64x8xf32>, vector<64x2xf32> -> vector<64x18xf32>
    %c24 = arith.constant 24 : index
    %c0_5 = arith.constant 0 : index
    %17 = vector.load %arg3[%c24, %c0_5] : memref<416x32xf32, #tpu.memory_space<vmem>>, vector<18x16xf32>
    %c48 = arith.constant 48 : index
    %c0_6 = arith.constant 0 : index
    %18 = vector.load %arg3[%c48, %c0_6] : memref<416x32xf32, #tpu.memory_space<vmem>>, vector<1x16xf32>
    %cst = arith.constant dense<0.000000e+00> : vector<64x16xf32>
    %19 = tpu.matmul %16, %17, %cst {dimension_numbers = #tpu.dot_dimension_numbers<[1], [0], [0], [1], [0, 0, 1, 1], [], []>} : vector<64x18xf32>, vector<18x16xf32>, vector<64x16xf32> -> vector<64x16xf32>
    %20 = vector.broadcast %18 : vector<1x16xf32> to vector<64x16xf32>
    %21 = arith.addf %19, %20 : vector<64x16xf32>
    %cst_7 = arith.constant 0.000000e+00 : f32
    %22 = vector.broadcast %cst_7 : f32 to vector<64x16xf32>
    %23 = arith.maximumf %21, %22 : vector<64x16xf32>
    %c8 = arith.constant 8 : index
    %c0_8 = arith.constant 0 : index
    %24 = vector.load %arg3[%c8, %c0_8] : memref<416x32xf32, #tpu.memory_space<vmem>>, vector<16x8xf32>
    %25 = tpu.iota {dimensions = array<i32: 1>} : vector<64x16xi32>
    %26 = vector.broadcast %1 : vector<64x1xi32> to vector<64x16xi32>
    %27 = arith.cmpi eq, %25, %26 : vector<64x16xi32>
    %28 = arith.extui %27 : vector<64x16xi1> to vector<64x16xi32>
    %29 = arith.sitofp %28 : vector<64x16xi32> to vector<64x16xf32>
    %cst_9 = arith.constant dense<0.000000e+00> : vector<64x8xf32>
    %30 = tpu.matmul %29, %24, %cst_9 {dimension_numbers = #tpu.dot_dimension_numbers<[1], [0], [0], [1], [0, 0, 1, 1], [], []>} : vector<64x16xf32>, vector<16x8xf32>, vector<64x8xf32> -> vector<64x8xf32>
    %31 = tpu.concatenate %23, %30 in 1 : vector<64x16xf32>, vector<64x8xf32> -> vector<64x24xf32>
    %cst_10 = arith.constant 0.000000e+00 : f32
    %32 = vector.broadcast %cst_10 : f32 to vector<1x24xf32>
    %33 = vector.extract_strided_slice %31 {offsets = [0, 0], sizes = [63, 24], strides = [1, 1]} : vector<64x24xf32> to vector<63x24xf32>
    %34 = tpu.concatenate %32, %33 in 0 : vector<1x24xf32>, vector<63x24xf32> -> vector<64x24xf32>
    %35 = vector.extract_strided_slice %31 {offsets = [1, 0], sizes = [63, 24], strides = [1, 1]} : vector<64x24xf32> to vector<63x24xf32>
    %36 = tpu.concatenate %35, %32 in 0 : vector<63x24xf32>, vector<1x24xf32> -> vector<64x24xf32>
    %37 = tpu.iota {dimensions = array<i32: 0>} : vector<64x24xi32>
    %c16_i32 = arith.constant 16 : i32
    %c0_i32 = arith.constant 0 : i32
    %38 = arith.cmpi eq, %c16_i32, %c0_i32 : i32
    %c1_i32 = arith.constant 1 : i32
    %39 = arith.select %38, %c1_i32, %c16_i32 : i32
    %40 = vector.broadcast %39 : i32 to vector<64x24xi32>
    %41 = arith.remsi %37, %40 : vector<64x24xi32>
    %c0_i32_11 = arith.constant 0 : i32
    %42 = vector.broadcast %c0_i32_11 : i32 to vector<64x24xi32>
    %43 = arith.cmpi ne, %41, %42 : vector<64x24xi32>
    %c0_i32_12 = arith.constant 0 : i32
    %44 = vector.broadcast %c0_i32_12 : i32 to vector<64x24xi32>
    %45 = arith.cmpi slt, %41, %44 : vector<64x24xi32>
    %c0_i32_13 = arith.constant 0 : i32
    %46 = arith.cmpi slt, %39, %c0_i32_13 : i32
    %47 = vector.broadcast %46 : i1 to vector<64x24xi1>
    %48 = vector.broadcast %47 : vector<64x24xi1> to vector<64x24xi1>
    %49 = arith.xori %45, %48 : vector<64x24xi1>
    %50 = arith.andi %49, %43 : vector<64x24xi1>
    %51 = vector.broadcast %39 : i32 to vector<64x24xi32>
    %52 = arith.addi %41, %51 : vector<64x24xi32>
    %53 = arith.select %50, %52, %41 : vector<64x24xi1>, vector<64x24xi32>
    %c0_i32_14 = arith.constant 0 : i32
    %54 = vector.broadcast %c0_i32_14 : i32 to vector<64x24xi32>
    %55 = arith.cmpi ne, %53, %54 : vector<64x24xi32>
    %cst_15 = arith.constant 0.000000e+00 : f32
    %56 = vector.broadcast %cst_15 : f32 to vector<64x24xf32>
    %57 = arith.select %55, %34, %56 : vector<64x24xi1>, vector<64x24xf32>
    %c15_i32 = arith.constant 15 : i32
    %58 = vector.broadcast %c15_i32 : i32 to vector<64x24xi32>
    %59 = arith.cmpi ne, %53, %58 : vector<64x24xi32>
    %cst_16 = arith.constant 0.000000e+00 : f32
    %60 = vector.broadcast %cst_16 : f32 to vector<64x24xf32>
    %61 = arith.select %59, %36, %60 : vector<64x24xi1>, vector<64x24xf32>
    %62 = tpu.concatenate %57, %31, %61 in 1 : vector<64x24xf32>, vector<64x24xf32>, vector<64x24xf32> -> vector<64x72xf32>
    %c56 = arith.constant 56 : index
    %c0_17 = arith.constant 0 : index
    %63 = vector.load %arg3[%c56, %c0_17] : memref<416x32xf32, #tpu.memory_space<vmem>>, vector<72x32xf32>
    %cst_18 = arith.constant dense<0.000000e+00> : vector<64x32xf32>
    %64 = tpu.matmul %62, %63, %cst_18 {dimension_numbers = #tpu.dot_dimension_numbers<[1], [0], [0], [1], [0, 0, 1, 1], [], []>} : vector<64x72xf32>, vector<72x32xf32>, vector<64x32xf32> -> vector<64x32xf32>
    %c0_19 = arith.constant 0 : index
    %c0_20 = arith.constant 0 : index
    %65 = vector.load %arg5[%c0_19, %c0_20] : memref<64x32xf32, #tpu.memory_space<vmem>>, vector<64x32xf32>
    tpu.vector_store %arg5[%c0_19, %c0_20], %64 {strides = array<i32>} : memref<64x32xf32, #tpu.memory_space<vmem>>, vector<64x32xf32>,
    %c0_21 = arith.constant 0 : index
    %c0_22 = arith.constant 0 : index
    %66 = tpu.strided_load %arg5[%c0_21, %c0_22] {strides = array<i32: 2, 1>} : memref<64x32xf32, #tpu.memory_space<vmem>>, vector<32x32xf32>
    %c1 = arith.constant 1 : index
    %c0_23 = arith.constant 0 : index
    %67 = tpu.strided_load %arg5[%c1, %c0_23] {strides = array<i32: 2, 1>} : memref<64x32xf32, #tpu.memory_space<vmem>>, vector<32x32xf32>
    %68 = arith.maximumf %66, %67 : vector<32x32xf32>
    %c128 = arith.constant 128 : index
    %c0_24 = arith.constant 0 : index
    %69 = vector.load %arg3[%c128, %c0_24] : memref<416x32xf32, #tpu.memory_space<vmem>>, vector<1x32xf32>
    %70 = vector.broadcast %69 : vector<1x32xf32> to vector<32x32xf32>
    %71 = arith.addf %68, %70 : vector<32x32xf32>
    %cst_25 = arith.constant 0.000000e+00 : f32
    %72 = vector.broadcast %cst_25 : f32 to vector<32x32xf32>
    %73 = arith.maximumf %71, %72 : vector<32x32xf32>
    %cst_26 = arith.constant 0.000000e+00 : f32
    %74 = vector.broadcast %cst_26 : f32 to vector<1x32xf32>
    %75 = vector.extract_strided_slice %73 {offsets = [0, 0], sizes = [31, 32], strides = [1, 1]} : vector<32x32xf32> to vector<31x32xf32>
    %76 = tpu.concatenate %74, %75 in 0 : vector<1x32xf32>, vector<31x32xf32> -> vector<32x32xf32>
    %77 = vector.extract_strided_slice %73 {offsets = [1, 0], sizes = [31, 32], strides = [1, 1]} : vector<32x32xf32> to vector<31x32xf32>
    %78 = tpu.concatenate %77, %74 in 0 : vector<31x32xf32>, vector<1x32xf32> -> vector<32x32xf32>
    %79 = tpu.iota {dimensions = array<i32: 0>} : vector<32x32xi32>
    %c8_i32 = arith.constant 8 : i32
    %c0_i32_27 = arith.constant 0 : i32
    %80 = arith.cmpi eq, %c8_i32, %c0_i32_27 : i32
    %c1_i32_28 = arith.constant 1 : i32
    %81 = arith.select %80, %c1_i32_28, %c8_i32 : i32
    %82 = vector.broadcast %81 : i32 to vector<32x32xi32>
    %83 = arith.remsi %79, %82 : vector<32x32xi32>
    %c0_i32_29 = arith.constant 0 : i32
    %84 = vector.broadcast %c0_i32_29 : i32 to vector<32x32xi32>
    %85 = arith.cmpi ne, %83, %84 : vector<32x32xi32>
    %c0_i32_30 = arith.constant 0 : i32
    %86 = vector.broadcast %c0_i32_30 : i32 to vector<32x32xi32>
    %87 = arith.cmpi slt, %83, %86 : vector<32x32xi32>
    %c0_i32_31 = arith.constant 0 : i32
    %88 = arith.cmpi slt, %81, %c0_i32_31 : i32
    %89 = vector.broadcast %88 : i1 to vector<32x32xi1>
    %90 = vector.broadcast %89 : vector<32x32xi1> to vector<32x32xi1>
    %91 = arith.xori %87, %90 : vector<32x32xi1>
    %92 = arith.andi %91, %85 : vector<32x32xi1>
    %93 = vector.broadcast %81 : i32 to vector<32x32xi32>
    %94 = arith.addi %83, %93 : vector<32x32xi32>
    %95 = arith.select %92, %94, %83 : vector<32x32xi1>, vector<32x32xi32>
    %c0_i32_32 = arith.constant 0 : i32
    %96 = vector.broadcast %c0_i32_32 : i32 to vector<32x32xi32>
    %97 = arith.cmpi ne, %95, %96 : vector<32x32xi32>
    %cst_33 = arith.constant 0.000000e+00 : f32
    %98 = vector.broadcast %cst_33 : f32 to vector<32x32xf32>
    %99 = arith.select %97, %76, %98 : vector<32x32xi1>, vector<32x32xf32>
    %c7_i32 = arith.constant 7 : i32
    %100 = vector.broadcast %c7_i32 : i32 to vector<32x32xi32>
    %101 = arith.cmpi ne, %95, %100 : vector<32x32xi32>
    %cst_34 = arith.constant 0.000000e+00 : f32
    %102 = vector.broadcast %cst_34 : f32 to vector<32x32xf32>
    %103 = arith.select %101, %78, %102 : vector<32x32xi1>, vector<32x32xf32>
    %104 = tpu.concatenate %99, %73, %103 in 1 : vector<32x32xf32>, vector<32x32xf32>, vector<32x32xf32> -> vector<32x96xf32>
    %c136 = arith.constant 136 : index
    %c0_35 = arith.constant 0 : index
    %105 = vector.load %arg3[%c136, %c0_35] : memref<416x32xf32, #tpu.memory_space<vmem>>, vector<96x32xf32>
    %cst_36 = arith.constant dense<0.000000e+00> : vector<32x32xf32>
    %106 = tpu.matmul %104, %105, %cst_36 {dimension_numbers = #tpu.dot_dimension_numbers<[1], [0], [0], [1], [0, 0, 1, 1], [], []>} : vector<32x96xf32>, vector<96x32xf32>, vector<32x32xf32> -> vector<32x32xf32>
    %c0_37 = arith.constant 0 : index
    %c0_38 = arith.constant 0 : index
    %107 = vector.load %arg5[%c0_37, %c0_38] : memref<64x32xf32, #tpu.memory_space<vmem>>, vector<32x32xf32>
    tpu.vector_store %arg5[%c0_37, %c0_38], %106 {strides = array<i32>} : memref<64x32xf32, #tpu.memory_space<vmem>>, vector<32x32xf32>,
    %c0_39 = arith.constant 0 : index
    %c0_40 = arith.constant 0 : index
    %108 = tpu.strided_load %arg5[%c0_39, %c0_40] {strides = array<i32: 2, 1>} : memref<64x32xf32, #tpu.memory_space<vmem>>, vector<16x32xf32>
    %c1_41 = arith.constant 1 : index
    %c0_42 = arith.constant 0 : index
    %109 = tpu.strided_load %arg5[%c1_41, %c0_42] {strides = array<i32: 2, 1>} : memref<64x32xf32, #tpu.memory_space<vmem>>, vector<16x32xf32>
    %110 = arith.maximumf %108, %109 : vector<16x32xf32>
    %c232 = arith.constant 232 : index
    %c0_43 = arith.constant 0 : index
    %111 = vector.load %arg3[%c232, %c0_43] : memref<416x32xf32, #tpu.memory_space<vmem>>, vector<1x32xf32>
    %112 = vector.broadcast %111 : vector<1x32xf32> to vector<16x32xf32>
    %113 = arith.addf %110, %112 : vector<16x32xf32>
    %cst_44 = arith.constant 0.000000e+00 : f32
    %114 = vector.broadcast %cst_44 : f32 to vector<16x32xf32>
    %115 = arith.maximumf %113, %114 : vector<16x32xf32>
    %c0_45 = arith.constant 0 : index
    %c0_46 = arith.constant 0 : index
    %116 = vector.load %arg5[%c0_45, %c0_46] : memref<64x32xf32, #tpu.memory_space<vmem>>, vector<16x32xf32>
    tpu.vector_store %arg5[%c0_45, %c0_46], %115 {strides = array<i32>} : memref<64x32xf32, #tpu.memory_space<vmem>>, vector<16x32xf32>,
    %c0_47 = arith.constant 0 : index
    %c0_48 = arith.constant 0 : index
    %117 = tpu.strided_load %arg5[%c0_47, %c0_48] {strides = array<i32: 4, 1>} : memref<64x32xf32, #tpu.memory_space<vmem>>, vector<4x32xf32>
    %c1_49 = arith.constant 1 : index
    %c0_50 = arith.constant 0 : index
    %118 = tpu.strided_load %arg5[%c1_49, %c0_50] {strides = array<i32: 4, 1>} : memref<64x32xf32, #tpu.memory_space<vmem>>, vector<4x32xf32>
    %c2 = arith.constant 2 : index
    %c0_51 = arith.constant 0 : index
    %119 = tpu.strided_load %arg5[%c2, %c0_51] {strides = array<i32: 4, 1>} : memref<64x32xf32, #tpu.memory_space<vmem>>, vector<4x32xf32>
    %c3 = arith.constant 3 : index
    %c0_52 = arith.constant 0 : index
    %120 = tpu.strided_load %arg5[%c3, %c0_52] {strides = array<i32: 4, 1>} : memref<64x32xf32, #tpu.memory_space<vmem>>, vector<4x32xf32>
    %121 = tpu.concatenate %117, %118, %119, %120 in 1 : vector<4x32xf32>, vector<4x32xf32>, vector<4x32xf32>, vector<4x32xf32> -> vector<4x128xf32>
    %c240 = arith.constant 240 : index
    %c0_53 = arith.constant 0 : index
    %122 = vector.load %arg3[%c240, %c0_53] : memref<416x32xf32, #tpu.memory_space<vmem>>, vector<128x32xf32>
    %c368 = arith.constant 368 : index
    %c0_54 = arith.constant 0 : index
    %123 = vector.load %arg3[%c368, %c0_54] : memref<416x32xf32, #tpu.memory_space<vmem>>, vector<1x32xf32>
    %cst_55 = arith.constant dense<0.000000e+00> : vector<4x32xf32>
    %124 = tpu.matmul %121, %122, %cst_55 {dimension_numbers = #tpu.dot_dimension_numbers<[1], [0], [0], [1], [0, 0, 1, 1], [], []>} : vector<4x128xf32>, vector<128x32xf32>, vector<4x32xf32> -> vector<4x32xf32>
    %125 = vector.broadcast %123 : vector<1x32xf32> to vector<4x32xf32>
    %126 = arith.addf %124, %125 : vector<4x32xf32>
    %cst_56 = arith.constant 0.000000e+00 : f32
    %127 = vector.broadcast %cst_56 : f32 to vector<4x32xf32>
    %128 = arith.maximumf %126, %127 : vector<4x32xf32>
    %c376 = arith.constant 376 : index
    %c0_57 = arith.constant 0 : index
    %129 = vector.load %arg3[%c376, %c0_57] : memref<416x32xf32, #tpu.memory_space<vmem>>, vector<32x4xf32>
    %c408 = arith.constant 408 : index
    %c0_58 = arith.constant 0 : index
    %130 = vector.load %arg3[%c408, %c0_58] : memref<416x32xf32, #tpu.memory_space<vmem>>, vector<1x4xf32>
    %cst_59 = arith.constant dense<0.000000e+00> : vector<4x4xf32>
    %131 = tpu.matmul %128, %129, %cst_59 {dimension_numbers = #tpu.dot_dimension_numbers<[1], [0], [0], [1], [0, 0, 1, 1], [], []>} : vector<4x32xf32>, vector<32x4xf32>, vector<4x4xf32> -> vector<4x4xf32>
    %132 = vector.broadcast %130 : vector<1x4xf32> to vector<4x4xf32>
    %133 = arith.addf %131, %132 : vector<4x4xf32>
    %c0_60 = arith.constant 0 : index
    %c0_61 = arith.constant 0 : index
    %134 = vector.load %arg4[%c0_60, %c0_61] : memref<4x4xf32, #tpu.memory_space<vmem>>, vector<4x4xf32>
    tpu.vector_store %arg4[%c0_60, %c0_61], %133 {strides = array<i32>} : memref<4x4xf32, #tpu.memory_space<vmem>>, vector<4x4xf32>,
    return
  }
  func.func @transform_0(%arg0: i32) -> (i32, i32) {
    %c0_i32 = arith.constant 0 : i32
    %c0_i32_0 = arith.constant 0 : i32
    %c0_i32_1 = arith.constant 0 : i32
    return %c0_i32, %c0_i32_0 : i32, i32
  }
  func.func @transform_1(%arg0: i32) -> (i32, i32) {
    %c0_i32 = arith.constant 0 : i32
    %c0_i32_0 = arith.constant 0 : i32
    %c0_i32_1 = arith.constant 0 : i32
    return %c0_i32, %c0_i32_0 : i32, i32
  }
  func.func @transform_2(%arg0: i32) -> (i32, i32) {
    %c0_i32 = arith.constant 0 : i32
    %c0_i32_0 = arith.constant 0 : i32
    %c0_i32_1 = arith.constant 0 : i32
    return %c0_i32, %c0_i32_0 : i32, i32
  }
  func.func @transform_3(%arg0: i32) -> (i32, i32) {
    %c0_i32 = arith.constant 0 : i32
    %c0_i32_0 = arith.constant 0 : i32
    %c0_i32_1 = arith.constant 0 : i32
    return %c0_i32, %c0_i32_0 : i32, i32
  }
}

</mosaic_0001>

<bundles_post_ra>
// kernel: net_forward.1
= control target key start
LH: loop header
LB: loop body
LE: loop exit
PB: predicated region body
PF: predicated region fallthrough
CT: control target
= control target key end

     0   :  { %v3797_v3 = vmov 1   ;;  %s5611_s0 = inlined_call_operand.vmem [shape: f32[64,2], index: 0, kind: input, shape index: {}]   ;;  %s5612_s1 = inlined_call_operand.vmem [shape: s32[64,1], index: 1, kind: input, shape index: {}]   ;;  %s5613_s2 = inlined_call_operand.vmem [shape: f32[416,32], index: 2, kind: input, shape index: {}]   ;;  %s5614_s3 = inlined_call_operand.hbm [shape: f32[4,4], index: 3, kind: output, shape index: {}]  }
   0x1   :  { %v19_v0 = vld [vmem:[%s5611_s0 + $0x20] sm:$0xff]  ;;  %v17_v1 = vld [vmem:[%s5611_s0 + $0x10] sm:$0xff]  ;;  %3754 = vset.pattern.permute.xlu2 %v3797_v3  ;;  %3753 = vset.pattern.permute.xlu1 %v3797_v3 }
   0x2   :  { %v15_v2 = vld [vmem:[%s5611_s0] sm:$0xff]  ;;  %3752 = vset.pattern.permute.xlu0 %v3797_v3  ;;  %98 = vperm.xlu2 %3754, %v19_v0  }
   0x3   :  { %90 = vperm.xlu1 %3753, %v17_v1   ;;  %82 = vperm.xlu0 %3752, %v15_v2  }
   0x4   :  { %8 = vsyncpa [#allocation4], 0  ;;  %v18_v4 = vld [vmem:[%s5611_s0 + $0x18] sm:$0xff]  ;;  %v16_v5 = vld [vmem:[%s5611_s0 + $0x8] sm:$0xff]  ;;  %v5629_v6 = vmov 0   ;;  %s3799_s30 = smov 4  }
   0x5   :  { %v20_v7 = vld [vmem:[%s5611_s0 + $0x28] sm:$0xff]  ;;  %v21_v8 = vld [vmem:[%s5611_s0 + $0x30] sm:$0xff]  ;;  %v22_v9 = vld [vmem:[%s5611_s0 + $0x38] sm:$0xff]  ;;  %vm154_vm0 = vcmask 31744   ;;  %v5633_v3 = vmov 683565275  }
   0x6   :  { %v31_v10 = vld [vmem:[%s5613_s2] sm:$0x3]  ;;  %v24_v14 = vld [vmem:[%s5612_s1 + $0x8] sm:$0xff]  ;;  %v29_v26 = vld [vmem:[%s5612_s1 + $0x30] sm:$0xff]  ;;  %s3807_s21 = smov 16   ;;  %s3808_s5 = smov 8  }
   0x7   :  { %v113_v11 = vperm.slane %v31_v10, 1  ;;  %v27_v18 = vld [vmem:[%s5612_s1 + $0x20] sm:$0xff]  ;;  %v28_v24 = vld [vmem:[%s5612_s1 + $0x28] sm:$0xff]  ;;  %v30_v28 = vld [vmem:[%s5612_s1 + $0x38] sm:$0xff]  ;;  %v3897_v38 = vperm.slane %v31_v10, 0  ;;  %s3809_s20 = smov 24  }
   0x8   :  { %v25_v32 = vld [vmem:[%s5612_s1 + $0x10] sm:$0xff]  ;;  %v23_v34 = vld [vmem:[%s5612_s1] sm:$0xff]  ;;  %v26_v35 = vld [vmem:[%s5612_s1 + $0x18] sm:$0xff]  ;;  %v5627_v10 = vmov 2102212464   ;;  %s3811_s14 = smov 32  }
   0x9   :  { %s3812_s17 = smov 64  }
   0xa   :  { %3755 = vset.pattern.permute.xlu2 %v5629_v6 }
   0xb   :  { %94 = vperm.xlu1 %3753, %v18_v4   ;;  %86 = vperm.xlu0 %3752, %v16_v5  }
   0xc   :  { %34 = vperm.xlu2 %3755, %v15_v2  }
  0x13   :  { %102 = vperm.xlu0 %3752, %v20_v7   ;;  %3756 = vset.pattern.permute.xlu1 %v5629_v6 }
  0x14   :  { %39 = vperm.xlu2 %3755, %v16_v5   ;;  %v5625_v5 = vmov 2475754826  }
  0x1b   :  { %106 = vperm.xlu0 %3752, %v21_v8  }
  0x1c   :  { %44 = vperm.xlu2 %3755, %v17_v1  }
  0x23   :  { %110 = vperm.xlu0 %3752, %v22_v9  }
  0x24   :  { %49 = vperm.xlu2 %3755, %v18_v4  }
  0x2b   :  { %3757 = vset.pattern.permute.xlu0 %v5629_v6 }
  0x5c   :  { %v99_v12 = vpop.permute.xlu2 %98 }
  0x5d   :  { %v118_v13 = vmul.f32 %v113_v11, %v99_v12 }
  0x5f   :  { %138 = vrot.lane.b32.xlu2 %v118_v13, %s3799_s30 }
  0x66   :  { %v35_v36 = vpop.permute.xlu2 %34 }
  0x67   :  { %64 = vperm.xlu2 %3755, %v21_v8   ;;  %v73_v39 = vmul.f32 %v3897_v38, %v35_v36  ;;  %v5623_v8 = vmov 2131351028  }
  0x6e   :  { %v40_v37 = vpop.permute.xlu2 %39 }
  0x6f   :  { %69 = vperm.xlu2 %3755, %v22_v9   ;;  %v74_v49 = vmul.f32 %v3897_v38, %v40_v37 }
  0x75   :  { %v91_v15 = vpop.permute.xlu1 %90  ;;  %v83_v16 = vpop.permute.xlu0 %82 }
  0x76   :  { %v114_v17 = vmul.f32 %v113_v11, %v83_v16  ;;  %v116_v23 = vmul.f32 %v113_v11, %v91_v15  ;;  %v3900_v40 = vpop.permute.xlu2 %44  ;;  %v5631_v15 = vmov 920167782  }
  0x77   :  { %2800 = vperm.xlu2 %3755, %v24_v14  }
  0x78   :  { %130 = vrot.lane.b32.xlu1 %v114_v17, %s3799_s30 }
  0x7d   :  { %v95_v19 = vpop.permute.xlu1 %94  ;;  %v87_v20 = vpop.permute.xlu0 %86 }
  0x7e   :  { %v117_v21 = vmul.f32 %v113_v11, %v95_v19  ;;  %v115_v22 = vmul.f32 %v113_v11, %v87_v20  ;;  %v50_v52 = vpop.permute.xlu2 %49 }
  0x7f   :  { %2809 = vperm.xlu2 %3755, %v27_v18   ;;  %v76_v54 = vmul.f32 %v3897_v38, %v50_v52  ;;  %v5616_v18 = vmov 1326507024  }
  0x80   :  { %136 = vrot.lane.b32.xlu0 %v117_v21, %s3799_s30  ;;  %132 = vrot.lane.b32.xlu1 %v115_v22, %s3799_s30 }
  0x85   :  { %v103_v25 = vpop.permute.xlu0 %102 }
  0x86   :  { %v119_v30 = vmul.f32 %v113_v11, %v103_v25 }
  0x87   :  { %2812 = vperm.xlu2 %3755, %v28_v24  }
  0x88   :  { %134 = vrot.lane.b32.xlu1 %v116_v23, %s3799_s30  ;;  %59 = vperm.xlu0 %3757, %v20_v7  }
  0x8d   :  { %v107_v27 = vpop.permute.xlu0 %106 }
  0x8e   :  { %v120_v33 = vmul.f32 %v113_v11, %v107_v27 }
  0x8f   :  { %2815 = vperm.xlu2 %3755, %v29_v26  }
  0x90   :  { %54 = vperm.xlu1 %3756, %v19_v0  }
  0x95   :  { %v111_v29 = vpop.permute.xlu0 %110 }
  0x96   :  { %v121_v31 = vmul.f32 %v113_v11, %v111_v29 }
  0x97   :  { %2818 = vperm.xlu2 %3755, %v30_v28  }
  0x98   :  { %140 = vrot.lane.b32.xlu1 %v119_v30, %s3799_s30  ;;  %144 = vrot.lane.b32.xlu0 %v121_v31, %s3799_s30 }
  0xa0   :  { %142 = vrot.lane.b32.xlu1 %v120_v33, %s3799_s30  ;;  %2803 = vperm.xlu0 %3757, %v25_v32  }
  0xa8   :  { %2797 = vperm.xlu1 %3756, %v23_v34  }
  0xb0   :  { %2806 = vperm.xlu1 %3756, %v26_v35  }
  0xea   :  { %v131_v41 = vpop.permute.xlu1 %130 }
  0xeb   :  { %v3903_v42 = vsel %vm154_vm0, %v73_v39, %v131_v41 }
  0xec   :  { %v163_v43 = vand.u32 2147483647, %v3903_v42  ;;  %v166_v44 = vand.u32 2139095040, %v3903_v42 }
  0xee   :  { %v167_v45 = vshrl.u32 %v166_v44, 23  ;;  %v170_v46 = vand.u32 8388607, %v163_v43 }
  0xf0   :  { %v3639_v47 = vadd.s32 4294967169, %v167_v45  ;;  %v171_v48 = vor.u32 8388608, %v170_v46 }
  0xf2   :  { %v173_v50 = vadd.s32 1, %v3639_v47  ;;  %v133_v51 = vpop.permute.xlu1 %132  ;;  %v3914_v55 = vshll.u32 %v171_v48, 8  ;;  %v137_v57 = vpop.permute.xlu0 %136 }
  0xf3   :  { %v3911_v53 = vsel %vm154_vm0, %v74_v49, %v133_v51  ;;  %v3919_v62 = vsel %vm154_vm0, %v76_v54, %v137_v57 }
  0xf4   :  { %5661 = vst [vmem:[#allocation6_spill] sm:$0xff] %v3911_v53  ;;  %vm174_vm1 = vcmp.gt.s32.totalorder %v173_v50, 0  ;;  %v318_v56 = vand.u32 2147483647, %v3911_v53  ;;  %v321_v59 = vand.u32 2139095040, %v3911_v53  ;;  %v212_v0 = vand.u32 65535, %v3914_v55 }
  0xf5   :  { %v175_v58 = vsel %vm174_vm1, %v173_v50, 0  ;;  %5662 = vst [vmem:[#allocation7_spill] sm:$0xff] %v3919_v62  ;;  %v213_v44 = vshrl.u32 %v3914_v55, 16  ;;  %v631_v50 = vand.u32 2139095040, %v3919_v62 }
  0xf6   :  { %v177_v60 = vand.u32 31, %v175_v58  ;;  %v176_v61 = vshrl.u32 %v175_v58, 5  ;;  %v322_v1 = vshrl.u32 %v321_v59, 23  ;;  %v325_v2 = vand.u32 8388607, %v318_v56 }
  0xf8   :  { %v178_v63 = vsub.s32 32, %v177_v60  ;;  %v180_v4 = vshll.u32 %v5633_v3, %v177_v60  ;;  %v183_v7 = vshll.u32 %v5625_v5, %v177_v60  ;;  %v186_v9 = vshll.u32 %v5623_v8, %v177_v60 }
  0xf9   :  { %v189_v11 = vshll.u32 %v5627_v10, %v177_v60  ;;  %v192_v16 = vshll.u32 %v5631_v15, %v177_v60  ;;  %vm195_vm2 = vcmp.lt.s32.totalorder %v176_v61, 1  ;;  %vm196_vm3 = vcmp.lt.s32.totalorder %v176_v61, 2 }
  0xfa   :  { %v181_v12 = vshrl.u32 %v5625_v5, %v178_v63  ;;  %v184_v13 = vshrl.u32 %v5623_v8, %v178_v63  ;;  %v187_v14 = vshrl.u32 %v5627_v10, %v178_v63  ;;  %v190_v17 = vshrl.u32 %v5631_v15, %v178_v63 }
  0xfb   :  { %v193_v19 = vshrl.u32 %v5616_v18, %v178_v63  ;;  %v3642_v23 = vadd.s32 4294967169, %v322_v1  ;;  %v179_v24 = vshrl.u32 %v5633_v3, %v178_v63  ;;  %vm198_vm4 = vcmp.lt.s32.totalorder %v176_v61, 4 }
  0xfc   :  { %v182_v20 = vor.u32 %v181_v12, %v180_v4  ;;  %v185_v21 = vor.u32 %v184_v13, %v183_v7  ;;  %v188_v22 = vor.u32 %v187_v14, %v186_v9  ;;  %v191_v25 = vor.u32 %v190_v17, %v189_v11 }
  0xfd   :  { %v194_v26 = vor.u32 %v193_v19, %v192_v16  ;;  %vm197_vm5 = vcmp.lt.s32.totalorder %v176_v61, 3  ;;  %v326_v32 = vor.u32 8388608, %v325_v2  ;;  %v328_v33 = vadd.s32 1, %v3642_v23 }
  0xfe   :  { %v200_v27 = vsel %vm198_vm4, %v188_v22, 2102212464  ;;  %v203_v28 = vsel %vm195_vm2, %v182_v20, %v185_v21  ;;  %v207_v29 = vsel %vm195_vm2, %v185_v21, %v188_v22  ;;  %v204_v30 = vsel %vm198_vm4, %v191_v25, 920167782 }
  0xff   :  { %v208_v31 = vsel %vm198_vm4, %v194_v26, 1326507024  ;;  %v199_v34 = vsel %vm195_vm2, %v179_v24, %v182_v20  ;;  %v201_v35 = vsel %vm197_vm5, %v185_v21, %v200_v27  ;;  %v205_v36 = vsel %vm197_vm5, %v188_v22, %v204_v30 }
 0x100   :  { %v209_v37 = vsel %vm197_vm5, %v191_v25, %v208_v31  ;;  %v206_v39 = vsel %vm196_vm3, %v203_v28, %v205_v36  ;;  %vm329_vm6 = vcmp.gt.s32.totalorder %v328_v33, 0  ;;  %v3942_v49 = vsel %vm196_vm3, %v199_v34, %v201_v35 }
 0x101   :  { %v210_v41 = vsel %vm196_vm3, %v207_v29, %v209_v37  ;;  %v236_v47 = vand.u32 65535, %v206_v39  ;;  %v237_v48 = vshrl.u32 %v206_v39, 16  ;;  %v330_v54 = vsel %vm329_vm6, %v328_v33, 0 }
 0x102   :  { %v214_v45 = vand.u32 65535, %v210_v41  ;;  %v215_v46 = vshrl.u32 %v210_v41, 16  ;;  %v3945_v57 = vshll.u32 %v326_v32, 8  ;;  %v332_v16 = vand.u32 31, %v330_v54 }
 0x103   :  { %v239_v60 = vmul.u32 %v237_v48, %v212_v0  ;;  %v240_v63 = vmul.u32 %v236_v47, %v213_v44  ;;  %v238_v4 = vmul.u32 %v236_v47, %v212_v0  ;;  %v241_v7 = vmul.u32 %v237_v48, %v213_v44 }
 0x104   :  { %v217_v51 = vmul.u32 %v215_v46, %v212_v0  ;;  %v218_v52 = vmul.u32 %v214_v45, %v213_v44  ;;  %v216_v58 = vmul.u32 %v214_v45, %v212_v0  ;;  %v219_v59 = vmul.u32 %v215_v46, %v213_v44 }
 0x105   :  { %v242_v61 = vshll.u32 %v239_v60, 16  ;;  %v243_v12 = vshrl.u32 %v239_v60, 16  ;;  %v244_v14 = vshll.u32 %v240_v63, 16  ;;  %v245_v19 = vshrl.u32 %v240_v63, 16 }
 0x106   :  { %v220_v1 = vshll.u32 %v217_v51, 16  ;;  %v221_v2 = vshrl.u32 %v217_v51, 16  ;;  %v222_v9 = vshll.u32 %v218_v52, 16  ;;  %v223_v11 = vshrl.u32 %v218_v52, 16 }
 0x107   :  { %vm246_vm8 = vc.u32 %v238_v4, %v242_v61  ;;  %v248_v20 = vadd.s32 %v242_v61, %v238_v4  ;;  %v333_v23 = vsub.s32 32, %v332_v16  ;;  %v3950_v25 = vshrl.u32 %v330_v54, 5 }
 0x108   :  { %vm224_vm7 = vc.u32 %v216_v58, %v220_v1  ;;  %v226_v13 = vadd.s32 %v220_v1, %v216_v58  ;;  %v247_v22 = vsel %vm246_vm8, 1, %v5629_v6  ;;  %v335_v29 = vshll.u32 %v5633_v3, %v332_v16 }
 0x109   :  { %v225_v17 = vsel %vm224_vm7, 1, %v5629_v6  ;;  %v249_v24 = vadd.s32 %v247_v22, %v241_v7  ;;  %vm250_vm10 = vc.u32 %v248_v20, %v244_v14  ;;  %v3953_v28 = vadd.s32 %v248_v20, %v244_v14 }
 0x10a   :  { %v227_v21 = vadd.s32 %v225_v17, %v219_v59  ;;  %vm228_vm9 = vc.u32 %v226_v13, %v222_v9  ;;  %v251_v27 = vsel %vm250_vm10, 1, %v5629_v6  ;;  %v336_v31 = vshrl.u32 %v5625_v5, %v333_v23 }
 0x10b   :  { %v229_v0 = vsel %vm228_vm9, 1, %v5629_v6  ;;  %v253_v30 = vadd.s32 %v251_v27, %v249_v24  ;;  %v338_v32 = vshll.u32 %v5625_v5, %v332_v16  ;;  %v339_v33 = vshrl.u32 %v5623_v8, %v333_v23 }
 0x10c   :  { %v231_v26 = vadd.s32 %v229_v0, %v227_v21  ;;  %v341_v35 = vshll.u32 %v5623_v8, %v332_v16  ;;  %v342_v36 = vshrl.u32 %v5627_v10, %v333_v23  ;;  %v344_v37 = vshll.u32 %v5627_v10, %v332_v16 }
 0x10d   :  { %v254_v39 = vadd.s32 %v253_v30, %v243_v12  ;;  %v337_v41 = vor.u32 %v336_v31, %v335_v29  ;;  %v340_v44 = vor.u32 %v339_v33, %v338_v32  ;;  %v345_v45 = vshrl.u32 %v5631_v15, %v333_v23 }
 0x10e   :  { %v232_v34 = vadd.s32 %v231_v26, %v221_v2  ;;  %v343_v47 = vor.u32 %v342_v36, %v341_v35  ;;  %v347_v48 = vshll.u32 %v5631_v15, %v332_v16  ;;  %v348_v51 = vshrl.u32 %v5616_v18, %v333_v23 }
 0x10f   :  { %v255_v52 = vadd.s32 %v254_v39, %v245_v19  ;;  %v256_v54 = vmul.u32 %v3914_v55, %v3942_v49  ;;  %v346_v58 = vor.u32 %v345_v45, %v344_v37  ;;  %v632_v59 = vshrl.u32 %v631_v50, 23 }
 0x110   :  { %v3963_v46 = vadd.s32 %v232_v34, %v223_v11  ;;  %v349_v60 = vor.u32 %v348_v51, %v347_v48  ;;  %vm350_vm12 = vcmp.lt.s32.totalorder %v3950_v25, 1  ;;  %v367_v63 = vand.u32 65535, %v3945_v57 }
 0x111   :  { %v259_v1 = vadd.s32 1, %v255_v52  ;;  %vm353_vm13 = vcmp.lt.s32.totalorder %v3950_v25, 4  ;;  %v358_v2 = vsel %vm350_vm12, %v337_v41, %v340_v44  ;;  %v368_v4 = vshrl.u32 %v3945_v57, 16 }
 0x112   :  { %vm258_vm11 = vc.u32 %v3963_v46, %v3953_v28  ;;  %vm352_vm14 = vcmp.lt.s32.totalorder %v3950_v25, 3  ;;  %v359_v55 = vsel %vm353_vm13, %v346_v58, 920167782  ;;  %v362_v49 = vsel %vm350_vm12, %v340_v44, %v343_v47 }
 0x113   :  { %v363_v50 = vsel %vm353_vm13, %v349_v60, 1326507024  ;;  %v260_v7 = vsel %vm258_vm11, %v259_v1, %v255_v52  ;;  %vm351_vm15 = vcmp.lt.s32.totalorder %v3950_v25, 2  ;;  %v360_v9 = vsel %vm352_vm14, %v343_v47, %v359_v55 }
 0x114   :  { %v364_v11 = vsel %vm352_vm14, %v346_v58, %v363_v50  ;;  %v261_v61 = vadd.s32 %v260_v7, %v256_v54  ;;  %v361_v12 = vsel %vm351_vm15, %v358_v2, %v360_v9  ;;  %v3648_v14 = vadd.s32 4294967169, %v632_v59 }
 0x115   :  { %v365_v13 = vsel %vm351_vm15, %v362_v49, %v364_v11  ;;  %v391_v19 = vand.u32 65535, %v361_v12  ;;  %v392_v20 = vshrl.u32 %v361_v12, 16  ;;  %v334_v22 = vshrl.u32 %v5633_v3, %v333_v23 }
 0x116   :  { %v369_v16 = vand.u32 65535, %v365_v13  ;;  %v370_v17 = vshrl.u32 %v365_v13, 16  ;;  %v262_v21 = vadd.s32 536870912, %v261_v61  ;;  %v355_v0 = vsel %vm353_vm13, %v343_v47, 2102212464 }
 0x117   :  { %v628_v27 = vand.u32 2147483647, %v3919_v62  ;;  %v354_v30 = vsel %vm350_vm12, %v334_v22, %v337_v41  ;;  %v394_v31 = vmul.u32 %v392_v20, %v367_v63  ;;  %v395_v32 = vmul.u32 %v391_v19, %v368_v4 }
 0x118   :  { %v372_v24 = vmul.u32 %v370_v17, %v367_v63  ;;  %v373_v26 = vmul.u32 %v369_v16, %v368_v4  ;;  %v3997_v29 = vshrl.u32 %v262_v21, 30  ;;  %v356_v33 = vsel %vm352_vm14, %v340_v44, %v355_v0 }
 0x119   :  { %v371_v34 = vmul.u32 %v369_v16, %v367_v63  ;;  %v638_v23 = vadd.s32 1, %v3648_v14  ;;  %v374_v37 = vmul.u32 %v370_v17, %v368_v4  ;;  %v393_v39 = vmul.u32 %v391_v19, %v367_v63 }
 0x11a   :  { %v375_v35 = vshll.u32 %v372_v24, 16  ;;  %v264_v36 = vshll.u32 %v3997_v29, 30  ;;  %v397_v45 = vshll.u32 %v394_v31, 16  ;;  %v376_v47 = vshrl.u32 %v372_v24, 16 }
 0x11b   :  { %v377_v48 = vshll.u32 %v373_v26, 16  ;;  %v396_v54 = vmul.u32 %v392_v20, %v368_v4  ;;  %v399_v58 = vshll.u32 %v395_v32, 16  ;;  %v378_v2 = vshrl.u32 %v373_v26, 16 }
 0x11c   :  { %vm379_vm1 = vc.u32 %v371_v34, %v375_v35  ;;  %v381_v51 = vadd.s32 %v375_v35, %v371_v34  ;;  %v4004_v52 = vsub.s32 %v261_v61, %v264_v36  ;;  %vm401_vm3 = vc.u32 %v393_v39, %v397_v45 }
 0x11d   :  { %v380_v41 = vsel %vm379_vm1, 1, %v5629_v6  ;;  %v403_v44 = vadd.s32 %v397_v45, %v393_v39  ;;  %v402_v1 = vsel %vm401_vm3, 1, %v5629_v6  ;;  %v398_v4 = vshrl.u32 %v394_v31, 16 }
 0x11e   :  { %v382_v59 = vadd.s32 %v380_v41, %v374_v37  ;;  %vm383_vm2 = vc.u32 %v381_v51, %v377_v48  ;;  %vm266_vm4 = vcmp.lt.s32.totalorder %v4004_v52, 0  ;;  %v267_v60 = vsub.s32 0, %v4004_v52 }
 0x11f   :  { %v384_v63 = vsel %vm383_vm2, 1, %v5629_v6  ;;  %v404_v49 = vadd.s32 %v402_v1, %v396_v54  ;;  %vm405_vm5 = vc.u32 %v403_v44, %v399_v58  ;;  %vm639_vm6 = vcmp.gt.s32.totalorder %v638_v23, 0 }
 0x120   :  { %v386_v55 = vadd.s32 %v384_v63, %v382_v59  ;;  %v268_v50 = vsel %vm266_vm4, %v267_v60, %v4004_v52  ;;  %v406_v7 = vsel %vm405_vm5, 1, %v5629_v6  ;;  %v640_v12 = vsel %vm639_vm6, %v638_v23, 0 }
 0x121   :  { %v269_v9 = vclz %v268_v50  ;;  %v408_v61 = vadd.s32 %v406_v7, %v404_v49  ;;  %v635_v13 = vand.u32 8388607, %v628_v27  ;;  %v642_v14 = vand.u32 31, %v640_v12 }
 0x122   :  { %v387_v11 = vadd.s32 %v386_v55, %v376_v47  ;;  %v400_v19 = vshrl.u32 %v395_v32, 16  ;;  %v357_v21 = vsel %vm351_vm15, %v354_v30, %v356_v33  ;;  %v4019_v22 = vadd.s32 %v403_v44, %v399_v58 }
 0x123   :  { %v3640_v16 = vadd.s32 4294967294, %v269_v9  ;;  %v409_v20 = vadd.s32 %v408_v61, %v398_v4  ;;  %v4021_v0 = vsub.s32 32, %v642_v14  ;;  %v411_v34 = vmul.u32 %v3945_v57, %v357_v21 }
 0x124   :  { %v4015_v17 = vadd.s32 %v387_v11, %v378_v2  ;;  %v636_v30 = vor.u32 8388608, %v635_v13  ;;  %v4030_v33 = vshrl.u32 %v640_v12, 5  ;;  %v645_v35 = vshll.u32 %v5633_v3, %v642_v14 }
 0x125   :  { %vm3641_vm7 = vcmp.lt.s32.totalorder %v3640_v16, 0  ;;  %v410_v24 = vadd.s32 %v409_v20, %v400_v19  ;;  %v646_v31 = vshrl.u32 %v5625_v5, %v4021_v0  ;;  %v649_v32 = vshrl.u32 %v5623_v8, %v4021_v0 }
 0x126   :  { %v272_v26 = vsel %vm3641_vm7, 0, %v3640_v16  ;;  %vm413_vm8 = vc.u32 %v4015_v17, %v4019_v22  ;;  %v648_v23 = vshll.u32 %v5625_v5, %v642_v14  ;;  %v651_v36 = vshll.u32 %v5623_v8, %v642_v14 }
 0x127   :  { %v414_v25 = vadd.s32 1, %v410_v24  ;;  %v652_v37 = vshrl.u32 %v5627_v10, %v4021_v0  ;;  %v277_v39 = vsub.s32 4294967266, %v272_v26  ;;  %v654_v47 = vshll.u32 %v5627_v10, %v642_v14 }
 0x128   :  { %v655_v57 = vshrl.u32 %v5631_v15, %v4021_v0  ;;  %v4040_v51 = vor.u32 %v646_v31, %v645_v35  ;;  %v4042_v41 = vor.u32 %v649_v32, %v648_v23  ;;  %v658_v54 = vshrl.u32 %v5616_v18, %v4021_v0  ;;  %v135_v35 = vpop.permute.xlu1 %134 }
 0x129   :  { %v415_v45 = vsel %vm413_vm8, %v414_v25, %v410_v24  ;;  %v273_v58 = vsub.s32 32, %v272_v26  ;;  %v4046_v59 = vor.u32 %v652_v37, %v651_v36  ;;  %v657_v60 = vshll.u32 %v5631_v15, %v642_v14  ;;  %v4087_v25 = vpop.permute.xlu2 %138 }
 0x12a   :  { %v416_v48 = vadd.s32 %v415_v45, %v411_v34  ;;  %v656_v44 = vor.u32 %v655_v57, %v654_v47  ;;  %v257_v63 = vadd.s32 %v3953_v28, %v3963_v46  ;;  %v4051_v2 = vshll.u32 %v636_v30, 8 }
 0x12b   :  { %v278_v55 = vadd.s32 127, %v277_v39  ;;  %v659_v49 = vor.u32 %v658_v54, %v657_v60  ;;  %vm660_vm9 = vcmp.lt.s32.totalorder %v4030_v33, 1  ;;  %vm663_vm10 = vcmp.lt.s32.totalorder %v4030_v33, 4 }
 0x12c   :  { %v417_v1 = vadd.s32 536870912, %v416_v48  ;;  %vm662_vm11 = vcmp.lt.s32.totalorder %v4030_v33, 3  ;;  %v668_v4 = vsel %vm660_vm9, %v4040_v51, %v4042_v41  ;;  %v669_v28 = vsel %vm663_vm10, %v656_v44, 920167782 }
 0x12d   :  { %v275_v46 = vshrl.u32 %v257_v63, %v273_v58  ;;  %vm661_vm12 = vcmp.lt.s32.totalorder %v4030_v33, 2  ;;  %v670_v7 = vsel %vm662_vm11, %v4046_v59, %v669_v28  ;;  %v672_v61 = vsel %vm660_vm9, %v4042_v41, %v4046_v59 }
 0x12e   :  { %v4055_v50 = vshrl.u32 %v417_v1, 30  ;;  %v671_v11 = vsel %vm661_vm12, %v668_v4, %v670_v7  ;;  %v677_v12 = vand.u32 65535, %v4051_v2  ;;  %v274_v13 = vshll.u32 %v4004_v52, %v272_v26 }
 0x12f   :  { %v279_v14 = vshll.u32 %v278_v55, 23  ;;  %v673_v16 = vsel %vm663_vm10, %v659_v49, 1326507024  ;;  %v702_v19 = vshrl.u32 %v671_v11, 16  ;;  %v701_v32 = vand.u32 65535, %v671_v11 }
 0x130   :  { %v419_v9 = vshll.u32 %v4055_v50, 30  ;;  %v674_v21 = vsel %vm662_vm11, %v656_v44, %v673_v16  ;;  %v276_v24 = vor.u32 %v275_v46, %v274_v13  ;;  %v75_v23 = vmul.f32 %v3897_v38, %v3900_v40 }
 0x131   :  { %v675_v31 = vsel %vm661_vm12, %v672_v61, %v674_v21  ;;  %v4085_v34 = vmul.u32 %v702_v19, %v677_v12  ;;  %v280_v36 = vor.u32 4788187, %v279_v14  ;;  %v678_v37 = vshrl.u32 %v4051_v2, 16 }
 0x132   :  { %v4079_v20 = vsub.s32 %v416_v48, %v419_v9  ;;  %v679_v26 = vand.u32 65535, %v675_v31  ;;  %v680_v30 = vshrl.u32 %v675_v31, 16  ;;  %v4097_v58 = vsel %vm154_vm0, %v75_v23, %v135_v35 }
 0x133   :  { %v707_v47 = vshll.u32 %v4085_v34, 16  ;;  %v705_v54 = vmul.u32 %v701_v32, %v678_v37  ;;  %v283_v44 = vcvt.s32.f32 %v276_v24  ;;  %v703_v1 = vmul.u32 %v701_v32, %v677_v12  ;;  %v4105_v24 = vpop.permute.xlu2 %64 }
 0x134   :  { %vm421_vm13 = vcmp.lt.s32.totalorder %v4079_v20, 0  ;;  %v422_v52 = vsub.s32 0, %v4079_v20  ;;  %v682_v45 = vmul.u32 %v680_v30, %v677_v12  ;;  %v683_v48 = vmul.u32 %v679_v26, %v678_v37 }
 0x135   :  { %v681_v60 = vmul.u32 %v679_v26, %v677_v12  ;;  %v281_v55 = vand.u32 2147483647, %v280_v36  ;;  %v684_v49 = vmul.u32 %v680_v30, %v678_v37  ;;  %v706_v4 = vmul.u32 %v702_v19, %v678_v37 }
 0x136   :  { %v423_v39 = vsel %vm421_vm13, %v422_v52, %v4079_v20  ;;  %v685_v63 = vshll.u32 %v682_v45, 16  ;;  %v687_v28 = vshll.u32 %v683_v48, 16  ;;  %vm711_vm15 = vc.u32 %v703_v1, %v707_v47 }
 0x137   :  { %v424_v57 = vclz %v423_v39  ;;  %v709_v9 = vshll.u32 %v705_v54, 16  ;;  %v712_v11 = vsel %vm711_vm15, 1, %v5629_v6  ;;  %v713_v14 = vadd.s32 %v707_v47, %v703_v1 }
 0x138   :  { %vm689_vm14 = vc.u32 %v681_v60, %v685_v63  ;;  %v691_v46 = vadd.s32 %v685_v63, %v681_v60  ;;  %v412_v12 = vadd.s32 %v4019_v22, %v4015_v17  ;;  %v644_v19 = vshrl.u32 %v5633_v3, %v4021_v0 }
 0x139   :  { %v3643_v40 = vadd.s32 4294967294, %v424_v57  ;;  %v690_v7 = vsel %vm689_vm14, 1, %v5629_v6  ;;  %v284_v31 = vmul.f32 %v283_v44, %v281_v55  ;;  %v714_v52 = vadd.s32 %v712_v11, %v706_v4 }
 0x13a   :  { %v692_v13 = vadd.s32 %v690_v7, %v684_v49  ;;  %vm693_vm2 = vc.u32 %v691_v46, %v687_v28  ;;  %vm715_vm3 = vc.u32 %v713_v14, %v709_v9  ;;  %v686_v35 = vshrl.u32 %v682_v45, 16 }
 0x13b   :  { %vm3644_vm1 = vcmp.lt.s32.totalorder %v3643_v40, 0  ;;  %v694_v32 = vsel %vm693_vm2, 1, %v5629_v6  ;;  %v664_v17 = vsel %vm660_vm9, %v644_v19, %v4040_v51  ;;  %v665_v22 = vsel %vm663_vm10, %v4046_v59, 2102212464 }
 0x13c   :  { %v427_v61 = vsel %vm3644_vm1, 0, %v3643_v40  ;;  %v696_v23 = vadd.s32 %v694_v32, %v692_v13  ;;  %v716_v0 = vsel %vm715_vm3, 1, %v5629_v6  ;;  %v476_v36 = vand.u32 2139095040, %v4097_v58 }
 0x13d   :  { %v428_v16 = vsub.s32 32, %v427_v61  ;;  %v432_v21 = vsub.s32 4294967266, %v427_v61  ;;  %v429_v37 = vshll.u32 %v4079_v20, %v427_v61  ;;  %v688_v47 = vshrl.u32 %v683_v48, 16 }
 0x13e   :  { %v697_v57 = vadd.s32 %v696_v23, %v686_v35  ;;  %v285_v44 = vxor.u32 2147483648, %v284_v31  ;;  %v708_v45 = vshrl.u32 %v4085_v34, 16  ;;  %v718_v60 = vadd.s32 %v716_v0, %v714_v52 }
 0x13f   :  { %v430_v26 = vshrl.u32 %v412_v12, %v428_v16  ;;  %v433_v30 = vadd.s32 127, %v432_v21  ;;  %v477_v63 = vshrl.u32 %v476_v36, 23  ;;  %v666_v59 = vsel %vm662_vm11, %v4042_v41, %v665_v22  ;;  %v55_v21 = vpop.permute.xlu1 %54 }
 0x140   :  { %v4121_v55 = vadd.s32 %v697_v57, %v688_v47  ;;  %v710_v40 = vshrl.u32 %v705_v54, 16  ;;  %v719_v49 = vadd.s32 %v718_v60, %v708_v45  ;;  %v5615_v20 = vand.u32 2147483647, %v4097_v58  ;;  %v4133_v54 = vpop.permute.xlu2 %69 }
 0x141   :  { %v434_v39 = vshll.u32 %v433_v30, 23  ;;  %v431_v1 = vor.u32 %v430_v26, %v429_v37  ;;  %v3645_v4 = vadd.s32 4294967169, %v477_v63  ;;  %vm165_vm4 = vcmp.lt.s32.totalorder %v3903_v42, 0 }
 0x142   :  { %v4125_v28 = vadd.s32 %v713_v14, %v709_v9  ;;  %v286_v34 = vsel %vm165_vm4, %v285_v44, %v284_v31  ;;  %v667_v46 = vsel %vm661_vm12, %v664_v17, %v666_v59  ;;  %v720_v7 = vadd.s32 %v719_v49, %v710_v40 }
 0x143   :  { %v435_v51 = vor.u32 4788187, %v434_v39  ;;  %v483_v41 = vadd.s32 1, %v3645_v4  ;;  %v438_v11 = vcvt.s32.f32 %v431_v1  ;;  %vm4137_vm6 = vcmp.le.f32.partialorder %v163_v43, 0.7853982 }
 0x144   :  { %vm723_vm5 = vc.u32 %v4121_v55, %v4125_v28  ;;  %v724_v9 = vadd.s32 1, %v720_v7  ;;  %v480_v13 = vand.u32 8388607, %v5615_v20  ;;  %v4146_v33 = vsel %vm4137_vm6, %v3903_v42, %v286_v34 }
 0x145   :  { %v436_v48 = vand.u32 2147483647, %v435_v51  ;;  %vm484_vm7 = vcmp.gt.s32.totalorder %v483_v41, 0  ;;  %v721_v12 = vmul.u32 %v4051_v2, %v667_v46  ;;  %v4151_v32 = vmul.f32 %v4146_v33, %v4146_v33 }
 0x146   :  { %v485_v16 = vsel %vm484_vm7, %v483_v41, 0  ;;  %v725_v19 = vsel %vm723_vm5, %v724_v9, %v720_v7  ;;  %v481_v52 = vor.u32 8388608, %v480_v13  ;;  %v77_v30 = vmul.f32 %v3897_v38, %v55_v21 }
 0x147   :  { %v439_v14 = vmul.f32 %v438_v11, %v436_v48  ;;  %v487_v43 = vand.u32 31, %v485_v16  ;;  %v726_v31 = vadd.s32 %v725_v19, %v721_v12  ;;  %v4156_v17 = vshrl.u32 %v485_v16, 5 }
 0x148   :  { %v4180_v40 = vshll.u32 %v481_v52, 8  ;;  %v4184_v49 = vsel %vm154_vm0, %v77_v30, %v4087_v25  ;;  %v4186_v4 = vpop.permute.xlu2 %2800  ;;  %vm4190_vm8 = vcmp.le.f32.partialorder %v318_v56, 0.7853982  ;;  %v5666_v48 = vmov 0 }
 0x149   :  { %v4153_v26 = vsub.s32 32, %v487_v43  ;;  %v440_v35 = vxor.u32 2147483648, %v439_v14  ;;  %v727_v23 = vadd.s32 536870912, %v726_v31  ;;  %v490_v2 = vshll.u32 %v5633_v3, %v487_v43  ;;  %5665 = vst [vmem:[#allocation8_spill] sm:$0xff] %v4184_v49 }
 0x14a   :  { %v493_v0 = vshll.u32 %v5625_v5, %v487_v43  ;;  %v496_v47 = vshll.u32 %v5623_v8, %v487_v43  ;;  %v499_v57 = vshll.u32 %v5627_v10, %v487_v43  ;;  %v502_v63 = vshll.u32 %v5631_v15, %v487_v43 }
 0x14b   :  { %v491_v22 = vshrl.u32 %v5625_v5, %v4153_v26  ;;  %v494_v36 = vshrl.u32 %v5623_v8, %v4153_v26  ;;  %v497_v37 = vshrl.u32 %v5627_v10, %v4153_v26  ;;  %v4166_v39 = vshrl.u32 %v727_v23, 30 }
 0x14c   :  { %v500_v44 = vshrl.u32 %v5631_v15, %v4153_v26  ;;  %v503_v1 = vshrl.u32 %v5616_v18, %v4153_v26  ;;  %v5667_v48 = vsel %vm4190_vm8, 4294967295, %v5666_v48  ;;  %vm320_vm9 = vcmp.lt.s32.totalorder %v3911_v53, 0 }
 0x14d   :  { %v4172_v45 = vor.u32 %v491_v22, %v490_v2  ;;  %v4174_v60 = vor.u32 %v494_v36, %v493_v0  ;;  %v729_v51 = vshll.u32 %v4166_v39, 30  ;;  %5668 = vst [vmem:[#allocation9_spill] sm:$0xff] %v5667_v48  ;;  %v498_v34 = vor.u32 %v497_v37, %v496_v47 }
 0x14e   :  { %v501_v59 = vor.u32 %v500_v44, %v499_v57  ;;  %v504_v46 = vor.u32 %v503_v1, %v502_v63  ;;  %v299_v7 = vmul.f32 -0.00019511016, %v4151_v32  ;;  %vm505_vm10 = vcmp.lt.s32.totalorder %v4156_v17, 1 }
 0x14f   :  { %v4196_v41 = vsub.s32 %v726_v31, %v729_v51  ;;  %vm508_vm11 = vcmp.lt.s32.totalorder %v4156_v17, 4  ;;  %v441_v25 = vsel %vm320_vm9, %v440_v35, %v439_v14  ;;  %v513_v56 = vsel %vm505_vm10, %v4172_v45, %v4174_v60 }
 0x150   :  { %v514_v11 = vsel %vm508_vm11, %v501_v59, 920167782  ;;  %v786_v9 = vand.u32 2139095040, %v4184_v49  ;;  %vm507_vm13 = vcmp.lt.s32.totalorder %v4156_v17, 3  ;;  %v522_v12 = vand.u32 65535, %v4180_v40  ;;  %v4238_v51 = vpop.permute.xlu2 %2809 }
 0x151   :  { %vm731_vm12 = vcmp.lt.s32.totalorder %v4196_v41, 0  ;;  %v732_v13 = vsub.s32 0, %v4196_v41  ;;  %vm506_vm14 = vcmp.lt.s32.totalorder %v4156_v17, 2  ;;  %v515_v14 = vsel %vm507_vm13, %v498_v34, %v514_v11 }
 0x152   :  { %v517_v16 = vsel %vm505_vm10, %v4174_v60, %v498_v34  ;;  %v518_v21 = vsel %vm508_vm11, %v504_v46, 1326507024  ;;  %v4224_v19 = vsel %vm4190_vm8, %v3911_v53, %v441_v25  ;;  %v516_v31 = vsel %vm506_vm14, %v513_v56, %v515_v14 }
 0x153   :  { %v733_v43 = vsel %vm731_vm12, %v732_v13, %v4196_v41  ;;  %v519_v52 = vsel %vm507_vm13, %v501_v59, %v518_v21  ;;  %v546_v23 = vand.u32 65535, %v516_v31  ;;  %v547_v2 = vshrl.u32 %v516_v31, 16 }
 0x154   :  { %v734_v30 = vclz %v733_v43  ;;  %v520_v35 = vsel %vm506_vm14, %v517_v16, %v519_v52  ;;  %v523_v22 = vshrl.u32 %v4180_v40, 16  ;;  %v4236_v37 = vmul.f32 %v4224_v19, %v4224_v19 }
 0x155   :  { %v524_v0 = vand.u32 65535, %v520_v35  ;;  %v525_v36 = vshrl.u32 %v520_v35, 16  ;;  %v549_v57 = vmul.u32 %v547_v2, %v522_v12  ;;  %v300_v44 = vadd.f32 0.008332121, %v299_v7 }
 0x156   :  { %v3649_v47 = vadd.s32 4294967294, %v734_v30  ;;  %v722_v59 = vadd.s32 %v4125_v28, %v4121_v55  ;;  %v550_v46 = vmul.u32 %v546_v23, %v523_v22  ;;  %v787_v25 = vshrl.u32 %v786_v9, 23 }
 0x157   :  { %v527_v63 = vmul.u32 %v525_v36, %v522_v12  ;;  %v528_v1 = vmul.u32 %v524_v0, %v523_v22  ;;  %v526_v11 = vmul.u32 %v524_v0, %v522_v12  ;;  %v552_v14 = vshll.u32 %v549_v57, 16 }
 0x158   :  { %vm3650_vm15 = vcmp.lt.s32.totalorder %v3649_v47, 0  ;;  %v454_v16 = vmul.f32 -0.00019511016, %v4236_v37  ;;  %v529_v43 = vmul.u32 %v525_v36, %v523_v22  ;;  %v548_v31 = vmul.u32 %v546_v23, %v522_v12 }
 0x159   :  { %v737_v56 = vsel %vm3650_vm15, 0, %v3649_v47  ;;  %v530_v13 = vshll.u32 %v527_v63, 16  ;;  %v532_v7 = vshll.u32 %v528_v1, 16  ;;  %v551_v30 = vmul.u32 %v547_v2, %v523_v22 }
 0x15a   :  { %v742_v21 = vsub.s32 4294967266, %v737_v56  ;;  %v738_v35 = vsub.s32 32, %v737_v56  ;;  %v554_v28 = vshll.u32 %v550_v46, 16  ;;  %vm556_vm3 = vc.u32 %v548_v31, %v552_v14 }
 0x15b   :  { %vm534_vm1 = vc.u32 %v526_v11, %v530_v13  ;;  %v536_v52 = vadd.s32 %v530_v13, %v526_v11  ;;  %v558_v9 = vadd.s32 %v552_v14, %v548_v31  ;;  %v510_v0 = vsel %vm508_vm11, %v498_v34, 2102212464 }
 0x15c   :  { %v743_v20 = vadd.s32 127, %v742_v21  ;;  %v535_v55 = vsel %vm534_vm1, 1, %v5629_v6  ;;  %v531_v47 = vshrl.u32 %v527_v63, 16  ;;  %v557_v12 = vsel %vm556_vm3, 1, %v5629_v6  ;;  %v4251_v63 = vpop.permute.xlu2 %2812 }
 0x15d   :  { %v537_v18 = vadd.s32 %v535_v55, %v529_v43  ;;  %vm538_vm2 = vc.u32 %v536_v52, %v532_v7  ;;  %v559_v2 = vadd.s32 %v557_v12, %v551_v30  ;;  %vm560_vm5 = vc.u32 %v558_v9, %v554_v28 }
 0x15e   :  { %v539_v36 = vsel %vm538_vm2, 1, %v5629_v6  ;;  %v744_v23 = vshll.u32 %v743_v20, 23  ;;  %v455_v22 = vadd.f32 0.008332121, %v454_v16  ;;  %v489_v13 = vshrl.u32 %v5633_v3, %v4153_v26 }
 0x15f   :  { %v541_v11 = vadd.s32 %v539_v36, %v537_v18  ;;  %v533_v21 = vshrl.u32 %v528_v1, 16  ;;  %v561_v43 = vsel %vm560_vm5, 1, %v5629_v6  ;;  %v740_v14 = vshrl.u32 %v722_v59, %v738_v35 }
 0x160   :  { %v553_v7 = vshrl.u32 %v549_v57, 16  ;;  %v563_v34 = vadd.s32 %v561_v43, %v559_v2  ;;  %v739_v52 = vshll.u32 %v4196_v41, %v737_v56  ;;  %v509_v18 = vsel %vm505_vm10, %v489_v13, %v4172_v45 }
 0x161   :  { %v542_v31 = vadd.s32 %v541_v11, %v531_v47  ;;  %v511_v20 = vsel %vm507_vm13, %v4174_v60, %v510_v0  ;;  %v3651_v26 = vadd.s32 4294967169, %v787_v25  ;;  %v745_v1 = vor.u32 4788187, %v744_v23  ;;  %v141_v11 = vpop.permute.xlu1 %140 }
 0x162   :  { %v555_v59 = vshrl.u32 %v550_v46, 16  ;;  %v564_v30 = vadd.s32 %v563_v34, %v553_v7  ;;  %v301_v57 = vmul.f32 %v300_v44, %v4151_v32  ;;  %v4263_v35 = vadd.s32 %v558_v9, %v554_v28  ;;  %v60_v46 = vpop.permute.xlu0 %59 }
 0x163   :  { %v4260_v16 = vadd.s32 %v542_v31, %v533_v21  ;;  %v456_v41 = vmul.f32 %v455_v22, %v4236_v37  ;;  %v741_v56 = vor.u32 %v740_v14, %v739_v52  ;;  %v512_v45 = vsel %vm506_vm14, %v509_v18, %v511_v20 }
 0x164   :  { %v565_v55 = vadd.s32 %v564_v30, %v555_v59  ;;  %v5618_v47 = vlaneseq  ;;  %v793_v60 = vadd.s32 1, %v3651_v26  ;;  %v746_v25 = vand.u32 2147483647, %v745_v1 }
 0x165   :  { %vm568_vm7 = vc.u32 %v4260_v16, %v4263_v35  ;;  %v566_v36 = vmul.u32 %v4180_v40, %v512_v45  ;;  %v78_v44 = vmul.f32 %v3897_v38, %v60_v46  ;;  %v302_v28 = vadd.f32 -0.16666654, %v301_v57  ;;  %v2816_v40 = vpop.permute.xlu2 %2815 }
 0x166   :  { %v569_v0 = vadd.s32 1, %v565_v55  ;;  %v457_v9 = vadd.f32 -0.16666654, %v456_v41  ;;  %v748_v12 = vcvt.s32.f32 %v741_v56  ;;  %v4273_v17 = vand.u32 127, %v5618_v47 }
 0x167   :  { %v5619_v22 = vand.u32 2147483647, %v4184_v49  ;;  %vm794_vm10 = vcmp.gt.s32.totalorder %v793_v60, 0  ;;  %v4278_v21 = vmul.f32 %v3897_v38, %v4105_v24  ;;  %v4281_v14 = vsel %vm154_vm0, %v78_v44, %v141_v11 }
 0x168   :  { %v570_v23 = vsel %vm568_vm7, %v569_v0, %v565_v55  ;;  %v749_v13 = vmul.f32 %v748_v12, %v746_v25  ;;  %5669 = vst [vmem:[#allocation10_spill] sm:$0xff] %v4281_v14  ;;  %v4285_v31 = vmul.f32 %v3897_v38, %v4133_v54  ;;  %v303_v7 = vmul.f32 %v302_v28, %v4151_v32 }
 0x169   :  { %v571_v2 = vadd.s32 %v570_v23, %v566_v36  ;;  %v458_v34 = vmul.f32 %v457_v9, %v4236_v37  ;;  %v795_v52 = vsel %vm794_vm10, %v793_v60, 0  ;;  %vm2821_vm11 = vcmp.eq.s32.totalorder %v4273_v17, %v4186_v4 }
 0x16a   :  { %vm2824_vm12 = vcmp.eq.s32.totalorder %v4273_v17, %v4238_v51  ;;  %v790_v18 = vand.u32 8388607, %v5619_v22  ;;  %vm2825_vm13 = vcmp.eq.s32.totalorder %v4273_v17, %v4251_v63  ;;  %vm2826_vm14 = vcmp.eq.s32.totalorder %v4273_v17, %v2816_v40 }
 0x16b   :  { %v572_v43 = vadd.s32 536870912, %v571_v2  ;;  %v750_v38 = vxor.u32 2147483648, %v749_v13  ;;  %v941_v54 = vand.u32 2139095040, %v4281_v14  ;;  %v287_v20 = vsub.s32 4, %v3997_v29 }
 0x16c   :  { %v442_v26 = vsub.s32 4, %v4055_v50  ;;  %v797_v59 = vand.u32 31, %v795_v52  ;;  %v304_v30 = vadd.f32 1.0, %v303_v7  ;;  %v459_v57 = vadd.f32 1.0, %v458_v34 }
 0x16d   :  { %v4293_v24 = vshrl.u32 %v572_v43, 30  ;;  %v752_v41 = vsub.s32 4, %v4166_v39  ;;  %v942_v56 = vshrl.u32 %v941_v54, 23  ;;  %v5620_v45 = vmov 0.0  }
 0x16e   :  { %v4309_v55 = vsel %vm2821_vm11, 1.0, %v5620_v45  ;;  %v4315_v60 = vsel %vm2824_vm12, 1.0, %v5620_v45  ;;  %vm630_vm15 = vcmp.lt.s32.totalorder %v3919_v62, 0  ;;  %v791_v25 = vor.u32 8388608, %v790_v18 }
 0x16f   :  { %v574_v1 = vshll.u32 %v4293_v24, 30  ;;  %5670 = vst [vmem:[#allocation11_spill] sm:$0xff] %v4315_v60  ;;  %v4322_v0 = vsel %vm2825_vm13, 1.0, %v5620_v45  ;;  %v4327_v4 = vsel %vm2826_vm14, 1.0, %v5620_v45  ;;  %v751_v46 = vsel %vm630_vm15, %v750_v38, %v749_v13 }
 0x170   :  { %5671 = vst [vmem:[#allocation12_spill] sm:$0xff] %v4322_v0  ;;  %v4334_v51 = vsel %vm165_vm4, %v287_v20, %v3997_v29  ;;  %vm4338_vm1 = vcmp.le.f32.partialorder %v628_v27, 0.7853982  ;;  %v5673_v44 = vmov 0  ;;  %v798_v63 = vsub.s32 32, %v797_v59 }
 0x171   :  { %5672 = vst [vmem:[#allocation13_spill] sm:$0xff] %v4327_v4  ;;  %v4329_v36 = vsub.s32 %v571_v2, %v574_v1  ;;  %v5674_v44 = vsel %vm4338_vm1, 4294967295, %v5673_v44  ;;  %v3654_v28 = vadd.s32 4294967169, %v942_v56  ;;  %v4343_v9 = vmul.f32 %v304_v30, %v4146_v33 }
 0x172   :  { %5675 = vst [vmem:[#allocation14_spill] sm:$0xff] %v5674_v44  ;;  %v4348_v12 = vsel %vm320_vm9, %v442_v26, %v4055_v50  ;;  %v4351_v23 = vmul.f32 %v459_v57, %v4224_v19  ;;  %v4354_v29 = vsel %vm630_vm15, %v752_v41, %v4166_v39  ;;  %v4359_v27 = vsel %vm4338_vm1, %v3919_v62, %v751_v46 }
 0x173   :  { %5676 = vst [vmem:[#allocation15_spill] sm:$0xff] %v4343_v9  ;;  %v4361_v11 = vshrl.u32 %v795_v52, 5  ;;  %v4363_v33 = vshll.u32 %v791_v25, 8  ;;  %v5622_v2 = vand.u32 2147483647, %v4281_v14  ;;  %v577_v50 = vsub.s32 0, %v4329_v36 }
 0x174   :  { %5677 = vst [vmem:[#allocation16_spill] sm:$0xff] %v4348_v12  ;;  %v800_v13 = vshll.u32 %v5633_v3, %v797_v59  ;;  %v803_v19 = vshll.u32 %v5625_v5, %v797_v59  ;;  %v806_v39 = vshll.u32 %v5623_v8, %v797_v59  ;;  %vm576_vm4 = vcmp.lt.s32.totalorder %v4329_v36, 0 }
 0x175   :  { %5678 = vst [vmem:[#allocation17_spill] sm:$0xff] %v4351_v23  ;;  %v801_v40 = vshrl.u32 %v5625_v5, %v798_v63  ;;  %v804_v43 = vshrl.u32 %v5623_v8, %v798_v63  ;;  %v948_v7 = vadd.s32 1, %v3654_v28  ;;  %v4375_v34 = vmul.f32 %v4359_v27, %v4359_v27 }
 0x176   :  { %5679 = vst [vmem:[#allocation18_spill] sm:$0xff] %v4354_v29  ;;  %v807_v52 = vshrl.u32 %v5627_v10, %v798_v63  ;;  %v809_v18 = vshll.u32 %v5627_v10, %v797_v59  ;;  %v810_v38 = vshrl.u32 %v5631_v15, %v798_v63  ;;  %v4381_v54 = vshll.u32 %v5631_v15, %v797_v59 }
 0x177   :  { %5680 = vst [vmem:[#allocation19_spill] sm:$0xff] %v4359_v27  ;;  %v5682_v20 = vmov 1326507024   ;;  %v4387_v1 = vand.u32 65535, %v4363_v33  ;;  %vm949_vm9 = vcmp.gt.s32.totalorder %v948_v7, 0  ;;  %v4391_v30 = vadd.s32 %v4263_v35, %v4260_v16 }
 0x178   :  { %5681 = vst [vmem:[#allocation20_spill] sm:$0xff] %v4363_v33  ;;  %v4384_v26 = vshrl.u32 %v5682_v20, %v798_v63  ;;  %v578_v57 = vsel %vm576_vm4, %v577_v50, %v4329_v36  ;;  %v4395_v41 = vshrl.u32 %v4363_v33, 16  ;;  %v950_v56 = vsel %vm949_vm9, %v948_v7, 0 }
 0x179   :  { %v799_v59 = vshrl.u32 %v5633_v3, %v798_v63  ;;  %v802_v25 = vor.u32 %v801_v40, %v800_v13  ;;  %v805_v46 = vor.u32 %v804_v43, %v803_v19  ;;  %v952_v28 = vand.u32 31, %v950_v56 }
 0x17a   :  { %v764_v47 = vmul.f32 -0.00019511016, %v4375_v34  ;;  %v4399_v22 = vor.u32 %v807_v52, %v806_v39  ;;  %v4401_v45 = vor.u32 %v810_v38, %v809_v18  ;;  %vm815_vm2 = vcmp.lt.s32.totalorder %v4361_v11, 1 }
 0x17b   :  { %v579_v16 = vclz %v578_v57  ;;  %v814_v35 = vor.u32 %v4384_v26, %v4381_v54  ;;  %vm817_vm3 = vcmp.lt.s32.totalorder %v4361_v11, 3  ;;  %v4407_v50 = vsub.s32 32, %v952_v28 }
 0x17c   :  { %v945_v63 = vand.u32 8388607, %v5622_v2  ;;  %v4411_v13 = vshrl.u32 %v950_v56, 5  ;;  %v955_v19 = vshll.u32 %v5633_v3, %v952_v28  ;;  %v958_v39 = vshll.u32 %v5625_v5, %v952_v28 }
 0x17d   :  { %v956_v40 = vshrl.u32 %v5625_v5, %v4407_v50  ;;  %v959_v43 = vshrl.u32 %v5623_v8, %v4407_v50  ;;  %v961_v7 = vshll.u32 %v5623_v8, %v952_v28  ;;  %v962_v52 = vshrl.u32 %v5627_v10, %v4407_v50 }
 0x17e   :  { %vm816_vm5 = vcmp.lt.s32.totalorder %v4361_v11, 2  ;;  %v964_v18 = vshll.u32 %v5627_v10, %v952_v28  ;;  %v965_v38 = vshrl.u32 %v5631_v15, %v4407_v50  ;;  %v967_v54 = vshll.u32 %v5631_v15, %v952_v28  ;;  %v3763_v28 = vld [vmem:[%s5611_s0] sm:$0xff] }
 0x17f   :  { %v968_v26 = vshrl.u32 %v5682_v20, %v4407_v50  ;;  %vm818_vm7 = vcmp.lt.s32.totalorder %v4361_v11, 4  ;;  %v4430_v57 = vor.u32 %v956_v40, %v955_v19  ;;  %v4432_v56 = vor.u32 %v959_v43, %v958_v39  ;;  %2667 = vrot.lane.b32.xlu1 %v3763_v28, %s3807_s21 }
 0x180   :  { %v963_v2 = vor.u32 %v962_v52, %v961_v7  ;;  %v3646_v8 = vadd.s32 4294967294, %v579_v16  ;;  %v819_v5 = vsel %vm815_vm2, %v799_v59, %v802_v25  ;;  %v966_v10 = vor.u32 %v965_v38, %v964_v18  ;;  %v145_v7 = vpop.permute.xlu0 %144 }
 0x181   :  { %v969_v6 = vor.u32 %v968_v26, %v967_v54  ;;  %v4442_v19 = vsel %vm815_vm2, %v802_v25, %v805_v46  ;;  %v946_v39 = vor.u32 8388608, %v945_v63  ;;  %vm970_vm10 = vcmp.lt.s32.totalorder %v4411_v13, 1 }
 0x182   :  { %vm973_vm11 = vcmp.lt.s32.totalorder %v4411_v13, 4  ;;  %v820_v59 = vsel %vm818_vm7, %v4399_v22, 2102212464  ;;  %vm972_vm12 = vcmp.lt.s32.totalorder %v4411_v13, 3  ;;  %v978_v16 = vsel %vm970_vm10, %v4430_v57, %v4432_v56 }
 0x183   :  { %v979_v25 = vsel %vm973_vm11, %v966_v10, 920167782  ;;  %vm971_vm13 = vcmp.lt.s32.totalorder %v4411_v13, 2  ;;  %v982_v40 = vsel %vm970_vm10, %v4432_v56, %v963_v2  ;;  %v983_v43 = vsel %vm973_vm11, %v969_v6, 1326507024 }
 0x184   :  { %v980_v63 = vsel %vm972_vm12, %v963_v2, %v979_v25  ;;  %v765_v52 = vadd.f32 0.008332121, %v764_v47  ;;  %vm3647_vm14 = vcmp.lt.s32.totalorder %v3646_v8, 0  ;;  %v984_v38 = vsel %vm972_vm12, %v966_v10, %v983_v43  ;;  %v3764_v43 = vld [vmem:[%s5611_s0 + $0x8] sm:$0xff] }
 0x185   :  { %v981_v18 = vsel %vm971_vm13, %v978_v16, %v980_v63  ;;  %v821_v54 = vsel %vm817_vm3, %v805_v46, %v820_v59  ;;  %v4473_v26 = vsel %vm815_vm2, %v805_v46, %v4399_v22  ;;  %v985_v6 = vsel %vm971_vm13, %v982_v40, %v984_v38 }
 0x186   :  { %v4477_v28 = vshll.u32 %v946_v39, 8  ;;  %v989_v47 = vand.u32 65535, %v985_v6  ;;  %v990_v25 = vshrl.u32 %v985_v6, 16  ;;  %v1012_v15 = vshrl.u32 %v981_v18, 16 }
 0x187   :  { %v4481_v16 = vsel %vm154_vm0, %v4285_v31, %v145_v7  ;;  %v4483_v10 = vsel %vm3647_vm14, 0, %v3646_v8  ;;  %v4488_v59 = vsel %vm818_vm7, %v4401_v45, 920167782  ;;  %v4493_v39 = vmul.f32 %v765_v52, %v4375_v34  ;;  %2669 = vrot.lane.b32.xlu1 %v3764_v43, %s3807_s21 }
 0x188   :  { %5683 = vst [vmem:[#allocation21_spill] sm:$0xff] %v4481_v16  ;;  %v987_v46 = vand.u32 65535, %v4477_v28  ;;  %v988_v63 = vshrl.u32 %v4477_v28, 16  ;;  %v4498_v31 = vsel %vm818_vm7, %v814_v35, 1326507024  ;;  %v1011_v8 = vand.u32 65535, %v981_v18 }
 0x189   :  { %v4506_v7 = vsel %vm816_vm5, %v819_v5, %v821_v54  ;;  %v1251_v6 = vand.u32 2139095040, %v4481_v16  ;;  %v583_v40 = vsub.s32 32, %v4483_v10  ;;  %v587_v35 = vsub.s32 4294967266, %v4483_v10 }
 0x18a   :  { %5684 = vst [vmem:[#allocation22_spill] sm:$0xff] %v4506_v7  ;;  %v992_v38 = vmul.u32 %v990_v25, %v987_v46  ;;  %v993_v52 = vmul.u32 %v989_v47, %v988_v63  ;;  %v1014_v3 = vmul.u32 %v1012_v15, %v987_v46  ;;  %v5685_v49 = vmov 683565275  }
 0x18b   :  { %v954_v4 = vshrl.u32 %v5685_v49, %v4407_v50  ;;  %v975_v43 = vsel %vm973_vm11, %v963_v2, 2102212464  ;;  %v991_v62 = vmul.u32 %v989_v47, %v987_v46  ;;  %v994_v54 = vmul.u32 %v990_v25, %v988_v63 }
 0x18c   :  { %v995_v5 = vshll.u32 %v992_v38, 16  ;;  %v1013_v0 = vmul.u32 %v1011_v8, %v987_v46  ;;  %v1015_v44 = vmul.u32 %v1011_v8, %v988_v63  ;;  %v1017_v29 = vshll.u32 %v1014_v3, 16 }
 0x18d   :  { %v997_v60 = vshll.u32 %v993_v52, 16  ;;  %v1252_v53 = vshrl.u32 %v1251_v6, 23  ;;  %v974_v18 = vsel %vm970_vm10, %v954_v4, %v4430_v57  ;;  %v5686_v48 = vmov 0   ;;  %v3765_v4 = vld [vmem:[%s5611_s0 + $0x10] sm:$0xff] }
 0x18e   :  { %vm999_vm15 = vc.u32 %v991_v62, %v995_v5  ;;  %v1001_v23 = vadd.s32 %v995_v5, %v991_v62  ;;  %v1016_v50 = vmul.u32 %v1012_v15, %v988_v63  ;;  %v1019_v27 = vshll.u32 %v1015_v44, 16 }
 0x18f   :  { %v1000_v12 = vsel %vm999_vm15, 1, %v5686_v48  ;;  %vm1021_vm9 = vc.u32 %v1013_v0, %v1017_v29  ;;  %v1023_v2 = vadd.s32 %v1017_v29, %v1013_v0  ;;  %v976_v47 = vsel %vm972_vm12, %v4432_v56, %v975_v43  ;;  %2671 = vrot.lane.b32.xlu1 %v3765_v4, %s3807_s21 }
 0x190   :  { %v1002_v14 = vadd.s32 %v1000_v12, %v994_v54  ;;  %vm1003_vm4 = vc.u32 %v1001_v23, %v997_v60  ;;  %v1022_v62 = vsel %vm1021_vm9, 1, %v5686_v48  ;;  %v3660_v46 = vadd.s32 4294967169, %v1252_v53 }
 0x191   :  { %v1004_v25 = vsel %vm1003_vm4, 1, %v5686_v48  ;;  %v996_v15 = vshrl.u32 %v992_v38, 16  ;;  %v1024_v60 = vadd.s32 %v1022_v62, %v1016_v50  ;;  %vm1025_vm2 = vc.u32 %v1023_v2, %v1019_v27 }
 0x192   :  { %v1006_v12 = vadd.s32 %v1004_v25, %v1002_v14  ;;  %v585_v0 = vshrl.u32 %v4391_v30, %v583_v40  ;;  %v4530_v23 = vadd.s32 127, %v587_v35  ;;  %v1026_v29 = vsel %vm1025_vm2, 1, %v5686_v48  ;;  %v143_v30 = vpop.permute.xlu1 %142 }
 0x193   :  { %v1258_v57 = vadd.s32 1, %v3660_v46  ;;  %v998_v56 = vshrl.u32 %v993_v52, 16  ;;  %v1018_v53 = vshrl.u32 %v1014_v3, 16  ;;  %v1028_v8 = vadd.s32 %v1026_v29, %v1024_v60 }
 0x194   :  { %v1007_v63 = vadd.s32 %v1006_v12, %v996_v15  ;;  %v584_v6 = vshll.u32 %v4329_v36, %v4483_v10  ;;  %v977_v38 = vsel %vm971_vm13, %v974_v18, %v976_v47  ;;  %v5687_v14 = vand.u32 2147483647, %v4481_v16 }
 0x195   :  { %vm1259_vm7 = vcmp.gt.s32.totalorder %v1258_v57, 0  ;;  %v1020_v35 = vshrl.u32 %v1015_v44, 16  ;;  %v1029_v5 = vadd.s32 %v1028_v8, %v1018_v53  ;;  %v4547_v3 = vsel %vm817_vm3, %v4399_v22, %v4488_v59 }
 0x196   :  { %v1255_v43 = vand.u32 8388607, %v5687_v14  ;;  %v4539_v40 = vadd.s32 %v1007_v63, %v998_v56  ;;  %v1260_v54 = vsel %vm1259_vm7, %v1258_v57, 0  ;;  %v4541_v52 = vor.u32 %v585_v0, %v584_v6  ;;  %v2793_v14 = vld [vmem:[%s5613_s2 + $0x10] sm:$0xff] }
 0x197   :  { %v4549_v36 = vadd.s32 %v1023_v2, %v1019_v27  ;;  %v1262_v13 = vand.u32 31, %v1260_v54  ;;  %v589_v10 = vshll.u32 %v4530_v23, 23  ;;  %v1030_v18 = vadd.s32 %v1029_v5, %v1020_v35  ;;  %v3766_v27 = vld [vmem:[%s5611_s0 + $0x18] sm:$0xff]  ;;  %2882 = vmatpush.msra.mxu1 %v2793_v14 }
 0x198   :  { %v1031_v50 = vmul.u32 %v4477_v28, %v977_v38  ;;  %v4555_v44 = vsel %vm154_vm0, %v4278_v21, %v143_v30  ;;  %v1256_v47 = vor.u32 8388608, %v1255_v43  ;;  %v4559_v25 = vshrl.u32 %v1260_v54, 5  ;;  %2673 = vrot.lane.b32.xlu1 %v3766_v27, %s3807_s21 }
 0x199   :  { %vm1033_vm10 = vc.u32 %v4539_v40, %v4549_v36  ;;  %v4561_v22 = vsub.s32 32, %v1262_v13  ;;  %v1034_v59 = vadd.s32 1, %v1030_v18  ;;  %v1265_v28 = vshll.u32 %v5685_v49, %v1262_v13 }
 0x19a   :  { %v5688_v2 = vmov 2475754826   ;;  %v5689_v62 = vmov 2131351028   ;;  %v5690_v12 = vmov 2102212464  }
 0x19b   :  { %v1268_v21 = vshll.u32 %v5688_v2, %v1262_v13  ;;  %v1271_v46 = vshll.u32 %v5689_v62, %v1262_v13  ;;  %v1266_v4 = vshrl.u32 %v5688_v2, %v4561_v22  ;;  %v1269_v15 = vshrl.u32 %v5689_v62, %v4561_v22 }
 0x19c   :  { %v1272_v60 = vshrl.u32 %v5690_v12, %v4561_v22  ;;  %v1274_v0 = vshll.u32 %v5690_v12, %v1262_v13  ;;  %v1035_v23 = vsel %vm1033_vm10, %v1034_v59, %v1030_v18  ;;  %v5691_v29 = vmov 920167782  }
 0x19d   :  { %v1275_v57 = vshrl.u32 %v5691_v29, %v4561_v22  ;;  %v1277_v56 = vshll.u32 %v5691_v29, %v1262_v13  ;;  %v1278_v63 = vshrl.u32 %v5682_v20, %v4561_v22  ;;  %v1036_v53 = vadd.s32 %v1035_v23, %v1031_v50 }
 0x19e   :  { %v4582_v8 = vor.u32 %v1266_v4, %v1265_v28  ;;  %v4584_v6 = vor.u32 %v1269_v15, %v1268_v21  ;;  %v1273_v38 = vor.u32 %v1272_v60, %v1271_v46  ;;  %vm1280_vm0 = vcmp.lt.s32.totalorder %v4559_v25, 1 }
 0x19f   :  { %v1276_v43 = vor.u32 %v1275_v57, %v1274_v0  ;;  %v1279_v30 = vor.u32 %v1278_v63, %v1277_v56  ;;  %v4590_v35 = vshll.u32 %v1256_v47, 8  ;;  %v1037_v5 = vadd.s32 536870912, %v1036_v53 }
 0x1a0   :  { %vm1283_vm11 = vcmp.lt.s32.totalorder %v4559_v25, 4  ;;  %v1288_v54 = vsel %vm1280_vm0, %v4582_v8, %v4584_v6  ;;  %v1096_v13 = vand.u32 2139095040, %v4555_v44  ;;  %vm1282_vm12 = vcmp.lt.s32.totalorder %v4559_v25, 3 }
 0x1a1   :  { %v1289_v18 = vsel %vm1283_vm11, %v1276_v43, 920167782  ;;  %v1292_v50 = vsel %vm1280_vm0, %v4584_v6, %v1273_v38  ;;  %v1293_v47 = vsel %vm1283_vm11, %v1279_v30, 1326507024  ;;  %v4606_v27 = vshrl.u32 %v1037_v5, 30 }
 0x1a2   :  { %vm1281_vm13 = vcmp.lt.s32.totalorder %v4559_v25, 2  ;;  %v1290_v59 = vsel %vm1282_vm12, %v1273_v38, %v1289_v18  ;;  %v1294_v28 = vsel %vm1282_vm12, %v1276_v43, %v1293_v47  ;;  %v590_v21 = vor.u32 4788187, %v589_v10 }
 0x1a3   :  { %5692 = vst [vmem:[#allocation23_spill] sm:$0xff] %v4606_v27  ;;  %v1291_v46 = vsel %vm1281_vm13, %v1288_v54, %v1290_v59  ;;  %v1295_v4 = vsel %vm1281_vm13, %v1292_v50, %v1294_v28  ;;  %v1297_v15 = vand.u32 65535, %v4590_v35  ;;  %v1039_v60 = vshll.u32 %v4606_v27, 30 }
 0x1a4   :  { %v1299_v0 = vand.u32 65535, %v1295_v4  ;;  %v1300_v23 = vshrl.u32 %v1295_v4, 16  ;;  %v1097_v57 = vshrl.u32 %v1096_v13, 23  ;;  %v4623_v56 = vsel %vm817_vm3, %v4401_v45, %v4498_v31 }
 0x1a5   :  { %v1298_v10 = vshrl.u32 %v4590_v35, 16  ;;  %v1321_v63 = vand.u32 65535, %v1291_v46  ;;  %v1322_v14 = vshrl.u32 %v1291_v46, 16  ;;  %v4627_v43 = vadd.f32 -0.16666654, %v4493_v39 }
 0x1a6   :  { %v4631_v5 = vsub.s32 %v1036_v53, %v1039_v60  ;;  %v1302_v54 = vmul.u32 %v1300_v23, %v1297_v15  ;;  %vm475_vm14 = vcmp.lt.s32.totalorder %v4097_v58, 0  ;;  %v591_v13 = vand.u32 2147483647, %v590_v21 }
 0x1a7   :  { %v593_v18 = vcvt.s32.f32 %v4541_v52  ;;  %v1303_v45 = vmul.u32 %v1299_v0, %v1298_v10  ;;  %v1324_v31 = vmul.u32 %v1322_v14, %v1297_v15  ;;  %v1301_v47 = vmul.u32 %v1299_v0, %v1297_v15 }
 0x1a8   :  { %v1042_v50 = vsub.s32 0, %v4631_v5  ;;  %v1305_v59 = vshll.u32 %v1302_v54, 16  ;;  %v3657_v28 = vadd.s32 4294967169, %v1097_v57  ;;  %vm1041_vm3 = vcmp.lt.s32.totalorder %v4631_v5, 0 }
 0x1a9   :  { %v1304_v39 = vmul.u32 %v1300_v23, %v1298_v10  ;;  %v1323_v46 = vmul.u32 %v1321_v63, %v1297_v15  ;;  %v1325_v4 = vmul.u32 %v1321_v63, %v1298_v10  ;;  %v1307_v53 = vshll.u32 %v1303_v45, 16 }
 0x1aa   :  { %vm1309_vm15 = vc.u32 %v1301_v47, %v1305_v59  ;;  %v1311_v60 = vadd.s32 %v1305_v59, %v1301_v47  ;;  %v1327_v30 = vshll.u32 %v1324_v31, 16  ;;  %v1264_v21 = vshrl.u32 %v5685_v49, %v4561_v22 }
 0x1ab   :  { %v1285_v52 = vsel %vm1283_vm11, %v1273_v38, 2102212464  ;;  %v1310_v27 = vsel %vm1309_vm15, 1, %v5686_v48  ;;  %v1326_v0 = vmul.u32 %v1322_v14, %v1298_v10  ;;  %v1043_v57 = vsel %vm1041_vm3, %v1042_v50, %v4631_v5 }
 0x1ac   :  { %v1312_v7 = vadd.s32 %v1310_v27, %v1304_v39  ;;  %vm1313_vm4 = vc.u32 %v1311_v60, %v1307_v53  ;;  %vm1331_vm9 = vc.u32 %v1323_v46, %v1327_v30  ;;  %v1329_v23 = vshll.u32 %v1325_v4, 16  ;;  %v2792_v39 = vld [vmem:[%s5613_s2 + $0x8] sm:$0xff] }
 0x1ad   :  { %v1314_v15 = vsel %vm1313_vm4, 1, %v5686_v48  ;;  %v1332_v63 = vsel %vm1331_vm9, 1, %v5686_v48  ;;  %v1333_v47 = vadd.s32 %v1327_v30, %v1323_v46  ;;  %v1306_v59 = vshrl.u32 %v1302_v54, 16  ;;  %2883 = vmatpush.msra.mxu1 %v2792_v39 }
 0x1ae   :  { %v1316_v33 = vadd.s32 %v1314_v15, %v1312_v7  ;;  %v1334_v22 = vadd.s32 %v1332_v63, %v1326_v0  ;;  %v1103_v16 = vadd.s32 1, %v3657_v28  ;;  %v1044_v9 = vclz %v1043_v57 }
 0x1af   :  { %v1284_v38 = vsel %vm1280_vm0, %v1264_v21, %v4582_v8  ;;  %v1286_v27 = vsel %vm1282_vm12, %v4584_v6, %v1285_v52  ;;  %vm1335_vm2 = vc.u32 %v1333_v47, %v1329_v23  ;;  %v5693_v10 = vsub.s32 4, %v4293_v24 }
 0x1b0   :  { %v1308_v7 = vshrl.u32 %v1303_v45, 16  ;;  %v1317_v30 = vadd.s32 %v1316_v33, %v1306_v59  ;;  %v1336_v54 = vsel %vm1335_vm2, 1, %v5686_v48  ;;  %v594_v50 = vmul.f32 %v593_v18, %v591_v13 }
 0x1b1   :  { %v4656_v14 = vsel %vm475_vm14, %v5693_v10, %v4293_v24  ;;  %v4663_v8 = vsel %vm816_vm5, %v4442_v19, %v4547_v3  ;;  %v1328_v6 = vshrl.u32 %v1324_v31, 16  ;;  %v1338_v28 = vadd.s32 %v1336_v54, %v1334_v22 }
 0x1b2   :  { %v1287_v24 = vsel %vm1281_vm13, %v1284_v38, %v1286_v27  ;;  %v4670_v45 = vadd.s32 %v1317_v30, %v1308_v7  ;;  %v5654_v33 = vand.u32 2147483647, %v4555_v44  ;;  %vm1104_vm7 = vcmp.gt.s32.totalorder %v1103_v16, 0 }
 0x1b3   :  { %v3655_v13 = vadd.s32 4294967294, %v1044_v9  ;;  %v1330_v18 = vshrl.u32 %v1325_v4, 16  ;;  %v1339_v46 = vadd.s32 %v1338_v28, %v1328_v6  ;;  %v1105_v19 = vsel %vm1104_vm7, %v1103_v16, 0 }
 0x1b4   :  { %v4677_v3 = vsel %vm816_vm5, %v4473_v26, %v4623_v56  ;;  %v5656_v31 = vand.u32 65535, %v4663_v8  ;;  %v4680_v25 = vadd.s32 %v1333_v47, %v1329_v23  ;;  %v1107_v53 = vand.u32 31, %v1105_v19 }
 0x1b5   :  { %v768_v60 = vmul.f32 %v4627_v43, %v4375_v34  ;;  %v595_v21 = vxor.u32 2147483648, %v594_v50  ;;  %v5655_v9 = vshrl.u32 %v4663_v8, 16  ;;  %v1340_v4 = vadd.s32 %v1339_v46, %v1330_v18 }
 0x1b6   :  { %v5694_v16 = vand.u32 2147483647, %v4097_v58  ;;  %v1341_v11 = vmul.u32 %v4590_v35, %v1287_v24  ;;  %vm1343_vm5 = vc.u32 %v4670_v45, %v4680_v25  ;;  %v1100_v26 = vand.u32 8388607, %v5654_v33 }
 0x1b7   :  { %v4696_v56 = vsub.s32 32, %v1107_v53  ;;  %vm3656_vm0 = vcmp.lt.s32.totalorder %v3655_v13, 0  ;;  %v1344_v43 = vadd.s32 1, %v1340_v4  ;;  %v4698_v0 = vshrl.u32 %v1105_v19, 5 }
 0x1b8   :  { %vm4687_vm10 = vcmp.le.f32.partialorder %v5694_v16, 0.7853982  ;;  %v1110_v57 = vshll.u32 %v5685_v49, %v1107_v53  ;;  %v1113_v23 = vshll.u32 %v5688_v2, %v1107_v53  ;;  %v1116_v59 = vshll.u32 %v5689_v62, %v1107_v53 }
 0x1b9   :  { %v1111_v15 = vshrl.u32 %v5688_v2, %v4696_v56  ;;  %v1114_v35 = vshrl.u32 %v5689_v62, %v4696_v56  ;;  %v1117_v63 = vshrl.u32 %v5690_v12, %v4696_v56  ;;  %v1345_v47 = vsel %vm1343_vm5, %v1344_v43, %v1340_v4 }
 0x1ba   :  { %v1119_v22 = vshll.u32 %v5690_v12, %v1107_v53  ;;  %v1120_v38 = vshrl.u32 %v5691_v29, %v4696_v56  ;;  %v1346_v27 = vadd.s32 %v1345_v47, %v1341_v11  ;;  %v1101_v10 = vor.u32 8388608, %v1100_v26 }
 0x1bb   :  { %v4712_v7 = vor.u32 %v1111_v15, %v1110_v57  ;;  %v4714_v30 = vor.u32 %v1114_v35, %v1113_v23  ;;  %v4716_v2 = vor.u32 %v1117_v63, %v1116_v59  ;;  %v1122_v6 = vshll.u32 %v5691_v29, %v1107_v53 }
 0x1bc   :  { %v1121_v54 = vor.u32 %v1120_v38, %v1119_v22  ;;  %v1123_v28 = vshrl.u32 %v5682_v20, %v4696_v56  ;;  %v596_v62 = vsel %vm475_vm14, %v595_v21, %v594_v50  ;;  %v5658_v12 = vand.u32 65535, %v4677_v3 }
 0x1bd   :  { %v5657_v39 = vshrl.u32 %v4677_v3, 16  ;;  %v1347_v24 = vadd.s32 536870912, %v1346_v27  ;;  %v4726_v18 = vsel %vm3656_vm0, 0, %v3655_v13  ;;  %vm1125_vm11 = vcmp.lt.s32.totalorder %v4698_v0, 1 }
 0x1be   :  { %v1124_v46 = vor.u32 %v1123_v28, %v1122_v6  ;;  %vm1128_vm12 = vcmp.lt.s32.totalorder %v4698_v0, 4  ;;  %vm1127_vm13 = vcmp.lt.s32.totalorder %v4698_v0, 3  ;;  %v1133_v20 = vsel %vm1125_vm11, %v4712_v7, %v4714_v30 }
 0x1bf   :  { %v4730_v29 = vshrl.u32 %v1347_v24, 30  ;;  %v1134_v50 = vsel %vm1128_vm12, %v1121_v54, 920167782  ;;  %v4742_v13 = vsel %vm4687_vm10, %v4097_v58, %v596_v62  ;;  %vm1126_vm14 = vcmp.lt.s32.totalorder %v4698_v0, 2 }
 0x1c0   :  { %v1135_v19 = vsel %vm1127_vm13, %v4716_v2, %v1134_v50  ;;  %v4748_v53 = vshll.u32 %v1101_v10, 8  ;;  %v4753_v21 = vmul.u32 %v5656_v31, %v4387_v1  ;;  %v1137_v11 = vsel %vm1125_vm11, %v4714_v30, %v4716_v2 }
 0x1c1   :  { %5697 = vst [vmem:[#allocation24_spill] sm:$0xff] %v4730_v29  ;;  %v1349_v4 = vshll.u32 %v4730_v29, 30  ;;  %v1136_v16 = vsel %vm1126_vm14, %v1133_v20, %v1135_v19  ;;  %v4762_v26 = vadd.f32 1.0, %v768_v60  ;;  %v4767_v43 = vmul.u32 %v5655_v9, %v4387_v1 }
 0x1c2   :  { %v1052_v57 = vsub.s32 4294967266, %v4726_v18  ;;  %v1138_v15 = vsel %vm1128_vm12, %v1124_v46, 1326507024  ;;  %v4774_v23 = vmul.f32 %v4742_v13, %v4742_v13  ;;  %v1167_v63 = vshrl.u32 %v1136_v16, 16 }
 0x1c3   :  { %v4776_v35 = vsub.s32 %v1346_v27, %v1349_v4  ;;  %v1139_v60 = vsel %vm1127_vm13, %v1121_v54, %v1138_v15  ;;  %v1142_v59 = vand.u32 65535, %v4748_v53  ;;  %v1143_v22 = vshrl.u32 %v4748_v53, 16 }
 0x1c4   :  { %v1140_v47 = vsel %vm1126_vm14, %v1137_v11, %v1139_v60  ;;  %v1166_v38 = vand.u32 65535, %v1136_v16  ;;  %v4789_v27 = vmul.u32 %v5658_v12, %v4387_v1  ;;  %v4794_v54 = vmul.u32 %v5657_v39, %v4387_v1 }
 0x1c5   :  { %vm1351_vm3 = vcmp.lt.s32.totalorder %v4776_v35, 0  ;;  %v1352_v10 = vsub.s32 0, %v4776_v35  ;;  %v1144_v6 = vand.u32 65535, %v1140_v47  ;;  %v1145_v28 = vshrl.u32 %v1140_v47, 16 }
 0x1c6   :  { %v1053_v62 = vadd.s32 127, %v1052_v57  ;;  %v1169_v24 = vmul.u32 %v1167_v63, %v1142_v59  ;;  %v609_v46 = vmul.f32 -0.00019511016, %v4774_v23  ;;  %v1032_v4 = vadd.s32 %v4549_v36, %v4539_v40 }
 0x1c7   :  { %v1353_v20 = vsel %vm1351_vm3, %v1352_v10, %v4776_v35  ;;  %v1147_v50 = vmul.u32 %v1145_v28, %v1142_v59  ;;  %v1148_v19 = vmul.u32 %v1144_v6, %v1143_v22  ;;  %v1048_v16 = vsub.s32 32, %v4726_v18 }
 0x1c8   :  { %v1354_v11 = vclz %v1353_v20  ;;  %v1172_v15 = vshll.u32 %v1169_v24, 16  ;;  %v1146_v60 = vmul.u32 %v1144_v6, %v1142_v59  ;;  %v1168_v33 = vmul.u32 %v1166_v38, %v1142_v59 }
 0x1c9   :  { %v1150_v47 = vshll.u32 %v1147_v50, 16  ;;  %v1170_v1 = vmul.u32 %v1166_v38, %v1143_v22  ;;  %v1054_v9 = vshll.u32 %v1053_v62, 23  ;;  %v1149_v31 = vmul.u32 %v1145_v28, %v1143_v22 }
 0x1ca   :  { %v3661_v57 = vadd.s32 4294967294, %v1354_v11  ;;  %v1152_v39 = vshll.u32 %v1148_v19, 16  ;;  %vm1176_vm4 = vc.u32 %v1168_v33, %v1172_v15  ;;  %v1178_v10 = vadd.s32 %v1172_v15, %v1168_v33 }
 0x1cb   :  { %vm1154_vm15 = vc.u32 %v1146_v60, %v1150_v47  ;;  %v1156_v12 = vadd.s32 %v1150_v47, %v1146_v60  ;;  %v1171_v40 = vmul.u32 %v1167_v63, %v1143_v22  ;;  %v1177_v36 = vsel %vm1176_vm4, 1, %v5686_v48  ;;  %v2798_v60 = vpop.permute.xlu1 %2797 }
 0x1cc   :  { %vm3662_vm9 = vcmp.lt.s32.totalorder %v3661_v57, 0  ;;  %v1155_v29 = vsel %vm1154_vm15, 1, %v5686_v48  ;;  %v1174_v59 = vshll.u32 %v1170_v1, 16  ;;  %v610_v38 = vadd.f32 0.008332121, %v609_v46 }
 0x1cd   :  { %v4803_v20 = vsel %vm3662_vm9, 0, %v3661_v57  ;;  %v1157_v6 = vadd.s32 %v1155_v29, %v1149_v31  ;;  %vm1158_vm2 = vc.u32 %v1156_v12, %v1152_v39  ;;  %v1049_v28 = vshll.u32 %v4631_v5, %v4726_v18 }
 0x1ce   :  { %v1362_v62 = vsub.s32 4294967266, %v4803_v20  ;;  %v1179_v11 = vadd.s32 %v1177_v36, %v1171_v40  ;;  %v1050_v33 = vshrl.u32 %v1032_v4, %v1048_v16  ;;  %v1055_v15 = vor.u32 4788187, %v1054_v9 }
 0x1cf   :  { %v1159_v47 = vsel %vm1158_vm2, 1, %v5686_v48  ;;  %vm1180_vm7 = vc.u32 %v1178_v10, %v1174_v59  ;;  %v1109_v63 = vshrl.u32 %v5685_v49, %v4696_v56  ;;  %v1130_v31 = vsel %vm1128_vm12, %v4716_v2, 2102212464 }
 0x1d0   :  { %v1151_v12 = vshrl.u32 %v1147_v50, 16  ;;  %v1161_v39 = vadd.s32 %v1159_v47, %v1157_v6  ;;  %v1363_v29 = vadd.s32 127, %v1362_v62  ;;  %v1181_v5 = vsel %vm1180_vm7, 1, %v5686_v48 }
 0x1d1   :  { %vm2820_vm5 = vcmp.eq.s32.totalorder %v4273_v17, %v2798_v60  ;;  %vm2700_vm0 = vcmask 130048   ;;  %v1153_v18 = vshrl.u32 %v1148_v19, 16  ;;  %v1173_v22 = vshrl.u32 %v1169_v24, 16 }
 0x1d2   :  { %v1162_v9 = vadd.s32 %v1161_v39, %v1151_v12  ;;  %v1183_v46 = vadd.s32 %v1181_v5, %v1179_v11  ;;  %v1129_v49 = vsel %vm1125_vm11, %v1109_v63, %v4712_v7  ;;  %v1131_v56 = vsel %vm1127_vm13, %v4714_v30, %v1130_v31 }
 0x1d3   :  { %v5698_v2 = vmov 0.0   ;;  %v292_v4 = vmul.f32 -0.001358992, %v4151_v32  ;;  %v1175_v57 = vshrl.u32 %v1170_v1, 16  ;;  %v290_v24 = vsel %vm4137_vm6, 0, %v4334_v51 }
 0x1d4   :  { %v3696_v50 = vsel %vm2820_vm5, 1.0, %v5698_v2  ;;  %v4824_v16 = vadd.s32 %v1162_v9, %v1153_v18  ;;  %v1184_v40 = vadd.s32 %v1183_v46, %v1173_v22  ;;  %v1358_v7 = vsub.s32 32, %v4803_v20 }
 0x1d5   :  { %3704 = vmatmul.msk.f32.vlgmr.msra.gmra.mxu1 %vm2700_vm0, %v3696_v50  ;;  %v1364_v19 = vshll.u32 %v1363_v29, 23  ;;  %v4831_v36 = vadd.s32 %v1178_v10, %v1174_v59  ;;  %v293_v30 = vadd.f32 0.041655596, %v292_v4  ;;  %v840_v6 = vshll.u32 %v4794_v54, 16 }
 0x1d6   :  { %v1051_v62 = vor.u32 %v1050_v33, %v1049_v28  ;;  %v1132_v11 = vsel %vm1126_vm14, %v1129_v49, %v1131_v56  ;;  %v1185_v1 = vadd.s32 %v1184_v40, %v1175_v57  ;;  %v1342_v60 = vadd.s32 %v4680_v25, %v4670_v45  ;;  %v2804_v45 = vpop.permute.xlu0 %2803  ;;  %v5702_v40 = vld [vmem:[#allocation15_spill] sm:$0xff] }
 0x1d7   :  { %vm1188_vm11 = vc.u32 %v4824_v16, %v4831_v36  ;;  %v294_v61 = vmul.f32 %v293_v30, %v4151_v32  ;;  %v307_v51 = vadd.s32 3, %v290_v24  ;;  %v611_v10 = vmul.f32 %v610_v38, %v4774_v23 }
 0x1d8   :  { %v5699_v59 = vand.u32 65535, %v4677_v3  ;;  %v1056_v28 = vand.u32 2147483647, %v1055_v15  ;;  %v1189_v0 = vadd.s32 1, %v1185_v1  ;;  %v1360_v33 = vshrl.u32 %v1342_v60, %v1358_v7 }
 0x1d9   :  { %v1365_v63 = vor.u32 4788187, %v1364_v19  ;;  %v1186_v31 = vmul.u32 %v4748_v53, %v1132_v11  ;;  %v295_v25 = vadd.f32 -0.4999988, %v294_v61  ;;  %v1058_v12 = vcvt.s32.f32 %v1051_v62 }
 0x1da   :  { %v4845_v47 = vmul.u32 %v5699_v59, %v4395_v41  ;;  %v1190_v39 = vsel %vm1188_vm11, %v1189_v0, %v1185_v1  ;;  %vm306_vm6 = vweird.f32 %v3903_v42  ;;  %v1547_v29 = vand.u32 3, %v290_v24 }
 0x1db   :  { %v447_v38 = vmul.f32 -0.001358992, %v4236_v37  ;;  %vm4853_vm12 = vc.u32 %v4789_v27, %v840_v6  ;;  %v1359_v15 = vshll.u32 %v4776_v35, %v4803_v20  ;;  %v1191_v53 = vadd.s32 %v1190_v39, %v1186_v31 }
 0x1dc   :  { %v296_v18 = vmul.f32 %v295_v25, %v4151_v32  ;;  %v308_v9 = vand.u32 3, %v307_v51  ;;  %v612_v22 = vadd.f32 -0.16666654, %v611_v10  ;;  %v1059_v46 = vmul.f32 %v1058_v12, %v1056_v28  ;;  %v5703_v32 = vld [vmem:[#allocation10_spill] sm:$0xff] }
 0x1dd   :  { %vm2822_vm13 = vcmp.eq.s32.totalorder %v4273_v17, %v2804_v45  ;;  %3705 = vmatmul.msk.f32.gmra.mxu1 %vm2700_vm0, %v4309_v55  ;;  %v448_v49 = vadd.f32 0.041655596, %v447_v38  ;;  %v1361_v56 = vor.u32 %v1360_v33, %v1359_v15  ;;  %v1366_v50 = vand.u32 2147483647, %v1365_v63 }
 0x1de   :  { %v1192_v4 = vadd.s32 536870912, %v1191_v53  ;;  %v297_v57 = vadd.f32 1.0, %v296_v18  ;;  %v311_v24 = vxor.u32 2147483648, %v5702_v40  ;;  %vm1548_vm14 = vcmp.lt.s32.totalorder %v1547_v29, 2 }
 0x1df   :  { %vm1549_vm3 = vcmp.eq.s32.totalorder %v1547_v29, 0  ;;  %v449_v35 = vmul.f32 %v448_v49, %v4236_v37  ;;  %vm940_vm15 = vcmp.lt.s32.totalorder %v5703_v32, 0  ;;  %vm310_vm4 = vcmp.eq.s32.totalorder %v308_v9, 0 }
 0x1e0   :  { %v4866_v20 = vshrl.u32 %v1192_v4, 30  ;;  %v314_v7 = vxor.u32 2147483648, %v297_v57  ;;  %vm1552_vm9 = vcmp.eq.s32.totalorder %v1547_v29, 2  ;;  %vm309_vm2 = vcmp.lt.s32.totalorder %v308_v9, 2  ;;  %v5712_v4 = vld [vmem:[#allocation16_spill] sm:$0xff] }
 0x1e1   :  { %v312_v55 = vsel %vm310_vm4, %v297_v57, %v311_v24  ;;  %vm313_vm7 = vcmp.eq.s32.totalorder %v308_v9, 2  ;;  %v1551_v19 = vsel %vm1549_vm3, %v297_v57, %v311_v24  ;;  %v450_v1 = vadd.f32 -0.4999988, %v449_v35  ;;  %v5710_v9 = vld [vmem:[#allocation19_spill] sm:$0xff] }
 0x1e2   :  { %v1194_v30 = vshll.u32 %v4866_v20, 30  ;;  %v315_v62 = vsel %vm313_vm7, %v314_v7, %v5702_v40  ;;  %v1554_v11 = vsel %vm1552_vm9, %v314_v7, %v5702_v40  ;;  %v613_v60 = vmul.f32 %v612_v22, %v4774_v23 }
 0x1e3   :  { %v5704_v61 = vand.u32 2147483647, %v5703_v32  ;;  %v1368_v10 = vcvt.s32.f32 %v1361_v56  ;;  %v316_v59 = vsel %vm309_vm2, %v312_v55, %v315_v62  ;;  %v1555_v28 = vsel %vm1548_vm14, %v1551_v19, %v1554_v11 }
 0x1e4   :  { %v4879_v0 = vsub.s32 %v1191_v53, %v1194_v30  ;;  %v3698_v33 = vsel %vm2822_vm13, 1.0, %v5698_v2  ;;  %v4886_v63 = vsel %vm306_vm6, nan, %v316_v59  ;;  %v1556_v31 = vsel %vm306_vm6, nan, %v1555_v28  ;;  %v2807_v53 = vpop.permute.xlu1 %2806  ;;  %v5718_v59 = vld [vmem:[#allocation17_spill] sm:$0xff] }
 0x1e5   :  { %vm4874_vm5 = vcmp.le.f32.partialorder %v5704_v61, 0.7853982  ;;  %v5707_v25 = vshrl.u32 %v4677_v3, 16  ;;  %v5708_v39 = vand.u32 65535, %v4663_v8  ;;  %v1060_v38 = vxor.u32 2147483648, %v1059_v46  ;;  %3706 = vmatmul.msk.f32.gmra.mxu1 %vm2700_vm0, %v3698_v33  ;;  %2643 = vrot.lane.b32.xlu0 %v1556_v31, %s3808_s5  ;;  %v5717_v61 = vld [vmem:[#allocation6_spill] sm:$0xff] }
 0x1e6   :  { %v1369_v15 = vmul.f32 %v1368_v10, %v1366_v50  ;;  %v5709_v42 = vshrl.u32 %v4663_v8, 16  ;;  %vm1196_vm11 = vcmp.lt.s32.totalorder %v4879_v0, 0  ;;  %v1197_v3 = vsub.s32 0, %v4879_v0  ;;  %v5711_v50 = vld [vmem:[#allocation21_spill] sm:$0xff] }
 0x1e7   :  { %v839_v12 = vmul.u32 %v5707_v25, %v4395_v41  ;;  %v4896_v29 = vmul.u32 %v5708_v39, %v4395_v41  ;;  %v451_v18 = vmul.f32 %v450_v1, %v4236_v37  ;;  %v4910_v22 = vmul.f32 %v4762_v26, %v5710_v9 }
 0x1e8   :  { %v4903_v45 = vmul.u32 %v5709_v42, %v4395_v41  ;;  %v614_v49 = vadd.f32 1.0, %v613_v60  ;;  %v842_v56 = vshll.u32 %v4845_v47, 16  ;;  %v845_v8 = vsel %vm4853_vm12, 1, %v5686_v48 }
 0x1e9   :  { %v4919_v41 = vadd.s32 %v840_v6, %v4789_v27  ;;  %vm1250_vm6 = vcmp.lt.s32.totalorder %v5711_v50, 0  ;;  %v1198_v37 = vsel %vm1196_vm11, %v1197_v3, %v4879_v0  ;;  %v445_v26 = vsel %vm4190_vm8, 0, %v5712_v4 }
 0x1ea   :  { %v1061_v40 = vsel %vm940_vm15, %v1060_v38, %v1059_v46  ;;  %v1370_v24 = vxor.u32 2147483648, %v1369_v15  ;;  %v1199_v35 = vclz %v1198_v37  ;;  %vm2823_vm12 = vcmp.eq.s32.totalorder %v4273_v17, %v2807_v53 }
 0x1eb   :  { %v4929_v5 = vadd.s32 %v845_v8, %v839_v12  ;;  %v5714_v27 = vand.u32 2147483647, %v5711_v50  ;;  %v452_v7 = vadd.f32 1.0, %v451_v18  ;;  %v862_v55 = vshll.u32 %v4767_v43, 16 }
 0x1ec   :  { %v4939_v19 = vmul.f32 %v614_v49, %v4742_v13  ;;  %v3658_v30 = vadd.s32 4294967294, %v1199_v35  ;;  %v462_v46 = vadd.s32 3, %v445_v26  ;;  %v1701_v62 = vand.u32 3, %v445_v26 }
 0x1ed   :  { %vm4933_vm13 = vcmp.le.f32.partialorder %v5714_v27, 0.7853982  ;;  %v4944_v11 = vsel %vm4874_vm5, %v5703_v32, %v1061_v40  ;;  %v1187_v1 = vadd.s32 %v4831_v36, %v4824_v16  ;;  %v3699_v60 = vsel %vm2823_vm12, 1.0, %v5698_v2  ;;  %v5721_v40 = vld [vmem:[#allocation11_spill] sm:$0xff] }
 0x1ee   :  { %vm461_vm8 = vweird.f32 %v5717_v61  ;;  %v1371_v10 = vsel %vm1250_vm6, %v1370_v24, %v1369_v15  ;;  %vm3659_vm14 = vcmp.lt.s32.totalorder %v3658_v30, 0  ;;  %3707 = vmatmul.msk.f32.gmra.mxu1 %vm2700_vm0, %v3699_v60  ;;  %v463_v13 = vand.u32 3, %v462_v46  ;;  %v5722_v46 = vld [vmem:[#allocation18_spill] sm:$0xff] }
 0x1ef   :  { %v466_v28 = vxor.u32 2147483648, %v5718_v59  ;;  %v1202_v33 = vsel %vm3659_vm14, 0, %v3658_v30  ;;  %v469_v31 = vxor.u32 2147483648, %v452_v7  ;;  %vm1702_vm3 = vcmp.lt.s32.totalorder %v1701_v62, 2 }
 0x1f0   :  { %vm4955_vm4 = vc.u32 %v4753_v21, %v862_v55  ;;  %v1203_v16 = vsub.s32 32, %v1202_v33  ;;  %v1207_v36 = vsub.s32 4294967266, %v1202_v33  ;;  %vm464_vm9 = vcmp.lt.s32.totalorder %v463_v13, 2 }
 0x1f1   :  { %vm1703_vm2 = vcmp.eq.s32.totalorder %v1701_v62, 0  ;;  %vm465_vm7 = vcmp.eq.s32.totalorder %v463_v13, 0  ;;  %vm468_vm11 = vcmp.eq.s32.totalorder %v463_v13, 2  ;;  %vm1706_vm12 = vcmp.eq.s32.totalorder %v1701_v62, 2 }
 0x1f2   :  { %v1705_v12 = vsel %vm1703_vm2, %v452_v7, %v466_v28  ;;  %v1205_v39 = vshrl.u32 %v1187_v1, %v1203_v16  ;;  %v1208_v38 = vadd.s32 127, %v1207_v36  ;;  %v467_v15 = vsel %vm465_vm7, %v452_v7, %v466_v28 }
 0x1f3   :  { %v470_v42 = vsel %vm468_vm11, %v469_v31, %v5718_v59  ;;  %v1708_v53 = vsel %vm1706_vm12, %v469_v31, %v5718_v59  ;;  %v600_v18 = vsel %vm4687_vm10, 0, %v4656_v14  ;;  %v602_v9 = vmul.f32 -0.001358992, %v4774_v23 }
 0x1f4   :  { %v471_v3 = vsel %vm464_vm9, %v467_v15, %v470_v42  ;;  %v4968_v49 = vsel %vm4933_vm13, %v5711_v50, %v1371_v10  ;;  %v1209_v8 = vshll.u32 %v1208_v38, 23  ;;  %v1709_v4 = vsel %vm1702_vm3, %v1705_v12, %v1708_v53  ;;  %v5724_v12 = vld [vmem:[#allocation12_spill] sm:$0xff]  ;;  %v5725_v53 = vld [vmem:[#allocation7_spill] sm:$0xff] }
 0x1f5   :  { %v4972_v37 = vsel %vm461_vm8, nan, %v471_v3  ;;  %v1204_v57 = vshll.u32 %v4879_v0, %v1202_v33  ;;  %v1710_v52 = vsel %vm461_vm8, nan, %v1709_v4  ;;  %v603_v14 = vadd.f32 0.041655596, %v602_v9 }
 0x1f6   :  { %v841_v26 = vshrl.u32 %v4794_v54, 16  ;;  %3708 = vmatmul.msk.f32.gmra.mxu1 %vm2700_vm0, %v5721_v40  ;;  %2645 = vrot.lane.b32.xlu0 %v1710_v52, %s3808_s5  ;;  %v617_v24 = vadd.s32 3, %v600_v18  ;;  %v757_v35 = vmul.f32 -0.001358992, %v4375_v34  ;;  %v867_v27 = vsel %vm4955_vm4, 1, %v5686_v48 }
 0x1f7   :  { %v868_v0 = vadd.s32 %v862_v55, %v4753_v21  ;;  %v1206_v7 = vor.u32 %v1205_v39, %v1204_v57  ;;  %v604_v30 = vmul.f32 %v603_v14, %v4774_v23  ;;  %v755_v54 = vsel %vm4338_vm1, 0, %v5722_v46 }
 0x1f8   :  { %v843_v1 = vshrl.u32 %v4845_v47, 16  ;;  %v1210_v60 = vor.u32 4788187, %v1209_v8  ;;  %v1855_v61 = vand.u32 3, %v600_v18  ;;  %vm848_vm10 = vc.u32 %v4919_v41, %v842_v56 }
 0x1f9   :  { %v864_v10 = vshll.u32 %v4896_v29, 16  ;;  %v605_v13 = vadd.f32 -0.4999988, %v604_v30  ;;  %v863_v21 = vshrl.u32 %v4767_v43, 16  ;;  %v865_v55 = vshrl.u32 %v4896_v29, 16 }
 0x1fa   :  { %v869_v59 = vadd.s32 %v867_v27, %v4903_v45  ;;  %vm616_vm8 = vweird.f32 %v4097_v58  ;;  %v618_v28 = vand.u32 3, %v617_v24  ;;  %v758_v33 = vadd.f32 0.041655596, %v757_v35 }
 0x1fb   :  { %v772_v31 = vadd.s32 3, %v755_v54  ;;  %vm870_vm1 = vc.u32 %v868_v0, %v864_v10  ;;  %v1213_v25 = vcvt.s32.f32 %v1206_v7  ;;  %v606_v47 = vmul.f32 %v605_v13, %v4774_v23 }
 0x1fc   :  { %v621_v56 = vxor.u32 2147483648, %v4939_v19  ;;  %v849_v41 = vsel %vm848_vm10, 1, %v5686_v48  ;;  %v1211_v16 = vand.u32 2147483647, %v1210_v60  ;;  %vm1856_vm14 = vcmp.lt.s32.totalorder %v1855_v61, 2 }
 0x1fd   :  { %v759_v43 = vmul.f32 %v758_v33, %v4375_v34  ;;  %v776_v29 = vxor.u32 2147483648, %v4910_v22  ;;  %v607_v45 = vadd.f32 1.0, %v606_v47  ;;  %vm1857_vm3 = vcmp.eq.s32.totalorder %v1855_v61, 0  ;;  %v5728_v33 = vld [vmem:[#allocation22_spill] sm:$0xff] }
 0x1fe   :  { %vm1860_vm4 = vcmp.eq.s32.totalorder %v1855_v61, 2  ;;  %v871_v36 = vsel %vm870_vm1, 1, %v5686_v48  ;;  %3709 = vmatmul.msk.f32.gmra.mxu1 %vm2700_vm0, %v5724_v12  ;;  %vm620_vm9 = vcmp.eq.s32.totalorder %v618_v28, 0  ;;  %v773_v39 = vand.u32 3, %v772_v31 }
 0x1ff   :  { %v760_v23 = vadd.f32 -0.4999988, %v759_v43  ;;  %v851_v38 = vadd.s32 %v849_v41, %v4929_v5  ;;  %v622_v15 = vsel %vm620_vm9, %v607_v45, %v621_v56  ;;  %vm623_vm2 = vcmp.eq.s32.totalorder %v618_v28, 2 }
 0x200   :  { %v624_v42 = vxor.u32 2147483648, %v607_v45  ;;  %v1859_v3 = vsel %vm1857_vm3, %v607_v45, %v621_v56  ;;  %vm771_vm7 = vweird.f32 %v5725_v53  ;;  %v2009_v9 = vand.u32 3, %v755_v54  ;;  %v5726_v54 = vld [vmem:[#allocation13_spill] sm:$0xff] }
 0x201   :  { %v761_v18 = vmul.f32 %v760_v23, %v4375_v34  ;;  %v852_v8 = vadd.s32 %v851_v38, %v841_v26  ;;  %v873_v4 = vadd.s32 %v871_v36, %v869_v59  ;;  %v1214_v48 = vmul.f32 %v1213_v25, %v1211_v16  ;;  %v3767_v53 = vld [vmem:[%s5611_s0 + $0x20] sm:$0xff] }
 0x202   :  { %vm619_vm11 = vcmp.lt.s32.totalorder %v618_v28, 2  ;;  %v625_v57 = vsel %vm623_vm2, %v624_v42, %v4939_v19  ;;  %v1862_v52 = vsel %vm1860_vm4, %v624_v42, %v4939_v19  ;;  %vm775_vm12 = vcmp.eq.s32.totalorder %v773_v39, 0  ;;  %v5727_v28 = vld [vmem:[#allocation20_spill] sm:$0xff] }
 0x203   :  { %v626_v14 = vsel %vm619_vm11, %v622_v15, %v625_v57  ;;  %v1863_v5 = vsel %vm1856_vm14, %v1859_v3, %v1862_v52  ;;  %v762_v40 = vadd.f32 1.0, %v761_v18  ;;  %v5021_v26 = vadd.s32 %v852_v8, %v843_v1  ;;  %v2819_v1 = vpop.permute.xlu2 %2818  ;;  %v5733_v18 = vld [vmem:[#allocation23_spill] sm:$0xff] }
 0x204   :  { %v5017_v24 = vsel %vm616_vm8, nan, %v626_v14  ;;  %v1864_v34 = vsel %vm616_vm8, nan, %v1863_v5  ;;  %v874_v35 = vadd.s32 %v873_v4, %v863_v21  ;;  %vm2011_vm10 = vcmp.eq.s32.totalorder %v2009_v9, 0 }
 0x205   :  { %2647 = vrot.lane.b32.xlu0 %v1864_v34, %s3808_s5  ;;  %v779_v27 = vxor.u32 2147483648, %v762_v40  ;;  %v777_v19 = vsel %vm775_vm12, %v762_v40, %v776_v29  ;;  %v872_v7 = vadd.s32 %v868_v0, %v864_v10  ;;  %v1215_v30 = vxor.u32 2147483648, %v1214_v48 }
 0x206   :  { %vm778_vm1 = vcmp.eq.s32.totalorder %v773_v39, 2  ;;  %v2013_v46 = vsel %vm2011_vm10, %v762_v40, %v776_v29  ;;  %v875_v62 = vadd.s32 %v874_v35, %v865_v55  ;;  %3710 = vmatmul.msk.f32.gmra.mxu1 %vm2700_vm0, %v5726_v54  ;;  %vm774_vm14 = vcmp.lt.s32.totalorder %v773_v39, 2  ;;  %v5734_v40 = vld [vmem:[#allocation24_spill] sm:$0xff] }
 0x207   :  { %vm2014_vm3 = vcmp.eq.s32.totalorder %v2009_v9, 2  ;;  %v780_v58 = vsel %vm778_vm1, %v779_v27, %v4910_v22  ;;  %vm878_vm8 = vc.u32 %v5021_v26, %v872_v7  ;;  %vm2010_vm4 = vcmp.lt.s32.totalorder %v2009_v9, 2 }
 0x208   :  { %v2016_v60 = vsel %vm2014_vm3, %v779_v27, %v4910_v22  ;;  %v781_v61 = vsel %vm774_vm14, %v777_v19, %v780_v58  ;;  %v879_v13 = vadd.s32 1, %v875_v62  ;;  %v5031_v0 = vmul.f32 %v4944_v11, %v4944_v11 }
 0x209   :  { %vm1095_vm9 = vcmp.lt.s32.totalorder %v4555_v44, 0  ;;  %v2017_v10 = vsel %vm2010_vm4, %v2013_v46, %v2016_v60  ;;  %v5036_v21 = vsel %vm771_vm7, nan, %v781_v61  ;;  %vm2827_vm2 = vcmp.eq.s32.totalorder %v4273_v17, %v2819_v1 }
 0x20a   :  { %v1216_v55 = vsel %vm1095_vm9, %v1215_v30, %v1214_v48  ;;  %v880_v59 = vsel %vm878_vm8, %v879_v13, %v875_v62  ;;  %v5043_v22 = vmul.f32 %v4968_v49, %v4968_v49  ;;  %v5729_v31 = vmul.u32 %v5727_v28, %v5728_v33 }
 0x20b   :  { %v5730_v47 = vand.u32 2147483647, %v4555_v44  ;;  %v2018_v41 = vsel %vm771_vm7, nan, %v2017_v10  ;;  %v1074_v16 = vmul.f32 -0.00019511016, %v5031_v0  ;;  %v3703_v29 = vsel %vm2827_vm2, 1.0, %v5698_v2 }
 0x20c   :  { %v881_v25 = vadd.s32 %v880_v59, %v5729_v31  ;;  %v1384_v45 = vmul.f32 -0.00019511016, %v5043_v22  ;;  %v1062_v9 = vsub.s32 4, %v5733_v18  ;;  %v1372_v34 = vsub.s32 4, %v5734_v40  ;;  %v5735_v31 = vld [vmem:[#allocation8_spill] sm:$0xff] }
 0x20d   :  { %vm5050_vm11 = vcmp.le.f32.partialorder %v5730_v47, 0.7853982  ;;  %2649 = vrot.lane.b32.xlu0 %v2018_v41, %s3808_s5  ;;  %v1075_v23 = vadd.f32 0.008332121, %v1074_v16  ;;  %v877_v46 = vadd.s32 %v872_v7, %v5021_v26  ;;  %v1217_v61 = vsub.s32 4, %v4866_v20 }
 0x20e   :  { %v5060_v17 = vsel %vm5050_vm11, %v4555_v44, %v1216_v55  ;;  %v882_v43 = vadd.s32 536870912, %v881_v25  ;;  %3711 = vmatmul.msk.f32.gmra.mxu1 %vm2700_vm0, %v3703_v29  ;;  %v1385_v38 = vadd.f32 0.008332121, %v1384_v45  ;;  %v1063_v5 = vsel %vm940_vm15, %v1062_v9, %v5733_v18 }
 0x20f   :  { %v5070_v12 = vmul.f32 %v5060_v17, %v5060_v17  ;;  %v1076_v3 = vmul.f32 %v1075_v23, %v5031_v0  ;;  %v1065_v58 = vsel %vm4874_vm5, 0, %v1063_v5  ;;  %v1373_v1 = vsel %vm1250_vm6, %v1372_v34, %v5734_v40 }
 0x210   :  { %v5066_v36 = vshrl.u32 %v882_v43, 30  ;;  %v1386_v8 = vmul.f32 %v1385_v38, %v5043_v22  ;;  %v1082_v33 = vadd.s32 3, %v1065_v58  ;;  %vm785_vm15 = vcmp.lt.s32.totalorder %v5735_v31, 0 }
 0x211   :  { %v1229_v42 = vmul.f32 -0.00019511016, %v5070_v12  ;;  %v1077_v52 = vadd.f32 -0.16666654, %v1076_v3  ;;  %v5099_v47 = vsel %vm4933_vm13, 0, %v1373_v1  ;;  %v1218_v16 = vsel %vm1095_vm9, %v1217_v61, %v4866_v20 }
 0x212   :  { %v884_v39 = vshll.u32 %v5066_v36, 30  ;;  %v1387_v35 = vadd.f32 -0.16666654, %v1386_v8  ;;  %v1377_v41 = vmul.f32 -0.001358992, %v5043_v22  ;;  %v2317_v45 = vand.u32 3, %v1065_v58 }
 0x213   :  { %v1230_v48 = vadd.f32 0.008332121, %v1229_v42  ;;  %v1078_v19 = vmul.f32 %v1077_v52, %v5031_v0  ;;  %v1083_v38 = vand.u32 3, %v1082_v33  ;;  %v5736_v42 = vand.u32 2147483647, %v5735_v31 }
 0x214   :  { %v885_v15 = vsub.s32 %v881_v25, %v884_v39  ;;  %v1388_v60 = vmul.f32 %v1387_v35, %v5043_v22  ;;  %v1067_v25 = vmul.f32 -0.001358992, %v5031_v0  ;;  %vm2319_vm6 = vcmp.eq.s32.totalorder %v2317_v45, 0 }
 0x215   :  { %2675 = vrot.lane.b32.xlu0 %v3767_v53, %s3807_s21  ;;  %v1231_v27 = vmul.f32 %v1230_v48, %v5070_v12  ;;  %v1079_v28 = vadd.f32 1.0, %v1078_v19  ;;  %vm5109_vm5 = vcmp.le.f32.partialorder %v5736_v42, 0.7853982  ;;  %v1392_v53 = vadd.s32 3, %v5099_v47 }
 0x216   :  { %vm886_vm7 = vcmp.lt.s32.totalorder %v885_v15, 0  ;;  %v887_v2 = vsub.s32 0, %v885_v15  ;;  %v1389_v51 = vadd.f32 1.0, %v1388_v60  ;;  %v1068_v39 = vadd.f32 0.041655596, %v1067_v25 }
 0x217   :  { %v1232_v13 = vadd.f32 -0.16666654, %v1231_v27  ;;  %v1080_v23 = vmul.f32 %v1079_v28, %v4944_v11  ;;  %v1220_v11 = vsel %vm5050_vm11, 0, %v1218_v16  ;;  %v907_v48 = vsub.s32 4, %v5066_v36 }
 0x218   :  { %v888_v4 = vsel %vm886_vm7, %v887_v2, %v885_v15  ;;  %v5115_v20 = vmul.f32 %v1389_v51, %v4968_v49  ;;  %v1069_v18 = vmul.f32 %v1068_v39, %v5031_v0  ;;  %vm1084_vm13 = vcmp.lt.s32.totalorder %v1083_v38, 2 }
 0x219   :  { %v889_v57 = vclz %v888_v4  ;;  %v1233_v43 = vmul.f32 %v1232_v13, %v5070_v12  ;;  %vm1085_vm10 = vcmp.eq.s32.totalorder %v1083_v38, 0  ;;  %vm1088_vm1 = vcmp.eq.s32.totalorder %v1083_v38, 2 }
 0x21a   :  { %vm2318_vm14 = vcmp.lt.s32.totalorder %v2317_v45, 2  ;;  %vm1081_vm3 = vweird.f32 %v5703_v32  ;;  %vm2322_vm8 = vcmp.eq.s32.totalorder %v2317_v45, 2  ;;  %v1393_v56 = vand.u32 3, %v1392_v53 }
 0x21b   :  { %v3652_v14 = vadd.s32 4294967294, %v889_v57  ;;  %v1234_v8 = vadd.f32 1.0, %v1233_v43  ;;  %v1070_v57 = vadd.f32 -0.4999988, %v1069_v18  ;;  %v1086_v40 = vxor.u32 2147483648, %v1080_v23 }
 0x21c   :  { %v1222_v34 = vmul.f32 -0.001358992, %v5070_v12  ;;  %vm1391_vm4 = vweird.f32 %v5711_v50  ;;  %vm1394_vm9 = vcmp.lt.s32.totalorder %v1393_v56, 2  ;;  %vm1395_vm2 = vcmp.eq.s32.totalorder %v1393_v56, 0 }
 0x21d   :  { %vm3653_vm12 = vcmp.lt.s32.totalorder %v3652_v14, 0  ;;  %v1071_v5 = vmul.f32 %v1070_v57, %v5031_v0  ;;  %v1235_v27 = vmul.f32 %v1234_v8, %v5060_v17  ;;  %vm1236_vm7 = vweird.f32 %v4555_v44 }
 0x21e   :  { %v892_v30 = vsel %vm3653_vm12, 0, %v3652_v14  ;;  %v1237_v14 = vadd.s32 3, %v1220_v11  ;;  %vm1398_vm12 = vcmp.eq.s32.totalorder %v1393_v56, 2 }
 0x21f   :  { %v893_v62 = vsub.s32 32, %v892_v30  ;;  %v897_v54 = vsub.s32 4294967266, %v892_v30  ;;  %v894_v10 = vshll.u32 %v885_v15, %v892_v30  ;;  %v1378_v15 = vadd.f32 0.041655596, %v1377_v41 }
 0x220   :  { %v908_v30 = vsel %vm785_vm15, %v907_v48, %v5066_v36  ;;  %v1072_v0 = vadd.f32 1.0, %v1071_v5  ;;  %v1238_v17 = vand.u32 3, %v1237_v14  ;;  %v1241_v39 = vxor.u32 2147483648, %v1235_v27 }
 0x221   :  { %v895_v55 = vshrl.u32 %v877_v46, %v893_v62  ;;  %v898_v59 = vadd.s32 127, %v897_v54  ;;  %v1379_v9 = vmul.f32 %v1378_v15, %v5043_v22  ;;  %v2471_v46 = vand.u32 3, %v1220_v11 }
 0x222   :  { %v1223_v54 = vadd.f32 0.041655596, %v1222_v34  ;;  %v1089_v1 = vxor.u32 2147483648, %v1072_v0  ;;  %v2321_v36 = vsel %vm2319_vm6, %v1072_v0, %v1086_v40  ;;  %v1087_v60 = vsel %vm1085_vm10, %v1072_v0, %v1086_v40 }
 0x223   :  { %v896_v26 = vor.u32 %v895_v55, %v894_v10  ;;  %v899_v7 = vshll.u32 %v898_v59, 23  ;;  %v1380_v52 = vadd.f32 -0.4999988, %v1379_v9  ;;  %v910_v13 = vsel %vm5109_vm5, 0, %v908_v30 }
 0x224   :  { %v1224_v61 = vmul.f32 %v1223_v54, %v5070_v12  ;;  %v1396_v59 = vxor.u32 2147483648, %v5115_v20  ;;  %v2324_v28 = vsel %vm2322_vm8, %v1089_v1, %v1080_v23  ;;  %v1090_v33 = vsel %vm1088_vm1, %v1089_v1, %v1080_v23 }
 0x225   :  { %v900_v29 = vor.u32 4788187, %v899_v7  ;;  %v903_v2 = vcvt.s32.f32 %v896_v26  ;;  %v1381_v35 = vmul.f32 %v1380_v52, %v5043_v22  ;;  %vm2472_vm11 = vcmp.lt.s32.totalorder %v2471_v46, 2 }
 0x226   :  { %v1225_v26 = vadd.f32 -0.4999988, %v1224_v61  ;;  %v2325_v41 = vsel %vm2318_vm14, %v2321_v36, %v2324_v28  ;;  %v1091_v16 = vsel %vm1084_vm13, %v1087_v60, %v1090_v33  ;;  %v927_v38 = vadd.s32 3, %v910_v13  ;;  %v3769_v60 = vld [vmem:[%s5611_s0 + $0x38] sm:$0xff]  ;;  %v2711_v33 = vld [vmem:[%s5613_s2 + $0x28] sm:$0x3] }
 0x227   :  { %v901_v3 = vand.u32 2147483647, %v900_v29  ;;  %v5137_v58 = vadd.f32 1.0, %v1381_v35  ;;  %v2326_v43 = vsel %vm1081_vm3, nan, %v2325_v41  ;;  %v5158_v29 = vsel %vm1081_vm3, nan, %v1091_v16 }
 0x228   :  { %v1226_v23 = vmul.f32 %v1225_v26, %v5070_v12  ;;  %2653 = vrot.lane.b32.xlu1 %v2326_v43, %s3808_s5  ;;  %vm1243_vm6 = vcmp.eq.s32.totalorder %v1238_v17, 2  ;;  %vm2476_vm13 = vcmp.eq.s32.totalorder %v2471_v46, 2  ;;  %v928_v48 = vand.u32 3, %v927_v38 }
 0x229   :  { %v904_v4 = vmul.f32 %v903_v2, %v901_v3  ;;  %v1399_v7 = vxor.u32 2147483648, %v5137_v58  ;;  %v1397_v45 = vsel %vm1395_vm2, %v5137_v58, %v1396_v59  ;;  %vm1239_vm10 = vcmp.lt.s32.totalorder %v1238_v17, 2 }
 0x22a   :  { %v1227_v6 = vadd.f32 1.0, %v1226_v23  ;;  %v2163_v40 = vand.u32 3, %v910_v13  ;;  %vm933_vm1 = vcmp.eq.s32.totalorder %v928_v48, 2  ;;  %vm930_vm14 = vcmp.eq.s32.totalorder %v928_v48, 0  ;;  %v3770_v13 = vld [vmem:[%s5611_s0 + $0x28] sm:$0xff] }
 0x22b   :  { %v905_v49 = vxor.u32 2147483648, %v904_v4  ;;  %v1400_v32 = vsel %vm1398_vm12, %v1399_v7, %v5115_v20  ;;  %vm929_vm2 = vcmp.lt.s32.totalorder %v928_v48, 2  ;;  %v2625_v61 = vand.u32 3, %v5099_v47 }
 0x22c   :  { %v1401_v2 = vsel %vm1394_vm9, %v1397_v45, %v1400_v32  ;;  %v1244_v18 = vxor.u32 2147483648, %v1227_v6  ;;  %vm2164_vm3 = vcmp.lt.s32.totalorder %v2163_v40, 2  ;;  %vm2165_vm8 = vcmp.eq.s32.totalorder %v2163_v40, 0 }
 0x22d   :  { %v906_v19 = vsel %vm785_vm15, %v905_v49, %v904_v4  ;;  %vm2473_vm15 = vcmp.eq.s32.totalorder %v2471_v46, 0  ;;  %v5172_v9 = vsel %vm1391_vm4, nan, %v1401_v2  ;;  %vm2168_vm9 = vcmp.eq.s32.totalorder %v2163_v40, 2 }
 0x22e   :  { %v5135_v62 = vsel %vm5109_vm5, %v5735_v31, %v906_v19  ;;  %vm1240_vm5 = vcmp.eq.s32.totalorder %v1238_v17, 0  ;;  %v2475_v11 = vsel %vm2473_vm15, %v1227_v6, %v1241_v39  ;;  %v1245_v57 = vsel %vm1243_vm6, %v1244_v18, %v1235_v27 }
 0x22f   :  { %v911_v22 = vmul.f32 %v5135_v62, %v5135_v62  ;;  %v1242_v53 = vsel %vm1240_vm5, %v1227_v6, %v1241_v39  ;;  %v2478_v52 = vsel %vm2476_vm13, %v1244_v18, %v1235_v27  ;;  %v3768_v27 = vld [vmem:[%s5611_s0 + $0x30] sm:$0xff]  ;;  %vm2630_vm12 = vcmp.eq.s32.totalorder %v2625_v61, 2 }
 0x230   :  { %v1246_v5 = vsel %vm1239_vm10, %v1242_v53, %v1245_v57  ;;  %v2479_v56 = vsel %vm2472_vm11, %v2475_v11, %v2478_v52  ;;  %2679 = vrot.lane.b32.xlu1 %v3768_v27, %s3807_s21  ;;  %vm926_vm11 = vweird.f32 %v5735_v31  ;;  %vm2626_vm15 = vcmp.lt.s32.totalorder %v2625_v61, 2  ;;  %v5261_v27 = vld [vmem:[%s5613_s2 + $0x30] ss:$0 sm:$0xff] }
 0x231   :  { %v912_v10 = vmul.f32 -0.001358992, %v911_v22  ;;  %v919_v55 = vmul.f32 -0.00019511016, %v911_v22  ;;  %v5177_v34 = vsel %vm1236_vm7, nan, %v1246_v5  ;;  %v2480_v35 = vsel %vm1236_vm7, nan, %v2479_v56 }
 0x232   :  { %2655 = vrot.lane.b32.xlu0 %v2480_v35, %s3808_s5  ;;  %vm2627_vm7 = vcmp.eq.s32.totalorder %v2625_v61, 0  ;;  %vm2739_vm5 = vcmask 1041408   ;;  %vm2714_vm6 = vcmask 146432   ;;  %vm2982_vm10 = vcmask 1046528  }
 0x233   :  { %v913_v51 = vadd.f32 0.041655596, %v912_v10  ;;  %v920_v25 = vadd.f32 0.008332121, %v919_v55  ;;  %v2629_v31 = vsel %vm2627_vm7, %v5137_v58, %v1396_v59  ;;  %v2632_v10 = vsel %vm2630_vm12, %v1399_v7, %v5115_v20  ;;  %v2710_v59 = vld [vmem:[%s5613_s2 + $0x20] sm:$0xff]  ;;  %3687 = vmatpush.msk.msra.mxu0 %vm2739_vm5, %v2711_v33  ;;  %v2709_v20 = vld [vmem:[%s5613_s2 + $0x18] sm:$0xff] }
 0x234   :  { %v2633_v55 = vsel %vm2626_vm15, %v2629_v31, %v2632_v10  ;;  %vm3293_vm5 = vcmask 261120  }
 0x235   :  { %v914_v15 = vmul.f32 %v913_v51, %v911_v22  ;;  %v921_v42 = vmul.f32 %v920_v25, %v911_v22  ;;  %v2634_v47 = vsel %vm1391_vm4, nan, %v2633_v55  ;;  %2757 = vmatpush.msra.mxu0 %v2710_v59  ;;  %v2668_v51 = vpop.permute.xlu1 %2667  ;;  %vm2691_vm4 = vcmask 64512  }
 0x237   :  { %v915_v3 = vadd.f32 -0.4999988, %v914_v15  ;;  %v922_v12 = vadd.f32 -0.16666654, %v921_v42  ;;  %2758 = vmatpush.msra.mxu0 %v2709_v20 }
 0x239   :  { %v916_v8 = vmul.f32 %v915_v3, %v911_v22  ;;  %v923_v4 = vmul.f32 %v922_v12, %v911_v22 }
 0x23a   :  { %2681 = vrot.lane.b32.xlu0 %v3769_v60, %s3807_s21 }
 0x23b   :  { %v917_v49 = vadd.f32 1.0, %v916_v8  ;;  %v924_v14 = vadd.f32 1.0, %v923_v4 }
 0x23d   :  { %v925_v19 = vmul.f32 %v924_v14, %v5135_v62  ;;  %v934_v30 = vxor.u32 2147483648, %v917_v49  ;;  %v2670_v23 = vpop.permute.xlu1 %2669 }
 0x23f   :  { %v931_v46 = vxor.u32 2147483648, %v925_v19  ;;  %v935_v0 = vsel %vm933_vm1, %v934_v30, %v925_v19  ;;  %v2170_v54 = vsel %vm2168_vm9, %v934_v30, %v925_v19  ;;  %vm2957_vm1 = vcmask 1040384  }
 0x240   :  { %vm3200_vm9 = vcmask 195584  }
 0x241   :  { %v2167_v44 = vsel %vm2165_vm8, %v917_v49, %v931_v46  ;;  %v932_v62 = vsel %vm930_vm14, %v917_v49, %v931_v46  ;;  %vm3209_vm8 = vcmask 392192  }
 0x242   :  { %v2171_v22 = vsel %vm2164_vm3, %v2167_v44, %v2170_v54  ;;  %v936_v17 = vsel %vm929_vm2, %v932_v62, %v935_v0  ;;  %v5739_v44 = vlaneseq  ;;  %vm3227_vm2 = vcmask 588800  }
 0x243   :  { %v2172_v1 = vsel %vm926_vm11, nan, %v2171_v22  ;;  %v5188_v36 = vsel %vm926_vm11, nan, %v936_v17 }
 0x244   :  { %2651 = vrot.lane.b32.xlu2 %v2172_v1, %s3808_s5  ;;  %v5265_v54 = vshrl.u32 %v5739_v44, 7 }
 0x246   :  { %v5273_v22 = vadd.s32 8, %v5265_v54 }
 0x248   :  { %v3027_v60 = vand.u32 15, %v5273_v22 }
 0x24a   :  { %vm3129_vm13 = vcmp.ne.s32.totalorder %v3027_v60, 15 }
 0x24c   :  { %2677 = vrot.lane.b32.xlu2 %v3770_v13, %s3807_s21 }
 0x252   :  { %v2885_v28 = vpop.f32.mrf.mxu1 }
 0x254   :  { %2657 = vrot.lane.b32.xlu2 %v2634_v47, %s3808_s5  ;;  %s3630_s5 = sshll.u32 %s5614_s3, 4  ;;  %s3631_s5 = int_to_ptr.hbm [resolvable:$true] %s3630_s5 }
 0x257   :  { %v2644_v25 = vpop.permute.xlu0 %2643 }
 0x258   :  { %v2692_v41 = vsel %vm2691_vm4, %v4886_v63, %v2644_v25  ;;  %v2672_v63 = vpop.permute.xlu1 %2671 }
 0x259   :  { %v2701_v16 = vsel %vm2700_vm0, %v2692_v41, %v2668_v51 }
 0x25a   :  { %v2888_v50 = vpop.f32.mrf.mxu1  ;;  %3688 = vmatmul.msk.f32.vlgmr.msra.gmra.mxu0 %vm2714_vm6, %v2701_v16 }
 0x25b   :  { %2919 = vrot.lane.b32.xlu1 %v2888_v50, %s3807_s21 }
 0x260   :  { %v2674_v12 = vpop.permute.xlu1 %2673 }
 0x262   :  { %v2891_v58 = vpop.f32.mrf.mxu1 }
 0x263   :  { %2921 = vrot.lane.b32.xlu2 %v2891_v58, %s3807_s21 }
 0x268   :  { %v2646_v39 = vpop.permute.xlu0 %2645 }
 0x269   :  { %v2693_v15 = vsel %vm2691_vm4, %v4972_v37, %v2646_v39 }
 0x26a   :  { %v2702_v42 = vsel %vm2700_vm0, %v2693_v15, %v2670_v23  ;;  %v5298_v23 = vadd.s32 24, %v5265_v54 }
 0x26b   :  { %v2894_v26 = vpop.f32.mrf.mxu1  ;;  %3689 = vmatmul.msk.f32.gmra.mxu0 %vm2714_vm6, %v2702_v42 }
 0x26c   :  { %2923 = vrot.lane.b32.xlu0 %v2894_v26, %s3807_s21 }
 0x273   :  { %v2897_v7 = vpop.f32.mrf.mxu1 }
 0x274   :  { %2925 = vrot.lane.b32.xlu1 %v2897_v7, %s3807_s21 }
 0x277   :  { %v2648_v38 = vpop.permute.xlu0 %2647 }
 0x278   :  { %v2694_v6 = vsel %vm2691_vm4, %v5017_v24, %v2648_v38 }
 0x279   :  { %v2703_v32 = vsel %vm2700_vm0, %v2694_v6, %v2672_v63  ;;  %v3041_v63 = vand.u32 15, %v5298_v23 }
 0x27a   :  { %3690 = vmatmul.msk.f32.gmra.mxu0 %vm2714_vm6, %v2703_v32 }
 0x27b   :  { %v2900_v43 = vpop.f32.mrf.mxu1  ;;  %vm3131_vm14 = vcmp.ne.s32.totalorder %v3041_v63, 15 }
 0x27c   :  { %2917 = vrot.lane.b32.xlu1 %v2885_v28, %s3807_s21  ;;  %2927 = vrot.lane.b32.xlu2 %v2900_v43, %s3807_s21 }
 0x27f   :  { %v2650_v37 = vpop.permute.xlu0 %2649 }
 0x280   :  { %v2695_v2 = vsel %vm2691_vm4, %v5036_v21, %v2650_v37 }
 0x281   :  { %v2704_v53 = vsel %vm2700_vm0, %v2695_v2, %v2674_v12 }
 0x282   :  { %3691 = vmatmul.msk.f32.gmra.mxu0 %vm2714_vm6, %v2704_v53 }
 0x283   :  { %v2903_v45 = vpop.f32.mrf.mxu1 }
 0x284   :  { %2929 = vrot.lane.b32.xlu0 %v2903_v45, %s3807_s21 }
 0x287   :  { %v2676_v18 = vpop.permute.xlu0 %2675 }
 0x28b   :  { %v2906_v3 = vpop.f32.mrf.mxu1 }
 0x28c   :  { %2931 = vrot.lane.b32.xlu2 %v2906_v3, %s3807_s21  ;;  %s3810_s21 = smov 48  }
 0x29a   :  { %v2654_v4 = vpop.permute.xlu1 %2653 }
 0x29b   :  { %v2697_v57 = vsel %vm2691_vm4, %v5158_v29, %v2654_v4 }
 0x29e   :  { %v2652_v11 = vpop.permute.xlu2 %2651 }
 0x29f   :  { %v2696_v24 = vsel %vm2691_vm4, %v5188_v36, %v2652_v11 }
 0x2a0   :  { %v2705_v8 = vsel %vm2700_vm0, %v2696_v24, %v2676_v18 }
 0x2a1   :  { %3692 = vmatmul.msk.f32.gmra.mxu0 %vm2714_vm6, %v2705_v8 }
 0x2a2   :  { %v2680_v49 = vpop.permute.xlu1 %2679 }
 0x2a4   :  { %v2656_v52 = vpop.permute.xlu0 %2655 }
 0x2a5   :  { %v2698_v14 = vsel %vm2691_vm4, %v5177_v34, %v2656_v52 }
 0x2a6   :  { %v2678_v48 = vpop.permute.xlu2 %2677  ;;  %v2707_v5 = vsel %vm2700_vm0, %v2698_v14, %v2680_v49 }
 0x2a7   :  { %v2706_v21 = vsel %vm2700_vm0, %v2697_v57, %v2678_v48 }
 0x2a9   :  { %3693 = vmatmul.msk.f32.gmra.mxu0 %vm2714_vm6, %v2706_v21  ;;  %v3013_v21 = vadd.s32 40, %v5265_v54 }
 0x2ac   :  { %v2682_v40 = vpop.permute.xlu0 %2681 }
 0x2ae   :  { %v2658_v56 = vpop.permute.xlu2 %2657 }
 0x2af   :  { %v2699_v35 = vsel %vm2691_vm4, %v5172_v9, %v2658_v56 }
 0x2b0   :  { %v2708_v29 = vsel %vm2700_vm0, %v2699_v35, %v2682_v40 }
 0x2b1   :  { %3694 = vmatmul.msk.f32.gmra.mxu0 %vm2714_vm6, %v2707_v5  ;;  %v3055_v5 = vand.u32 15, %v3013_v21 }
 0x2b3   :  { %vm3133_vm3 = vcmp.ne.s32.totalorder %v3055_v5, 15 }
 0x2b9   :  { %3695 = vmatmul.msk.f32.gmra.mxu0 %vm2714_vm6, %v2708_v29 }
 0x2bd   :  { %v2922_v31 = vpop.permute.xlu2 %2921 }
 0x2cd   :  { %v2920_v30 = vpop.permute.xlu1 %2919 }
 0x2d6   :  { %v2928_v8 = vpop.permute.xlu2 %2927 }
 0x2d7   :  { %v2760_v19 = vpop.f32.mrf.mxu0 }
 0x2d8   :  { %v2761_v17 = vadd.f32 %v5261_v27, %v2760_v19 }
 0x2da   :  { %v2784_v61 = vmax.f32 %v2761_v17, 0.0 }
 0x2de   :  { %v2924_v25 = vpop.permute.xlu0 %2923 }
 0x2e6   :  { %v2926_v62 = vpop.permute.xlu1 %2925  ;;  %v2932_v60 = vpop.permute.xlu2 %2931 }
 0x2e8   :  { %v2763_v34 = vpop.f32.mrf.mxu0 }
 0x2e9   :  { %v2764_v46 = vadd.f32 %v5261_v27, %v2763_v34 }
 0x2eb   :  { %v2785_v0 = vmax.f32 %v2764_v46, 0.0 }
 0x2ed   :  { %v5268_v9 = vsel %vm2700_vm0, %v2785_v0, %v2920_v30 }
 0x2ee   :  { %3146 = vrot.lane.b32.xlu0 %v5268_v9, %s3809_s20  ;;  %v2918_v55 = vpop.permute.xlu1 %2917  ;;  %v2984_v47 = vrot.slane %v5268_v9, 1  ;;  %v2959_v59 = vrot.slane %v5268_v9, 7 }
 0x2ef   :  { %v5282_v33 = vsel %vm2700_vm0, %v2784_v61, %v2918_v55 }
 0x2f0   :  { %v2958_v7 = vrot.slane %v5282_v33, 7  ;;  %v2983_v30 = vrot.slane %v5282_v33, 1 }
 0x2f2   :  { %v5294_v41 = vsel %vm2957_vm1, %v2958_v7, %v2959_v59  ;;  %v2985_v0 = vsel %vm2982_vm10, %v2983_v30, %v2984_v47 }
 0x2f6   :  { %v2930_v35 = vpop.permute.xlu0 %2929 }
 0x2f7   :  { %v2766_v1 = vpop.f32.mrf.mxu0 }
 0x2f8   :  { %v2767_v36 = vadd.f32 %v5261_v27, %v2766_v1 }
 0x2fa   :  { %v2786_v13 = vmax.f32 %v2767_v36, 0.0 }
 0x2fc   :  { %v2943_v10 = vsel %vm2700_vm0, %v2786_v13, %v2922_v31  ;;  %v3015_v31 = vadd.s32 56, %v5265_v54 }
 0x2fd   :  { %3148 = vrot.lane.b32.xlu2 %v2943_v10, %s3809_s20  ;;  %v2986_v28 = vrot.slane %v2943_v10, 1  ;;  %v2961_v15 = vrot.slane %v2943_v10, 7 }
 0x2fe   :  { %v3069_v10 = vand.u32 15, %v3015_v31 }
 0x2ff   :  { %v2769_v20 = vpop.f32.mrf.mxu0  ;;  %v2987_v50 = vsel %vm2982_vm10, %v2984_v47, %v2986_v28  ;;  %v5306_v6 = vsel %vm2957_vm1, %v2959_v59, %v2961_v15 }
 0x300   :  { %v2770_v58 = vadd.f32 %v5261_v27, %v2769_v20  ;;  %v3137_v26 = vsel %vm3129_vm13, %v2987_v50, 0.0  ;;  %v3226_v50 = vld [vmem:[%s5613_s2 + $0x78] sm:$0xff] }
 0x301   :  { %3178 = vrot.lane.b32.xlu1 %v3137_v26, %s3810_s21  ;;  %3259 = vmatpush.msrb.mxu1 %v3226_v50  ;;  %v3224_v26 = vld [vmem:[%s5613_s2 + $0x68] sm:$0xff] }
 0x302   :  { %v2787_v51 = vmax.f32 %v2770_v58, 0.0  ;;  %v3225_v58 = vld [vmem:[%s5613_s2 + $0x70] sm:$0xff]  ;;  %3725 = vmatpush.msra.mxu2 %v3226_v50 }
 0x303   :  { %3260 = vmatpush.msrb.mxu1 %v3225_v58 }
 0x304   :  { %v2944_v16 = vsel %vm2700_vm0, %v2787_v51, %v2924_v25  ;;  %3726 = vmatpush.msra.mxu2 %v3225_v58  ;;  %v3223_v51 = vld [vmem:[%s5613_s2 + $0x60] sm:$0xff]  ;;  %v3222_v25 = vld [vmem:[%s5613_s2 + $0x58] sm:$0xff] }
 0x305   :  { %v2988_v43 = vrot.slane %v2944_v16, 1  ;;  %v2963_v37 = vrot.slane %v2944_v16, 7  ;;  %3261 = vmatpush.msrb.mxu1 %v3224_v26 }
 0x306   :  { %3727 = vmatpush.msra.mxu2 %v3224_v26 }
 0x307   :  { %v2989_v39 = vsel %vm2982_vm10, %v2986_v28, %v2988_v43  ;;  %v5314_v11 = vsel %vm2957_vm1, %v2961_v15, %v2963_v37  ;;  %3262 = vmatpush.msrb.mxu1 %v3223_v51  ;;  %v3218_v15 = vld [vmem:[%s5613_s2 + $0x38] sm:$0xff] }
 0x308   :  { %3180 = vrot.lane.b32.xlu0 %v2989_v39, %s3810_s21  ;;  %3728 = vmatpush.msra.mxu2 %v3223_v51  ;;  %v3219_v39 = vld [vmem:[%s5613_s2 + $0x40] sm:$0xff] }
 0x309   :  { %3150 = vrot.lane.b32.xlu1 %v2944_v16, %s3809_s20  ;;  %v3221_v16 = vld [vmem:[%s5613_s2 + $0x50] sm:$0xff]  ;;  %3263 = vmatpush.msrb.mxu1 %v3222_v25 }
 0x30a   :  { %3729 = vmatpush.msra.mxu2 %v3222_v25 }
 0x30b   :  { %3264 = vmatpush.msrb.mxu1 %v3221_v16 }
 0x30c   :  { %3730 = vmatpush.msra.mxu2 %v3221_v16 }
 0x31e   :  { %v2772_v42 = vpop.f32.mrf.mxu0 }
 0x31f   :  { %v2773_v45 = vadd.f32 %v5261_v27, %v2772_v42  ;;  %v5381_v42 = vadd.s32 16, %v5265_v54 }
 0x321   :  { %v2788_v38 = vmax.f32 %v2773_v45, 0.0  ;;  %v3034_v63 = vand.u32 15, %v5381_v42 }
 0x323   :  { %v2945_v32 = vsel %vm2700_vm0, %v2788_v38, %v2926_v62  ;;  %vm3114_vm11 = vcmp.ne.s32.totalorder %v3034_v63, 0 }
 0x324   :  { %v2990_v3 = vrot.slane %v2945_v32, 1  ;;  %3152 = vrot.lane.b32.xlu0 %v2945_v32, %s3809_s20  ;;  %v2965_v48 = vrot.slane %v2945_v32, 7 }
 0x326   :  { %v2991_v12 = vsel %vm2982_vm10, %v2988_v43, %v2990_v3  ;;  %v2775_v2 = vpop.f32.mrf.mxu0  ;;  %v5323_v56 = vsel %vm2957_vm1, %v2963_v37, %v2965_v48  ;;  %v3220_v43 = vld [vmem:[%s5613_s2 + $0x48] sm:$0xff] }
 0x327   :  { %v3139_v53 = vsel %vm3131_vm14, %v2991_v12, 0.0  ;;  %v2776_v18 = vadd.f32 %v5261_v27, %v2775_v2  ;;  %3731 = vmatpush.msra.mxu2 %v3220_v43  ;;  %3265 = vmatpush.msrb.mxu1 %v3220_v43  ;;  %v3122_v12 = vsel %vm3114_vm11, %v5306_v6, 0.0 }
 0x328   :  { %3182 = vrot.lane.b32.xlu2 %v3139_v53, %s3810_s21 }
 0x329   :  { %v2789_v24 = vmax.f32 %v2776_v18, 0.0  ;;  %3732 = vmatpush.msra.mxu2 %v3219_v39  ;;  %3266 = vmatpush.msrb.mxu1 %v3219_v39  ;;  %v3471_v39 = vld [vmem:[%s5613_s2 + $0xe0] sm:$0xff] }
 0x32a   :  { %3489 = vmatpush.msra.mxu3 %v3471_v39 }
 0x32b   :  { %v2946_v4 = vsel %vm2700_vm0, %v2789_v24, %v2928_v8  ;;  %3733 = vmatpush.msra.mxu2 %v3218_v15  ;;  %3267 = vmatpush.msrb.mxu1 %v3218_v15  ;;  %v3012_v8 = vadd.s32 32, %v5265_v54 }
 0x32c   :  { %v2992_v57 = vrot.slane %v2946_v4, 1  ;;  %v2967_v19 = vrot.slane %v2946_v4, 7 }
 0x32e   :  { %v2778_v52 = vpop.f32.mrf.mxu0  ;;  %v2993_v49 = vsel %vm2982_vm10, %v2990_v3, %v2992_v57  ;;  %v5337_v1 = vsel %vm2957_vm1, %v2965_v48, %v2967_v19  ;;  %v3048_v48 = vand.u32 15, %v3012_v8  ;;  %v3370_v8 = vand.u32 7, %v5273_v22 }
 0x32f   :  { %v2779_v14 = vadd.f32 %v5261_v27, %v2778_v52  ;;  %3184 = vrot.lane.b32.xlu1 %v2993_v49, %s3810_s21 }
 0x330   :  { %3154 = vrot.lane.b32.xlu2 %v2946_v4, %s3809_s20  ;;  %vm3116_vm7 = vcmp.ne.s32.totalorder %v3048_v48, 0  ;;  %vm3416_vm6 = vcmp.ne.s32.totalorder %v3370_v8, 7  ;;  %vm5447_vm13 = vcmp.ne.s32.totalorder %v3370_v8, 0 }
 0x331   :  { %v2790_v40 = vmax.f32 %v2779_v14, 0.0  ;;  %v3124_v52 = vsel %vm3116_vm7, %v5323_v56, 0.0 }
 0x333   :  { %v2947_v29 = vsel %vm2700_vm0, %v2790_v40, %v2930_v35  ;;  %v3020_v40 = vand.u32 15, %v5265_v54  ;;  %v3014_v35 = vadd.s32 48, %v5265_v54 }
 0x334   :  { %v2994_v34 = vrot.slane %v2947_v29, 1  ;;  %v2969_v61 = vrot.slane %v2947_v29, 7 }
 0x335   :  { %vm3112_vm12 = vcmp.ne.s32.totalorder %v3020_v40, 0 }
 0x336   :  { %v2781_v46 = vpop.f32.mrf.mxu0  ;;  %v2995_v44 = vsel %vm2982_vm10, %v2992_v57, %v2994_v34  ;;  %v5346_v55 = vsel %vm2957_vm1, %v2967_v19, %v2969_v61 }
 0x337   :  { %v2782_v62 = vadd.f32 %v5261_v27, %v2781_v46  ;;  %3144 = vrot.lane.b32.xlu1 %v5282_v33, %s3809_s20  ;;  %v3141_v17 = vsel %vm3133_vm3, %v2995_v44, 0.0 }
 0x338   :  { %3176 = vrot.lane.b32.xlu2 %v2985_v0, %s3810_s21  ;;  %3186 = vrot.lane.b32.xlu0 %v3141_v17, %s3810_s21 }
 0x339   :  { %v2791_v36 = vmax.f32 %v2782_v62, 0.0  ;;  %v3062_v62 = vand.u32 15, %v3014_v35 }
 0x33b   :  { %v2948_v9 = vsel %vm2700_vm0, %v2791_v36, %v2932_v60  ;;  %vm3135_vm0 = vcmp.ne.s32.totalorder %v3069_v10, 15  ;;  %vm3118_vm15 = vcmp.ne.s32.totalorder %v3062_v62, 0 }
 0x33c   :  { %v2996_v13 = vrot.slane %v2948_v9, 1  ;;  %v2971_v47 = vrot.slane %v2948_v9, 7  ;;  %v3126_v33 = vsel %vm3118_vm15, %v5346_v55, 0.0  ;;  %v3759_v55 = vld [vmem:[%s5613_s2 + $0x80] ss:$0 sm:$0xff] }
 0x33e   :  { %v2997_v27 = vsel %vm2982_vm10, %v2994_v34, %v2996_v13  ;;  %v3006_v28 = vsel %vm2982_vm10, %v2996_v13, 0.0  ;;  %v5351_v20 = vsel %vm2957_vm1, %v2969_v61, %v2971_v47 }
 0x33f   :  { %3188 = vrot.lane.b32.xlu1 %v2997_v27, %s3810_s21  ;;  %v3143_v59 = vsel %vm3135_vm0, %v3006_v28, 0.0 }
 0x340   :  { %3158 = vrot.lane.b32.xlu2 %v2948_v9, %s3809_s20  ;;  %3156 = vrot.lane.b32.xlu0 %v2947_v29, %s3809_s20  ;;  %s3813_s20 = smov 96  }
 0x348   :  { %3190 = vrot.lane.b32.xlu0 %v3143_v59, %s3810_s21 }
 0x357   :  { %v3149_v37 = vpop.permute.xlu2 %3148 }
 0x358   :  { %v3203_v2 = vsel %vm3200_vm9, %v3122_v12, %v3149_v37 }
 0x360   :  { %v3147_v45 = vpop.permute.xlu0 %3146 }
 0x361   :  { %v3202_v38 = vsel %vm3200_vm9, %v5294_v41, %v3147_v45  ;;  %v3363_v45 = vand.u32 7, %v5265_v54 }
 0x363   :  { %vm3415_vm4 = vcmp.ne.s32.totalorder %v3363_v45, 7  ;;  %vm5451_vm14 = vcmp.ne.s32.totalorder %v3363_v45, 0 }
 0x373   :  { %v3179_v32 = vpop.permute.xlu1 %3178 }
 0x374   :  { %v3211_v3 = vsel %vm3209_vm8, %v3202_v38, %v3179_v32 }
 0x375   :  { %3713 = vmatmul.msk.f32.vlgmr.msra.gmra.mxu2 %vm3227_vm2, %v3211_v3 }
 0x37a   :  { %v3181_v53 = vpop.permute.xlu0 %3180 }
 0x37b   :  { %v3212_v18 = vsel %vm3209_vm8, %v3203_v2, %v3181_v53  ;;  %v3151_v24 = vpop.permute.xlu1 %3150 }
 0x37c   :  { %v3204_v4 = vsel %vm3200_vm9, %v5314_v11, %v3151_v24  ;;  %v2981_v11 = vsel %vm2957_vm1, 0.0, %v2958_v7 }
 0x37d   :  { %3714 = vmatmul.msk.f32.gmra.mxu2 %vm3227_vm2, %v3212_v18  ;;  %v3120_v29 = vsel %vm3112_vm12, %v2981_v11, 0.0  ;;  %v3377_v11 = vand.u32 7, %v5381_v42 }
 0x37f   :  { %vm5462_vm3 = vcmp.ne.s32.totalorder %v3377_v11, 0 }
 0x382   :  { %v3183_v41 = vpop.permute.xlu2 %3182 }
 0x383   :  { %v3213_v57 = vsel %vm3209_vm8, %v3204_v4, %v3183_v41 }
 0x385   :  { %3715 = vmatmul.msk.f32.gmra.mxu2 %vm3227_vm2, %v3213_v57 }
 0x38a   :  { %v3155_v21 = vpop.permute.xlu2 %3154 }
 0x38b   :  { %v3206_v56 = vsel %vm3200_vm9, %v5337_v1, %v3155_v21 }
 0x392   :  { %v3177_v30 = vpop.permute.xlu2 %3176 }
 0x396   :  { %v3153_v6 = vpop.permute.xlu0 %3152 }
 0x397   :  { %v3205_v49 = vsel %vm3200_vm9, %v3124_v52, %v3153_v6 }
 0x39a   :  { %v3159_v60 = vpop.permute.xlu2 %3158 }
 0x39b   :  { %v3208_v9 = vsel %vm3200_vm9, %v5351_v20, %v3159_v60 }
 0x3a1   :  { %v3185_v14 = vpop.permute.xlu1 %3184 }
 0x3a2   :  { %v3214_v5 = vsel %vm3209_vm8, %v3205_v49, %v3185_v14 }
 0x3a3   :  { %3716 = vmatmul.msk.f32.gmra.mxu2 %vm3227_vm2, %v3214_v5 }
 0x3a9   :  { %v3145_v19 = vpop.permute.xlu1 %3144 }
 0x3aa   :  { %v3201_v34 = vsel %vm3200_vm9, %v3120_v29, %v3145_v19  ;;  %v3187_v46 = vpop.permute.xlu0 %3186 }
 0x3ab   :  { %v3210_v0 = vsel %vm3209_vm8, %v3201_v34, %v3177_v30  ;;  %v3215_v44 = vsel %vm3209_vm8, %v3206_v56, %v3187_v46  ;;  %v3564_v30 = vld [vmem:[%s5613_s2 + $0x148] sm:$0xff] }
 0x3ac   :  { %3712 = vmatmul.msk.f32.vlgmr.msrb.gmra.mxu1 %vm3227_vm2, %v3210_v0  ;;  %3717 = vmatmul.msk.f32.gmra.mxu2 %vm3227_vm2, %v3215_v44  ;;  %v3384_v0 = vand.u32 7, %v5298_v23 }
 0x3ae   :  { %vm3418_vm0 = vcmp.ne.s32.totalorder %v3384_v0, 7 }
 0x3b1   :  { %v3189_v17 = vpop.permute.xlu1 %3188 }
 0x3b2   :  { %v3157_v7 = vpop.permute.xlu0 %3156 }
 0x3b3   :  { %v3207_v1 = vsel %vm3200_vm9, %v3126_v33, %v3157_v7  ;;  %vm5475_vm9 = vcmp.ne.s32.totalorder %v3384_v0, 0  ;;  %v3561_v0 = vld [vmem:[%s5613_s2 + $0x130] sm:$0xff] }
 0x3b4   :  { %v3216_v36 = vsel %vm3209_vm8, %v3207_v1, %v3189_v17 }
 0x3b5   :  { %3718 = vmatmul.msk.f32.gmra.mxu2 %vm3227_vm2, %v3216_v36  ;;  %v3595_v36 = vld [vmem:[%s5613_s2 + $0x190] sm:$0xff] }
 0x3ba   :  { %v3191_v61 = vpop.permute.xlu0 %3190 }
 0x3bb   :  { %v3217_v13 = vsel %vm3209_vm8, %v3208_v9, %v3191_v61  ;;  %vm3417_vm8 = vcmp.ne.s32.totalorder %v3377_v11, 7  ;;  %v3470_v61 = vld [vmem:[%s5613_s2 + $0xd8] sm:$0xff] }
 0x3bc   :  { %3490 = vmatpush.msra.mxu3 %v3470_v61 }
 0x3bd   :  { %3719 = vmatmul.msk.f32.gmra.mxu2 %vm3227_vm2, %v3217_v13  ;;  %v3469_v13 = vld [vmem:[%s5613_s2 + $0xd0] sm:$0xff]  ;;  %vm3621_vm2 = vcmask 27648  }
 0x3be   :  { %3491 = vmatpush.msra.mxu3 %v3469_v13 }
 0x3f8   :  { %v3272_v31 = vpop.f32.mrf.mxu2 }
 0x3f9   :  { %3295 = vst.msk [vmem:[#allocation2 + $0x8] sm:$0xff] %vm3293_vm5, %v3272_v31  ;;  %v3468_v31 = vld [vmem:[%s5613_s2 + $0xc8] sm:$0xff] }
 0x3fa   :  { %3492 = vmatpush.msra.mxu3 %v3468_v31 }
 0x400   :  { %v3275_v27 = vpop.f32.mrf.mxu2 }
 0x401   :  { %3296 = vst.msk [vmem:[#allocation2 + $0x10] sm:$0xff] %vm3293_vm5, %v3275_v27  ;;  %v3467_v27 = vld [vmem:[%s5613_s2 + $0xc0] sm:$0xff] }
 0x402   :  { %3493 = vmatpush.msra.mxu3 %v3467_v27 }
 0x408   :  { %v3278_v10 = vpop.f32.mrf.mxu2 }
 0x409   :  { %3297 = vst.msk [vmem:[#allocation2 + $0x18] sm:$0xff] %vm3293_vm5, %v3278_v10  ;;  %v3466_v10 = vld [vmem:[%s5613_s2 + $0xb8] sm:$0xff] }
 0x40a   :  { %3494 = vmatpush.msra.mxu3 %v3466_v10 }
 0x410   :  { %v3304_v47 = vld [vmem:[#allocation2 + $0x10] ss:$2 sm:$0xff]  ;;  %v3312_v28 = vld [vmem:[#allocation2 + $0x11] ss:$2 sm:$0xff] }
 0x411   :  { %v3318_v20 = vmax.f32 %v3304_v47, %v3312_v28  ;;  %v3464_v47 = vld [vmem:[%s5613_s2 + $0xa8] sm:$0xff]  ;;  %v3463_v28 = vld [vmem:[%s5613_s2 + $0xa0] sm:$0xff] }
 0x413   :  { %v3324_v50 = vadd.f32 %v3759_v55, %v3318_v20  ;;  %v3461_v20 = vld [vmem:[%s5613_s2 + $0x90] sm:$0xff] }
 0x415   :  { %v3328_v26 = vmax.f32 %v3324_v50, 0.0  ;;  %v3460_v50 = vld [vmem:[%s5613_s2 + $0x88] sm:$0xff] }
 0x417   :  { %3425 = vrot.lane.b32.xlu0 %v3328_v26, %s3811_s14  ;;  %v3348_v12 = vrot.slane %v3328_v26, 1  ;;  %v3336_v21 = vrot.slane %v3328_v26, 7 }
 0x426   :  { %v3281_v59 = vpop.f32.mrf.mxu2 }
 0x427   :  { %3298 = vst.msk [vmem:[#allocation2 + $0x20] sm:$0xff] %vm3293_vm5, %v3281_v59  ;;  %v3462_v59 = vld [vmem:[%s5613_s2 + $0x98] sm:$0xff] }
 0x429   :  { %v3269_v58 = vpop.f32.mrf.mxu1 }
 0x42a   :  { %3294 = vst.msk [vmem:[#allocation2] sm:$0xff] %vm3293_vm5, %v3269_v58 }
 0x42f   :  { %v3284_v51 = vpop.f32.mrf.mxu2 }
 0x430   :  { %3299 = vst.msk [vmem:[#allocation2 + $0x28] sm:$0xff] %vm3293_vm5, %v3284_v51 }
 0x431   :  { %v3302_v25 = vld [vmem:[#allocation2] ss:$2 sm:$0xff]  ;;  %v3310_v16 = vld [vmem:[#allocation2 + $0x1] ss:$2 sm:$0xff] }
 0x432   :  { %v3317_v43 = vmax.f32 %v3302_v25, %v3310_v16 }
 0x434   :  { %v3323_v15 = vadd.f32 %v3759_v55, %v3317_v43 }
 0x436   :  { %v3327_v63 = vmax.f32 %v3323_v15, 0.0 }
 0x437   :  { %v3306_v38 = vld [vmem:[#allocation2 + $0x20] ss:$2 sm:$0xff]  ;;  %v3314_v32 = vld [vmem:[#allocation2 + $0x21] ss:$2 sm:$0xff] }
 0x438   :  { %3423 = vrot.lane.b32.xlu1 %v3327_v63, %s3811_s14  ;;  %v3287_v3 = vpop.f32.mrf.mxu2  ;;  %v3347_v37 = vrot.slane %v3327_v63, 1  ;;  %v3319_v2 = vmax.f32 %v3306_v38, %v3314_v32  ;;  %v3335_v4 = vrot.slane %v3327_v63, 7 }
 0x439   :  { %3300 = vst.msk [vmem:[#allocation2 + $0x30] sm:$0xff] %vm3293_vm5, %v3287_v3 }
 0x43a   :  { %v3349_v53 = vsel %vm2982_vm10, %v3347_v37, %v3348_v12  ;;  %v3325_v18 = vadd.f32 %v3759_v55, %v3319_v2  ;;  %v5445_v52 = vsel %vm2957_vm1, %v3335_v4, %v3336_v21  ;;  %v3346_v14 = vsel %vm2957_vm1, 0.0, %v3335_v4 }
 0x43b   :  { %v3419_v24 = vsel %vm3415_vm4, %v3349_v53, 0.0  ;;  %v3412_v5 = vsel %vm5447_vm13, %v5445_v52, 0.0  ;;  %v3411_v40 = vsel %vm5451_vm14, %v3346_v14, 0.0  ;;  %v3566_v52 = vld [vmem:[%s5613_s2 + $0x158] sm:$0xff] }
 0x43c   :  { %3439 = vrot.lane.b32.xlu2 %v3419_v24, %s3812_s17  ;;  %v3329_v54 = vmax.f32 %v3325_v18, 0.0  ;;  %v3760_v24 = vld [vmem:[%s5613_s2 + $0xe8] ss:$0 sm:$0xff] }
 0x43e   :  { %v3350_v41 = vrot.slane %v3329_v54, 1  ;;  %v3338_v19 = vrot.slane %v3329_v54, 7 }
 0x440   :  { %v3290_v48 = vpop.f32.mrf.mxu2  ;;  %v3351_v57 = vsel %vm2982_vm10, %v3348_v12, %v3350_v41  ;;  %v3339_v34 = vsel %vm2957_vm1, %v3336_v21, %v3338_v19  ;;  %v3567_v21 = vld [vmem:[%s5613_s2 + $0x160] sm:$0xff] }
 0x441   :  { %3301 = vst.msk [vmem:[#allocation2 + $0x38] sm:$0xff] %vm3293_vm5, %v3290_v48  ;;  %v3420_v6 = vsel %vm3416_vm6, %v3351_v57, 0.0  ;;  %v3413_v44 = vsel %vm5462_vm3, %v3339_v34, 0.0  ;;  %v3563_v34 = vld [vmem:[%s5613_s2 + $0x140] sm:$0xff] }
 0x442   :  { %3441 = vrot.lane.b32.xlu1 %v3420_v6, %s3812_s17  ;;  %v3568_v6 = vld [vmem:[%s5613_s2 + $0x168] sm:$0xff] }
 0x444   :  { %3427 = vrot.lane.b32.xlu2 %v3329_v54, %s3811_s14 }
 0x448   :  { %v3308_v35 = vld [vmem:[#allocation2 + $0x30] ss:$2 sm:$0xff]  ;;  %v3316_v29 = vld [vmem:[#allocation2 + $0x31] ss:$2 sm:$0xff] }
 0x449   :  { %v3320_v56 = vmax.f32 %v3308_v35, %v3316_v29 }
 0x44b   :  { %v3326_v46 = vadd.f32 %v3759_v55, %v3320_v56  ;;  %v3465_v55 = vld [vmem:[%s5613_s2 + $0xb0] sm:$0xff] }
 0x44c   :  { %3495 = vmatpush.msra.mxu3 %v3465_v55  ;;  %v3565_v56 = vld [vmem:[%s5613_s2 + $0x150] sm:$0xff] }
 0x44d   :  { %v3330_v62 = vmax.f32 %v3326_v46, 0.0  ;;  %v3562_v46 = vld [vmem:[%s5613_s2 + $0x138] sm:$0xff] }
 0x44e   :  { %3496 = vmatpush.msra.mxu3 %v3464_v47  ;;  %v3593_v47 = vld [vmem:[%s5613_s2 + $0x180] sm:$0xff] }
 0x44f   :  { %3429 = vrot.lane.b32.xlu1 %v3330_v62, %s3811_s14  ;;  %v3352_v42 = vrot.slane %v3330_v62, 1  ;;  %v3340_v23 = vrot.slane %v3330_v62, 7  ;;  %v3559_v62 = vld [vmem:[%s5613_s2 + $0x120] sm:$0xff] }
 0x450   :  { %3497 = vmatpush.msra.mxu3 %v3463_v28  ;;  %v3592_v28 = vld [vmem:[%s5613_s2 + $0x178] sm:$0xff] }
 0x451   :  { %v3358_v33 = vsel %vm2982_vm10, %v3352_v42, 0.0  ;;  %v3353_v7 = vsel %vm2982_vm10, %v3350_v41, %v3352_v42  ;;  %v3341_v60 = vsel %vm2957_vm1, %v3338_v19, %v3340_v23  ;;  %vm3455_vm10 = vcmask 523264   ;;  %v3558_v42 = vld [vmem:[%s5613_s2 + $0x118] sm:$0xff]  ;;  %v3553_v23 = vld [vmem:[%s5613_s2 + $0xf0] sm:$0xff] }
 0x452   :  { %v3422_v17 = vsel %vm3418_vm0, %v3358_v33, 0.0  ;;  %v3421_v1 = vsel %vm3417_vm8, %v3353_v7, 0.0  ;;  %v3414_v9 = vsel %vm5475_vm9, %v3341_v60, 0.0  ;;  %3498 = vmatpush.msra.mxu3 %v3462_v59  ;;  %vm3472_vm1 = vcmask 785408   ;;  %v3557_v33 = vld [vmem:[%s5613_s2 + $0x110] sm:$0xff]  ;;  %v3556_v7 = vld [vmem:[%s5613_s2 + $0x108] sm:$0xff] }
 0x453   :  { %3445 = vrot.lane.b32.xlu2 %v3422_v17, %s3812_s17  ;;  %3443 = vrot.lane.b32.xlu0 %v3421_v1, %s3812_s17  ;;  %v3555_v17 = vld [vmem:[%s5613_s2 + $0x100] sm:$0xff]  ;;  %v3554_v1 = vld [vmem:[%s5613_s2 + $0xf8] sm:$0xff] }
 0x454   :  { %3499 = vmatpush.msra.mxu3 %v3461_v20  ;;  %v3594_v60 = vld [vmem:[%s5613_s2 + $0x188] sm:$0xff]  ;;  %v3761_v59 = vld [vmem:[%s5613_s2 + $0x170] ss:$0 sm:$0xff] }
 0x456   :  { %3500 = vmatpush.msra.mxu3 %v3460_v50 }
 0x458   :  { %3571 = vmatpush.msrb.mxu3 %v3568_v6 }
 0x45a   :  { %3572 = vmatpush.msrb.mxu3 %v3567_v21 }
 0x45c   :  { %3573 = vmatpush.msrb.mxu3 %v3566_v52 }
 0x45e   :  { %3574 = vmatpush.msrb.mxu3 %v3565_v56 }
 0x460   :  { %3575 = vmatpush.msrb.mxu3 %v3564_v30 }
 0x462   :  { %3576 = vmatpush.msrb.mxu3 %v3563_v34 }
 0x464   :  { %3577 = vmatpush.msrb.mxu3 %v3562_v46 }
 0x466   :  { %3578 = vmatpush.msrb.mxu3 %v3561_v0 }
 0x489   :  { %v3426_v16 = vpop.permute.xlu0 %3425 }
 0x48a   :  { %v3452_v43 = vsel %vm3293_vm5, %v3412_v5, %v3426_v16 }
 0x496   :  { %v3440_v26 = vpop.permute.xlu2 %3439 }
 0x49e   :  { %v3428_v45 = vpop.permute.xlu2 %3427 }
 0x49f   :  { %v3453_v63 = vsel %vm3293_vm5, %v3413_v44, %v3428_v45  ;;  %v3560_v44 = vld [vmem:[%s5613_s2 + $0x128] sm:$0xff] }
 0x4a0   :  { %3579 = vmatpush.msrb.mxu3 %v3560_v44 }
 0x4a2   :  { %3580 = vmatpush.msrb.mxu3 %v3559_v62 }
 0x4a4   :  { %3581 = vmatpush.msrb.mxu3 %v3558_v42 }
 0x4a6   :  { %3582 = vmatpush.msrb.mxu3 %v3557_v33 }
 0x4a8   :  { %3583 = vmatpush.msrb.mxu3 %v3556_v7 }
 0x4aa   :  { %v3424_v58 = vpop.permute.xlu1 %3423  ;;  %3584 = vmatpush.msrb.mxu3 %v3555_v17 }
 0x4ab   :  { %v3451_v51 = vsel %vm3293_vm5, %v3411_v40, %v3424_v58 }
 0x4ac   :  { %v3456_v25 = vsel %vm3455_vm10, %v3451_v51, %v3440_v26  ;;  %3585 = vmatpush.msrb.mxu3 %v3554_v1  ;;  %v3762_v26 = vld [vmem:[%s5613_s2 + $0x198] ss:$0 sm:$0xff] }
 0x4ad   :  { %3720 = vmatmul.msk.f32.vlgmr.msra.gmra.mxu3 %vm3472_vm1, %v3456_v25  ;;  %v3446_v12 = vpop.permute.xlu2 %3445 }
 0x4ae   :  { %3586 = vmatpush.msrb.mxu3 %v3553_v23 }
 0x4b0   :  { %3613 = vmatpush.msra.mxu3 %v3595_v36 }
 0x4b2   :  { %3614 = vmatpush.msra.mxu3 %v3594_v60 }
 0x4b4   :  { %v3442_v39 = vpop.permute.xlu1 %3441  ;;  %3615 = vmatpush.msra.mxu3 %v3593_v47 }
 0x4b5   :  { %v3457_v15 = vsel %vm3455_vm10, %v3452_v43, %v3442_v39 }
 0x4b6   :  { %3721 = vmatmul.msk.f32.gmra.mxu3 %vm3472_vm1, %v3457_v15 }
 0x4b7   :  { %3616 = vmatpush.msra.mxu3 %v3592_v28 }
 0x4c1   :  { %v3430_v3 = vpop.permute.xlu1 %3429 }
 0x4c2   :  { %v3454_v37 = vsel %vm3293_vm5, %v3414_v9, %v3430_v3 }
 0x4c3   :  { %v3459_v2 = vsel %vm3455_vm10, %v3454_v37, %v3446_v12 }
 0x4c5   :  { %v3444_v38 = vpop.permute.xlu0 %3443 }
 0x4c6   :  { %v3458_v32 = vsel %vm3455_vm10, %v3453_v63, %v3444_v38 }
 0x4c7   :  { %3722 = vmatmul.msk.f32.gmra.mxu3 %vm3472_vm1, %v3458_v32 }
 0x4cf   :  { %3723 = vmatmul.msk.f32.gmra.mxu3 %vm3472_vm1, %v3459_v2 }
 0x530   :  { %v3502_v53 = vpop.f32.mrf.mxu3 }
 0x531   :  { %3514 = vst.msk [vmem:[#allocation2] sm:$0xff] %vm3293_vm5, %v3502_v53 }
 0x539   :  { %v3505_v18 = vpop.f32.mrf.mxu3 }
 0x53a   :  { %3515 = vst.msk [vmem:[#allocation2 + $0x8] sm:$0xff] %vm3293_vm5, %v3505_v18 }
 0x541   :  { %v3518_v54 = vld [vmem:[#allocation2] ss:$2 sm:$0xff]  ;;  %v3520_v8 = vld [vmem:[#allocation2 + $0x1] ss:$2 sm:$0xff] }
 0x542   :  { %v3522_v41 = vmax.f32 %v3518_v54, %v3520_v8 }
 0x544   :  { %v3526_v4 = vadd.f32 %v3760_v24, %v3522_v41 }
 0x546   :  { %v3528_v48 = vmax.f32 %v3526_v4, 0.0 }
 0x548   :  { %3530 = vst.msk [vmem:[#allocation2] sm:$0xff] %vm3293_vm5, %v3528_v48 }
 0x54a   :  { %v3508_v57 = vpop.f32.mrf.mxu3 }
 0x54b   :  { %3516 = vst.msk [vmem:[#allocation2 + $0x10] sm:$0xff] %vm3293_vm5, %v3508_v57 }
 0x552   :  { %v3511_v49 = vpop.f32.mrf.mxu3 }
 0x553   :  { %3517 = vst.msk [vmem:[#allocation2 + $0x18] sm:$0xff] %vm3293_vm5, %v3511_v49 }
 0x55a   :  { %v3519_v22 = vld [vmem:[#allocation2 + $0x10] ss:$2 sm:$0xff]  ;;  %v3521_v14 = vld [vmem:[#allocation2 + $0x11] ss:$2 sm:$0xff] }
 0x55b   :  { %v3523_v5 = vmax.f32 %v3519_v22, %v3521_v14 }
 0x55d   :  { %v3527_v40 = vadd.f32 %v3760_v24, %v3523_v5 }
 0x55f   :  { %v3529_v11 = vmax.f32 %v3527_v40, 0.0 }
 0x561   :  { %3531 = vst.msk [vmem:[#allocation2 + $0x8] sm:$0xff] %vm3293_vm5, %v3529_v11 }
 0x568   :  { %v3537_v35 = vld [vmem:[#allocation2 + $0x3] ss:$4 sm:$0xf]  ;;  %v3535_v29 = vld [vmem:[#allocation2 + $0x2] ss:$4 sm:$0xf] }
 0x569   :  { %3547 = vrot.lane.b32.xlu2 %v3537_v35, %s3813_s20  ;;  %3543 = vrot.lane.b32.xlu1 %v3535_v29, %s3812_s17  ;;  %v3533_v19 = vld [vmem:[#allocation2 + $0x1] ss:$4 sm:$0xf]  ;;  %v3532_v13 = vld [vmem:[#allocation2] ss:$4 sm:$0xf] }
 0x56a   :  { %3539 = vrot.lane.b32.xlu0 %v3533_v19, %s3811_s14  ;;  %s3814_s17 = smov [#allocation3]  }
 0x56b   :  { %s3628_s29 = sshll.u32 %s3814_s17, 4  ;;  %s3629_s29 = int_to_ptr.vmem [resolvable:$true] %s3628_s29 }
 0x5c3   :  { %v3548_v27 = vpop.permute.xlu2 %3547 }
 0x5db   :  { %v3544_v9 = vpop.permute.xlu1 %3543 }
 0x5dc   :  { %v3540_v61 = vpop.permute.xlu0 %3539 }
 0x5dd   :  { %v3550_v31 = vsel %vm3293_vm5, %v3532_v13, %v3540_v61 }
 0x5de   :  { %v3551_v10 = vsel %vm3455_vm10, %v3550_v31, %v3544_v9 }
 0x5df   :  { %v3552_v55 = vsel %vm3472_vm1, %v3551_v10, %v3548_v27 }
 0x5e0   :  { %3587 = vmatmul.f32.vlgmr.msrb.gmra.mxu3 %v3552_v55 }
 0x663   :  { %v3588_v20 = vpop.f32.mrf.mxu3 }
 0x664   :  { %v3589_v50 = vadd.f32 %v3761_v59, %v3588_v20 }
 0x666   :  { %v3591_v58 = vmax.f32 %v3589_v50, 0.0 }
 0x668   :  { %3724 = vmatmul.msk.f32.vlgmr.msra.gmra.mxu3 %vm3293_vm5, %v3591_v58 }
 0x6eb   :  { %v3618_v51 = vpop.f32.mrf.mxu3 }
 0x6ec   :  { %v3619_v25 = vadd.f32 %v3762_v26, %v3618_v51 }
 0x6ee   :  { %3622 = vst.msk [vmem:[#allocation3] sm:$0xf] %vm3621_vm2, %v3619_v25 }
 0x6ef   :  { %3633 = dma.vmem_to_hbm [thread:$0]  %s3629_s29, 64, %s3631_s5, [#allocation4]  }
 0x6f0   :  { %3795 = dma.done.wait [#allocation4], 64  }
 0x6f1   :  { %3796 = vsyncadd [#allocation4], 4294967232 }
 0x6f2   :  { %3638 = vsyncpa [#allocation4], 1 }

</bundles_post_ra>
